<compile_context>
chip_gen: v7x
topology: tpu7x:2x2x1
jax: 0.10.0
libtpu: 0.0.40
codegen_flags: <defaults>
</compile_context>

<pallas_src>
import functools
import numpy as np

import jax
import jax.numpy as jnp
from jax.experimental import pallas as pl
from jax.experimental.pallas import tpu as pltpu  # noqa: F401  (TPU backend)

DT = 0.01  # matches torchsde.sdeint(..., dt=0.01)


def _block_diag(a, b):
    za = jnp.zeros((a.shape[0], b.shape[1]), a.dtype)
    zb = jnp.zeros((b.shape[0], a.shape[1]), b.dtype)
    return jnp.concatenate(
        [jnp.concatenate([a, za], axis=1),
         jnp.concatenate([zb, b], axis=1)], axis=0)


# ---------------------------------------------------------------------------
# The single fused kernel
# ---------------------------------------------------------------------------
def latent_sde_kernel(
        # data / noise
        xs_ref, eps0_ref, dw_ref,
        # encoder / qz0
        gru_wih_ref, gru_whh_ref, gru_bih_ref, gru_bhh_ref,
        enc_w_ref, enc_b_ref, qz0_w_ref, qz0_b_ref,
        # precomputed ctx weight/bias for the fused drift layer 1 + g bias
        fh_w1c_ref, fh_b1_ref, g_b1_ref,
        # fused Euler-step weights (f | h | diag-g)
        w1_ref, w2_ref, b2_ref, w3_ref, b3_ref,
        # projector + prior z0
        proj_w_ref, proj_b_ref, pz0_mean_ref, pz0_logstd_ref,
        # output [log_pxs, logqp, mse]
        out_ref,
        *, dt, noise_std):
    T, B, D = xs_ref.shape
    H = gru_whh_ref.shape[0]
    L = proj_w_ref.shape[0]
    H2 = 2 * H
    f32 = jnp.float32

    xs = xs_ref[...]                                       # (T, B, D)
    xs2 = xs.reshape(T * B, D)

    # -------------------- encoder: GRU over reversed time --------------------
    # Hoisted input projection: one batched matmul for all timesteps; kept as
    # a value (vregs), sliced statically inside the unrolled recurrence.
    gi_all = (jnp.dot(xs2, gru_wih_ref[...], preferred_element_type=f32)
              + gru_bih_ref[...])                           # (T*B, 3H)
    whh = gru_whh_ref[...]
    bhh = gru_bhh_ref[...]

    h = jnp.zeros((B, H), f32)
    h_list = [None] * T
    for s in range(T):                                      # fully unrolled
        t = T - 1 - s                                       # reversed walk
        gi = gi_all[t * B:(t + 1) * B]                      # static slice
        gh = jnp.dot(h, whh, preferred_element_type=f32) + bhh
        r = jax.nn.sigmoid(gi[:, :H] + gh[:, :H])
        zg = jax.nn.sigmoid(gi[:, H:H2] + gh[:, H:H2])
        n = jnp.tanh(gi[:, H2:] + r * gh[:, H2:])
        h = (1.0 - zg) * n + zg * h
        h_list[t] = h                                       # forward-time order
    hseq = jnp.concatenate(h_list, axis=0)                  # (T*B, H)

    # Context for every timestep in one batched matmul.
    ctx_all = (jnp.dot(hseq, enc_w_ref[...], preferred_element_type=f32)
               + enc_b_ref[...])                             # (T*B, C)

    # -------------------------- posterior over z0 ----------------------------
    qz0 = (jnp.dot(ctx_all[:B], qz0_w_ref[...], preferred_element_type=f32)
           + qz0_b_ref[...])                                 # (B, 2L)
    qz0_mean = qz0[:, :L]
    qz0_logstd = qz0[:, L:]
    z0 = qz0_mean + jnp.exp(qz0_logstd) * eps0_ref[...]

    # KL(q(z0) || p(z0)) summed over latent dim, mean over batch.
    pm = pz0_mean_ref[...]
    pls = pz0_logstd_ref[...]
    kl = ((pls - qz0_logstd)
          + (jnp.exp(2.0 * qz0_logstd) + (qz0_mean - pm) ** 2)
          / (2.0 * jnp.exp(2.0 * pls)) - 0.5)
    logqp0 = jnp.sum(kl, keepdims=True) / B                  # (1, 1)

    # -------------------- Euler-Maruyama with logqp path ---------------------
    # Per-step layer-1 bias slab: [ctx @ f_w1c + f_b1 | h_b1 | g_b1].
    ctxw = (jnp.dot(ctx_all, fh_w1c_ref[...], preferred_element_type=f32)
            + fh_b1_ref[...])                                # (T*B, 2H)
    bias_slab = jnp.concatenate(
        [ctxw, jnp.broadcast_to(g_b1_ref[...], (T * B, L * H))], axis=1)

    w1 = w1_ref[...]                                         # (L, 2H + L*H)
    w2 = w2_ref[...]                                         # (2H + L*H, 2H + L)
    b2 = b2_ref[...]                                         # (1, 2H + L)
    w3 = w3_ref[...]                                         # (2H, 2L)
    b3 = b3_ref[...]                                         # (1, 2L)
    dw_all = dw_ref[...]                                     # (T-1, B, L), pre-scaled by sqrt(dt)

    z = z0
    z_list = [z0]
    logqp_acc = jnp.zeros((B, 1), f32)
    for i in range(T - 1):                                   # fully unrolled
        # fused layer 1 (f | h | diag-g), single matmul + shared softplus
        a1 = jax.nn.softplus(
            jnp.dot(z, w1, preferred_element_type=f32)
            + bias_slab[(i + 1) * B:(i + 2) * B])
        # fused layer 2 (block-diag): softplus on f/h lanes, sigmoid on g lanes
        pre2 = jnp.dot(a1, w2, preferred_element_type=f32) + b2
        a2 = jax.nn.softplus(pre2[:, :H2])
        g = jax.nn.sigmoid(pre2[:, H2:H2 + L])               # diag diffusion
        # fused layer 3 (f | h)
        a3 = jnp.dot(a2, w3, preferred_element_type=f32) + b3  # (B, 2L)
        f_drift = a3[:, :L]
        h_drift = a3[:, L:]
        u = (f_drift - h_drift) / g
        z = z + f_drift * dt + g * dw_all[i]
        z_list.append(z)
        logqp_acc = logqp_acc + (0.5 * dt) * jnp.sum(u * u, axis=1,
                                                     keepdims=True)
    logqp_path = jnp.sum(logqp_acc, keepdims=True) / B       # (1, 1)

    # ---------------- projector + Gaussian log-prob / MSE --------------------
    zs = jnp.concatenate(z_list, axis=0)                     # (T*B, L)
    xs_hat = (jnp.dot(zs, proj_w_ref[...], preferred_element_type=f32)
              + proj_b_ref[...])                              # (T*B, D)
    diff = xs2 - xs_hat
    inv_var = 1.0 / (noise_std * noise_std)
    log_z = float(np.log(noise_std) + 0.5 * np.log(2.0 * np.pi))
    lp = -0.5 * diff * diff * inv_var - log_z

    logp = jnp.sum(lp, keepdims=True) / B                     # (1, 1)
    mse = jnp.sum(diff * diff, keepdims=True) / (T * B * D)   # (1, 1)
    out_ref[...] = jnp.concatenate([logp, logqp0 + logqp_path, mse], axis=1)


# ---------------------------------------------------------------------------
# Weight packing (fused / block-diagonal layout expected by the kernel)
# ---------------------------------------------------------------------------
def _pack_weights(p):
    L, H = p["h_w1"].shape
    C = p["enc_w"].shape[1]
    f32 = jnp.float32

    f_w1z, f_w1c = p["f_w1"][:L], p["f_w1"][L:]
    fh_w1z = jnp.concatenate([f_w1z, p["h_w1"]], axis=1)              # (L, 2H)
    fh_w1c = jnp.concatenate([f_w1c, jnp.zeros((C, H), f32)], axis=1)  # (C, 2H)
    fh_b1 = jnp.concatenate([p["f_b1"], p["h_b1"]], axis=1)           # (1, 2H)
    fh_w2 = _block_diag(p["f_w2"], p["h_w2"])                         # (2H, 2H)
    fh_b2 = jnp.concatenate([p["f_b2"], p["h_b2"]], axis=1)           # (1, 2H)
    fh_w3 = _block_diag(p["f_w3"], p["h_w3"])                         # (2H, 2L)
    fh_b3 = jnp.concatenate([p["f_b3"], p["h_b3"]], axis=1)           # (1, 2L)

    # g_nets: L scalar MLPs packed block-diagonally.
    eye = jnp.eye(L, dtype=f32)
    g_w1bd = (eye[:, :, None] * p["g_w1"][:, None, :]).reshape(L, L * H)
    g_b1 = p["g_b1"].reshape(1, L * H)
    g_w2bd = (p["g_w2"][:, :, None] * eye[:, None, :]).reshape(L * H, L)

    # Fused per-Euler-step weights: one matmul covers f, h and all g layer 1;
    # a block-diagonal second matmul covers f/h layer 2 and the g outputs.
    w1_full = jnp.concatenate([fh_w1z, g_w1bd], axis=1)               # (L, 2H+L*H)
    w2_full = _block_diag(fh_w2, g_w2bd)                              # (2H+L*H, 2H+L)
    b2_full = jnp.concatenate([fh_b2, p["g_b2"]], axis=1)             # (1, 2H+L)

    return [p["gru_wih"], p["gru_whh"], p["gru_bih"], p["gru_bhh"],
            p["enc_w"], p["enc_b"], p["qz0_w"], p["qz0_b"],
            fh_w1c, fh_b1, g_b1,
            w1_full, w2_full, b2_full, fh_w3, fh_b3,
            p["proj_w"], p["proj_b"], p["pz0_mean"], p["pz0_logstd"]]


# ---------------------------------------------------------------------------
# Wrapper
# ---------------------------------------------------------------------------
def latent_sde_forward(params, xs, ts, noise_std, seed):
    T, B, D = xs.shape
    L = params["proj_w"].shape[0]

    # ts accepted for API parity; uniform spacing == DT is assumed (see TODO).
    try:
        ts_np = np.asarray(ts)
        if ts_np.shape[0] > 1 and not np.allclose(np.diff(ts_np), DT,
                                                  atol=1e-6):
            raise ValueError("latent_sde_forward assumes ts spacing == dt")
    except (TypeError, jax.errors.TracerArrayConversionError):
        pass  # traced ts: cannot check statically

    # Host-side noise (same distribution as torch.randn_like).
    key = jax.random.PRNGKey(seed)
    k0, k1 = jax.random.split(key)
    eps0 = jax.random.normal(k0, (B, L), jnp.float32)
    dw = jax.random.normal(k1, (T - 1, B, L), jnp.float32) * np.sqrt(DT)

    weights = _pack_weights(params)
    kernel = functools.partial(latent_sde_kernel, dt=DT,
                               noise_std=float(noise_std))

    out = pl.pallas_call(
        kernel,
        out_shape=jax.ShapeDtypeStruct((1, 3), jnp.float32),
    )(xs, eps0, dw, *weights)
    return out[0, 0], out[0, 1], out[0, 2]


# ---------------------------------------------------------------------------
# Parameter initialization (PyTorch-default-ish uniform), raw per-net layout.
# ---------------------------------------------------------------------------
def init_params(key, D, L, C, H):
    ks = iter(jax.random.split(key, 32))

    def u(shape, fan_in):
        bound = 1.0 / np.sqrt(max(fan_in, 1))
        return jax.random.uniform(next(ks), shape, jnp.float32, -bound, bound)

    p = {}
    # Encoder: GRU(D->H), gates packed [r | z | n] along the output dim.
    p["gru_wih"] = u((D, 3 * H), H)
    p["gru_whh"] = u((H, 3 * H), H)
    p["gru_bih"] = u((1, 3 * H), H)
    p["gru_bhh"] = u((1, 3 * H), H)
    p["enc_w"] = u((H, C), H)
    p["enc_b"] = u((1, C), H)
    # qz0_net: Linear(C -> 2L)
    p["qz0_w"] = u((C, 2 * L), C)
    p["qz0_b"] = u((1, 2 * L), C)
    # f_net: Linear(L+C,H), Softplus, Linear(H,H), Softplus, Linear(H,L)
    p["f_w1"] = u((L + C, H), L + C)
    p["f_b1"] = u((1, H), L + C)
    p["f_w2"] = u((H, H), H)
    p["f_b2"] = u((1, H), H)
    p["f_w3"] = u((H, L), H)
    p["f_b3"] = u((1, L), H)
    # h_net: Linear(L,H), Softplus, Linear(H,H), Softplus, Linear(H,L)
    p["h_w1"] = u((L, H), L)
    p["h_b1"] = u((1, H), L)
    p["h_w2"] = u((H, H), H)
    p["h_b2"] = u((1, H), H)
    p["h_w3"] = u((H, L), H)
    p["h_b3"] = u((1, L), H)
    # g_nets: L x (Linear(1,H), Softplus, Linear(H,1), Sigmoid)
    p["g_w1"] = u((L, H), 1)
    p["g_b1"] = u((L, H), 1)
    p["g_w2"] = u((L, H), H)
    p["g_b2"] = u((1, L), H)
    # projector: Linear(L -> D); prior z0 params.
    p["proj_w"] = u((L, D), L)
    p["proj_b"] = u((1, D), L)
    p["pz0_mean"] = jnp.zeros((1, L), jnp.float32)
    p["pz0_logstd"] = jnp.zeros((1, L), jnp.float32)
    return p


if __name__ == "__main__":
    # small shapes: data_size=4, latent_size=4, context_size=8, hidden_size=32,
    # batch=8, sequence length T=8  (L*H = 128 -> lane-dense diffusion block)
    D, L, C, H = 4, 4, 8, 32
    B, T = 8, 8

    root = jax.random.PRNGKey(0)
    k_params, k_xs = jax.random.split(root)

    params = init_params(k_params, D, L, C, H)
    xs = jax.random.normal(k_xs, (T, B, D), jnp.float32)    # (T, B, D) time-major
    ts = jnp.arange(T, dtype=jnp.float32) * DT               # evenly spaced == dt
    noise_std = 0.5

    log_pxs, logqp, mse = latent_sde_forward(params, xs, ts, noise_std, seed=0)
    log_pxs, logqp, mse = jax.block_until_ready((log_pxs, logqp, mse))

    assert np.isfinite(float(log_pxs))
    assert np.isfinite(float(logqp))
    assert np.isfinite(float(mse))
    print("KERNEL_OK")
</pallas_src>

<mosaic_0001>
module attributes {stable_mosaic.version = 11 : i64} {
  func.func @latent_sde_kernel(%arg0: memref<8x8x4xf32, #tpu.memory_space<vmem>>, %arg1: memref<8x4xf32, #tpu.memory_space<vmem>>, %arg2: memref<7x8x4xf32, #tpu.memory_space<vmem>>, %arg3: memref<4x96xf32, #tpu.memory_space<vmem>>, %arg4: memref<32x96xf32, #tpu.memory_space<vmem>>, %arg5: memref<1x96xf32, #tpu.memory_space<vmem>>, %arg6: memref<1x96xf32, #tpu.memory_space<vmem>>, %arg7: memref<32x8xf32, #tpu.memory_space<vmem>>, %arg8: memref<1x8xf32, #tpu.memory_space<vmem>>, %arg9: memref<8x8xf32, #tpu.memory_space<vmem>>, %arg10: memref<1x8xf32, #tpu.memory_space<vmem>>, %arg11: memref<8x64xf32, #tpu.memory_space<vmem>>, %arg12: memref<1x64xf32, #tpu.memory_space<vmem>>, %arg13: memref<1x128xf32, #tpu.memory_space<vmem>>, %arg14: memref<4x192xf32, #tpu.memory_space<vmem>>, %arg15: memref<192x68xf32, #tpu.memory_space<vmem>>, %arg16: memref<1x68xf32, #tpu.memory_space<vmem>>, %arg17: memref<64x8xf32, #tpu.memory_space<vmem>>, %arg18: memref<1x8xf32, #tpu.memory_space<vmem>>, %arg19: memref<4x4xf32, #tpu.memory_space<vmem>>, %arg20: memref<1x4xf32, #tpu.memory_space<vmem>>, %arg21: memref<1x4xf32, #tpu.memory_space<vmem>>, %arg22: memref<1x4xf32, #tpu.memory_space<vmem>>, %arg23: memref<1x3xf32, #tpu.memory_space<vmem>>) attributes {dimension_semantics = [], scalar_prefetch = 0 : i64, scratch_operands = 0 : i64, tpu.core_type = #tpu.core_type<tc>} {
    %c0 = arith.constant 0 : index
    %c0_0 = arith.constant 0 : index
    %c0_1 = arith.constant 0 : index
    %0 = vector.load %arg0[%c0, %c0_0, %c0_1] : memref<8x8x4xf32, #tpu.memory_space<vmem>>, vector<8x8x4xf32>
    %1 = vector.shape_cast %0 : vector<8x8x4xf32> to vector<64x4xf32>
    %c0_2 = arith.constant 0 : index
    %c0_3 = arith.constant 0 : index
    %2 = vector.load %arg3[%c0_2, %c0_3] : memref<4x96xf32, #tpu.memory_space<vmem>>, vector<4x96xf32>
    %cst = arith.constant dense<0.000000e+00> : vector<64x96xf32>
    %3 = tpu.matmul %1, %2, %cst {dimension_numbers = #tpu.dot_dimension_numbers<[1], [0], [0], [1], [0, 0, 1, 1], [], []>} : vector<64x4xf32>, vector<4x96xf32>, vector<64x96xf32> -> vector<64x96xf32>
    %c0_4 = arith.constant 0 : index
    %c0_5 = arith.constant 0 : index
    %4 = vector.load %arg5[%c0_4, %c0_5] : memref<1x96xf32, #tpu.memory_space<vmem>>, vector<1x96xf32>
    %5 = vector.broadcast %4 : vector<1x96xf32> to vector<64x96xf32>
    %6 = arith.addf %3, %5 : vector<64x96xf32>
    %c0_6 = arith.constant 0 : index
    %c0_7 = arith.constant 0 : index
    %7 = vector.load %arg4[%c0_6, %c0_7] : memref<32x96xf32, #tpu.memory_space<vmem>>, vector<32x96xf32>
    %c0_8 = arith.constant 0 : index
    %c0_9 = arith.constant 0 : index
    %8 = vector.load %arg6[%c0_8, %c0_9] : memref<1x96xf32, #tpu.memory_space<vmem>>, vector<1x96xf32>
    %cst_10 = arith.constant 0.000000e+00 : f32
    %9 = vector.broadcast %cst_10 : f32 to vector<8x32xf32>
    %10 = vector.extract_strided_slice %6 {offsets = [56, 0], sizes = [8, 96], strides = [1, 1]} : vector<64x96xf32> to vector<8x96xf32>
    %cst_11 = arith.constant dense<0.000000e+00> : vector<8x96xf32>
    %11 = tpu.matmul %9, %7, %cst_11 {dimension_numbers = #tpu.dot_dimension_numbers<[1], [0], [0], [1], [0, 0, 1, 1], [], []>} : vector<8x32xf32>, vector<32x96xf32>, vector<8x96xf32> -> vector<8x96xf32>
    %12 = vector.broadcast %8 : vector<1x96xf32> to vector<8x96xf32>
    %13 = arith.addf %11, %12 : vector<8x96xf32>
    %14 = vector.extract_strided_slice %10 {offsets = [0, 0], sizes = [8, 32], strides = [1, 1]} : vector<8x96xf32> to vector<8x32xf32>
    %15 = vector.extract_strided_slice %13 {offsets = [0, 0], sizes = [8, 32], strides = [1, 1]} : vector<8x96xf32> to vector<8x32xf32>
    %16 = arith.addf %14, %15 : vector<8x32xf32>
    %17 = arith.negf %16 : vector<8x32xf32>
    %18 = math.exp %17 : vector<8x32xf32>
    %cst_12 = arith.constant 1.000000e+00 : f32
    %19 = vector.broadcast %cst_12 : f32 to vector<8x32xf32>
    %20 = arith.addf %19, %18 : vector<8x32xf32>
    %21 = arith.divf %19, %20 : vector<8x32xf32>
    %22 = vector.extract_strided_slice %10 {offsets = [0, 32], sizes = [8, 32], strides = [1, 1]} : vector<8x96xf32> to vector<8x32xf32>
    %23 = vector.extract_strided_slice %13 {offsets = [0, 32], sizes = [8, 32], strides = [1, 1]} : vector<8x96xf32> to vector<8x32xf32>
    %24 = arith.addf %22, %23 : vector<8x32xf32>
    %25 = arith.negf %24 : vector<8x32xf32>
    %26 = math.exp %25 : vector<8x32xf32>
    %cst_13 = arith.constant 1.000000e+00 : f32
    %27 = vector.broadcast %cst_13 : f32 to vector<8x32xf32>
    %28 = arith.addf %27, %26 : vector<8x32xf32>
    %29 = arith.divf %27, %28 : vector<8x32xf32>
    %30 = vector.extract_strided_slice %10 {offsets = [0, 64], sizes = [8, 32], strides = [1, 1]} : vector<8x96xf32> to vector<8x32xf32>
    %31 = vector.extract_strided_slice %13 {offsets = [0, 64], sizes = [8, 32], strides = [1, 1]} : vector<8x96xf32> to vector<8x32xf32>
    %32 = arith.mulf %21, %31 : vector<8x32xf32>
    %33 = arith.addf %30, %32 : vector<8x32xf32>
    %34 = math.tanh %33 : vector<8x32xf32>
    %cst_14 = arith.constant 1.000000e+00 : f32
    %35 = vector.broadcast %cst_14 : f32 to vector<8x32xf32>
    %36 = arith.subf %35, %29 : vector<8x32xf32>
    %37 = arith.mulf %36, %34 : vector<8x32xf32>
    %38 = arith.mulf %29, %9 : vector<8x32xf32>
    %39 = arith.addf %37, %38 : vector<8x32xf32>
    %40 = vector.extract_strided_slice %6 {offsets = [48, 0], sizes = [8, 96], strides = [1, 1]} : vector<64x96xf32> to vector<8x96xf32>
    %cst_15 = arith.constant dense<0.000000e+00> : vector<8x96xf32>
    %41 = tpu.matmul %39, %7, %cst_15 {dimension_numbers = #tpu.dot_dimension_numbers<[1], [0], [0], [1], [0, 0, 1, 1], [], []>} : vector<8x32xf32>, vector<32x96xf32>, vector<8x96xf32> -> vector<8x96xf32>
    %42 = vector.broadcast %8 : vector<1x96xf32> to vector<8x96xf32>
    %43 = arith.addf %41, %42 : vector<8x96xf32>
    %44 = vector.extract_strided_slice %40 {offsets = [0, 0], sizes = [8, 32], strides = [1, 1]} : vector<8x96xf32> to vector<8x32xf32>
    %45 = vector.extract_strided_slice %43 {offsets = [0, 0], sizes = [8, 32], strides = [1, 1]} : vector<8x96xf32> to vector<8x32xf32>
    %46 = arith.addf %44, %45 : vector<8x32xf32>
    %47 = arith.negf %46 : vector<8x32xf32>
    %48 = math.exp %47 : vector<8x32xf32>
    %cst_16 = arith.constant 1.000000e+00 : f32
    %49 = vector.broadcast %cst_16 : f32 to vector<8x32xf32>
    %50 = arith.addf %49, %48 : vector<8x32xf32>
    %51 = arith.divf %49, %50 : vector<8x32xf32>
    %52 = vector.extract_strided_slice %40 {offsets = [0, 32], sizes = [8, 32], strides = [1, 1]} : vector<8x96xf32> to vector<8x32xf32>
    %53 = vector.extract_strided_slice %43 {offsets = [0, 32], sizes = [8, 32], strides = [1, 1]} : vector<8x96xf32> to vector<8x32xf32>
    %54 = arith.addf %52, %53 : vector<8x32xf32>
    %55 = arith.negf %54 : vector<8x32xf32>
    %56 = math.exp %55 : vector<8x32xf32>
    %cst_17 = arith.constant 1.000000e+00 : f32
    %57 = vector.broadcast %cst_17 : f32 to vector<8x32xf32>
    %58 = arith.addf %57, %56 : vector<8x32xf32>
    %59 = arith.divf %57, %58 : vector<8x32xf32>
    %60 = vector.extract_strided_slice %40 {offsets = [0, 64], sizes = [8, 32], strides = [1, 1]} : vector<8x96xf32> to vector<8x32xf32>
    %61 = vector.extract_strided_slice %43 {offsets = [0, 64], sizes = [8, 32], strides = [1, 1]} : vector<8x96xf32> to vector<8x32xf32>
    %62 = arith.mulf %51, %61 : vector<8x32xf32>
    %63 = arith.addf %60, %62 : vector<8x32xf32>
    %64 = math.tanh %63 : vector<8x32xf32>
    %cst_18 = arith.constant 1.000000e+00 : f32
    %65 = vector.broadcast %cst_18 : f32 to vector<8x32xf32>
    %66 = arith.subf %65, %59 : vector<8x32xf32>
    %67 = arith.mulf %66, %64 : vector<8x32xf32>
    %68 = arith.mulf %59, %39 : vector<8x32xf32>
    %69 = arith.addf %67, %68 : vector<8x32xf32>
    %70 = vector.extract_strided_slice %6 {offsets = [40, 0], sizes = [8, 96], strides = [1, 1]} : vector<64x96xf32> to vector<8x96xf32>
    %cst_19 = arith.constant dense<0.000000e+00> : vector<8x96xf32>
    %71 = tpu.matmul %69, %7, %cst_19 {dimension_numbers = #tpu.dot_dimension_numbers<[1], [0], [0], [1], [0, 0, 1, 1], [], []>} : vector<8x32xf32>, vector<32x96xf32>, vector<8x96xf32> -> vector<8x96xf32>
    %72 = vector.broadcast %8 : vector<1x96xf32> to vector<8x96xf32>
    %73 = arith.addf %71, %72 : vector<8x96xf32>
    %74 = vector.extract_strided_slice %70 {offsets = [0, 0], sizes = [8, 32], strides = [1, 1]} : vector<8x96xf32> to vector<8x32xf32>
    %75 = vector.extract_strided_slice %73 {offsets = [0, 0], sizes = [8, 32], strides = [1, 1]} : vector<8x96xf32> to vector<8x32xf32>
    %76 = arith.addf %74, %75 : vector<8x32xf32>
    %77 = arith.negf %76 : vector<8x32xf32>
    %78 = math.exp %77 : vector<8x32xf32>
    %cst_20 = arith.constant 1.000000e+00 : f32
    %79 = vector.broadcast %cst_20 : f32 to vector<8x32xf32>
    %80 = arith.addf %79, %78 : vector<8x32xf32>
    %81 = arith.divf %79, %80 : vector<8x32xf32>
    %82 = vector.extract_strided_slice %70 {offsets = [0, 32], sizes = [8, 32], strides = [1, 1]} : vector<8x96xf32> to vector<8x32xf32>
    %83 = vector.extract_strided_slice %73 {offsets = [0, 32], sizes = [8, 32], strides = [1, 1]} : vector<8x96xf32> to vector<8x32xf32>
    %84 = arith.addf %82, %83 : vector<8x32xf32>
    %85 = arith.negf %84 : vector<8x32xf32>
    %86 = math.exp %85 : vector<8x32xf32>
    %cst_21 = arith.constant 1.000000e+00 : f32
    %87 = vector.broadcast %cst_21 : f32 to vector<8x32xf32>
    %88 = arith.addf %87, %86 : vector<8x32xf32>
    %89 = arith.divf %87, %88 : vector<8x32xf32>
    %90 = vector.extract_strided_slice %70 {offsets = [0, 64], sizes = [8, 32], strides = [1, 1]} : vector<8x96xf32> to vector<8x32xf32>
    %91 = vector.extract_strided_slice %73 {offsets = [0, 64], sizes = [8, 32], strides = [1, 1]} : vector<8x96xf32> to vector<8x32xf32>
    %92 = arith.mulf %81, %91 : vector<8x32xf32>
    %93 = arith.addf %90, %92 : vector<8x32xf32>
    %94 = math.tanh %93 : vector<8x32xf32>
    %cst_22 = arith.constant 1.000000e+00 : f32
    %95 = vector.broadcast %cst_22 : f32 to vector<8x32xf32>
    %96 = arith.subf %95, %89 : vector<8x32xf32>
    %97 = arith.mulf %96, %94 : vector<8x32xf32>
    %98 = arith.mulf %89, %69 : vector<8x32xf32>
    %99 = arith.addf %97, %98 : vector<8x32xf32>
    %100 = vector.extract_strided_slice %6 {offsets = [32, 0], sizes = [8, 96], strides = [1, 1]} : vector<64x96xf32> to vector<8x96xf32>
    %cst_23 = arith.constant dense<0.000000e+00> : vector<8x96xf32>
    %101 = tpu.matmul %99, %7, %cst_23 {dimension_numbers = #tpu.dot_dimension_numbers<[1], [0], [0], [1], [0, 0, 1, 1], [], []>} : vector<8x32xf32>, vector<32x96xf32>, vector<8x96xf32> -> vector<8x96xf32>
    %102 = vector.broadcast %8 : vector<1x96xf32> to vector<8x96xf32>
    %103 = arith.addf %101, %102 : vector<8x96xf32>
    %104 = vector.extract_strided_slice %100 {offsets = [0, 0], sizes = [8, 32], strides = [1, 1]} : vector<8x96xf32> to vector<8x32xf32>
    %105 = vector.extract_strided_slice %103 {offsets = [0, 0], sizes = [8, 32], strides = [1, 1]} : vector<8x96xf32> to vector<8x32xf32>
    %106 = arith.addf %104, %105 : vector<8x32xf32>
    %107 = arith.negf %106 : vector<8x32xf32>
    %108 = math.exp %107 : vector<8x32xf32>
    %cst_24 = arith.constant 1.000000e+00 : f32
    %109 = vector.broadcast %cst_24 : f32 to vector<8x32xf32>
    %110 = arith.addf %109, %108 : vector<8x32xf32>
    %111 = arith.divf %109, %110 : vector<8x32xf32>
    %112 = vector.extract_strided_slice %100 {offsets = [0, 32], sizes = [8, 32], strides = [1, 1]} : vector<8x96xf32> to vector<8x32xf32>
    %113 = vector.extract_strided_slice %103 {offsets = [0, 32], sizes = [8, 32], strides = [1, 1]} : vector<8x96xf32> to vector<8x32xf32>
    %114 = arith.addf %112, %113 : vector<8x32xf32>
    %115 = arith.negf %114 : vector<8x32xf32>
    %116 = math.exp %115 : vector<8x32xf32>
    %cst_25 = arith.constant 1.000000e+00 : f32
    %117 = vector.broadcast %cst_25 : f32 to vector<8x32xf32>
    %118 = arith.addf %117, %116 : vector<8x32xf32>
    %119 = arith.divf %117, %118 : vector<8x32xf32>
    %120 = vector.extract_strided_slice %100 {offsets = [0, 64], sizes = [8, 32], strides = [1, 1]} : vector<8x96xf32> to vector<8x32xf32>
    %121 = vector.extract_strided_slice %103 {offsets = [0, 64], sizes = [8, 32], strides = [1, 1]} : vector<8x96xf32> to vector<8x32xf32>
    %122 = arith.mulf %111, %121 : vector<8x32xf32>
    %123 = arith.addf %120, %122 : vector<8x32xf32>
    %124 = math.tanh %123 : vector<8x32xf32>
    %cst_26 = arith.constant 1.000000e+00 : f32
    %125 = vector.broadcast %cst_26 : f32 to vector<8x32xf32>
    %126 = arith.subf %125, %119 : vector<8x32xf32>
    %127 = arith.mulf %126, %124 : vector<8x32xf32>
    %128 = arith.mulf %119, %99 : vector<8x32xf32>
    %129 = arith.addf %127, %128 : vector<8x32xf32>
    %130 = vector.extract_strided_slice %6 {offsets = [24, 0], sizes = [8, 96], strides = [1, 1]} : vector<64x96xf32> to vector<8x96xf32>
    %cst_27 = arith.constant dense<0.000000e+00> : vector<8x96xf32>
    %131 = tpu.matmul %129, %7, %cst_27 {dimension_numbers = #tpu.dot_dimension_numbers<[1], [0], [0], [1], [0, 0, 1, 1], [], []>} : vector<8x32xf32>, vector<32x96xf32>, vector<8x96xf32> -> vector<8x96xf32>
    %132 = vector.broadcast %8 : vector<1x96xf32> to vector<8x96xf32>
    %133 = arith.addf %131, %132 : vector<8x96xf32>
    %134 = vector.extract_strided_slice %130 {offsets = [0, 0], sizes = [8, 32], strides = [1, 1]} : vector<8x96xf32> to vector<8x32xf32>
    %135 = vector.extract_strided_slice %133 {offsets = [0, 0], sizes = [8, 32], strides = [1, 1]} : vector<8x96xf32> to vector<8x32xf32>
    %136 = arith.addf %134, %135 : vector<8x32xf32>
    %137 = arith.negf %136 : vector<8x32xf32>
    %138 = math.exp %137 : vector<8x32xf32>
    %cst_28 = arith.constant 1.000000e+00 : f32
    %139 = vector.broadcast %cst_28 : f32 to vector<8x32xf32>
    %140 = arith.addf %139, %138 : vector<8x32xf32>
    %141 = arith.divf %139, %140 : vector<8x32xf32>
    %142 = vector.extract_strided_slice %130 {offsets = [0, 32], sizes = [8, 32], strides = [1, 1]} : vector<8x96xf32> to vector<8x32xf32>
    %143 = vector.extract_strided_slice %133 {offsets = [0, 32], sizes = [8, 32], strides = [1, 1]} : vector<8x96xf32> to vector<8x32xf32>
    %144 = arith.addf %142, %143 : vector<8x32xf32>
    %145 = arith.negf %144 : vector<8x32xf32>
    %146 = math.exp %145 : vector<8x32xf32>
    %cst_29 = arith.constant 1.000000e+00 : f32
    %147 = vector.broadcast %cst_29 : f32 to vector<8x32xf32>
    %148 = arith.addf %147, %146 : vector<8x32xf32>
    %149 = arith.divf %147, %148 : vector<8x32xf32>
    %150 = vector.extract_strided_slice %130 {offsets = [0, 64], sizes = [8, 32], strides = [1, 1]} : vector<8x96xf32> to vector<8x32xf32>
    %151 = vector.extract_strided_slice %133 {offsets = [0, 64], sizes = [8, 32], strides = [1, 1]} : vector<8x96xf32> to vector<8x32xf32>
    %152 = arith.mulf %141, %151 : vector<8x32xf32>
    %153 = arith.addf %150, %152 : vector<8x32xf32>
    %154 = math.tanh %153 : vector<8x32xf32>
    %cst_30 = arith.constant 1.000000e+00 : f32
    %155 = vector.broadcast %cst_30 : f32 to vector<8x32xf32>
    %156 = arith.subf %155, %149 : vector<8x32xf32>
    %157 = arith.mulf %156, %154 : vector<8x32xf32>
    %158 = arith.mulf %149, %129 : vector<8x32xf32>
    %159 = arith.addf %157, %158 : vector<8x32xf32>
    %160 = vector.extract_strided_slice %6 {offsets = [16, 0], sizes = [8, 96], strides = [1, 1]} : vector<64x96xf32> to vector<8x96xf32>
    %cst_31 = arith.constant dense<0.000000e+00> : vector<8x96xf32>
    %161 = tpu.matmul %159, %7, %cst_31 {dimension_numbers = #tpu.dot_dimension_numbers<[1], [0], [0], [1], [0, 0, 1, 1], [], []>} : vector<8x32xf32>, vector<32x96xf32>, vector<8x96xf32> -> vector<8x96xf32>
    %162 = vector.broadcast %8 : vector<1x96xf32> to vector<8x96xf32>
    %163 = arith.addf %161, %162 : vector<8x96xf32>
    %164 = vector.extract_strided_slice %160 {offsets = [0, 0], sizes = [8, 32], strides = [1, 1]} : vector<8x96xf32> to vector<8x32xf32>
    %165 = vector.extract_strided_slice %163 {offsets = [0, 0], sizes = [8, 32], strides = [1, 1]} : vector<8x96xf32> to vector<8x32xf32>
    %166 = arith.addf %164, %165 : vector<8x32xf32>
    %167 = arith.negf %166 : vector<8x32xf32>
    %168 = math.exp %167 : vector<8x32xf32>
    %cst_32 = arith.constant 1.000000e+00 : f32
    %169 = vector.broadcast %cst_32 : f32 to vector<8x32xf32>
    %170 = arith.addf %169, %168 : vector<8x32xf32>
    %171 = arith.divf %169, %170 : vector<8x32xf32>
    %172 = vector.extract_strided_slice %160 {offsets = [0, 32], sizes = [8, 32], strides = [1, 1]} : vector<8x96xf32> to vector<8x32xf32>
    %173 = vector.extract_strided_slice %163 {offsets = [0, 32], sizes = [8, 32], strides = [1, 1]} : vector<8x96xf32> to vector<8x32xf32>
    %174 = arith.addf %172, %173 : vector<8x32xf32>
    %175 = arith.negf %174 : vector<8x32xf32>
    %176 = math.exp %175 : vector<8x32xf32>
    %cst_33 = arith.constant 1.000000e+00 : f32
    %177 = vector.broadcast %cst_33 : f32 to vector<8x32xf32>
    %178 = arith.addf %177, %176 : vector<8x32xf32>
    %179 = arith.divf %177, %178 : vector<8x32xf32>
    %180 = vector.extract_strided_slice %160 {offsets = [0, 64], sizes = [8, 32], strides = [1, 1]} : vector<8x96xf32> to vector<8x32xf32>
    %181 = vector.extract_strided_slice %163 {offsets = [0, 64], sizes = [8, 32], strides = [1, 1]} : vector<8x96xf32> to vector<8x32xf32>
    %182 = arith.mulf %171, %181 : vector<8x32xf32>
    %183 = arith.addf %180, %182 : vector<8x32xf32>
    %184 = math.tanh %183 : vector<8x32xf32>
    %cst_34 = arith.constant 1.000000e+00 : f32
    %185 = vector.broadcast %cst_34 : f32 to vector<8x32xf32>
    %186 = arith.subf %185, %179 : vector<8x32xf32>
    %187 = arith.mulf %186, %184 : vector<8x32xf32>
    %188 = arith.mulf %179, %159 : vector<8x32xf32>
    %189 = arith.addf %187, %188 : vector<8x32xf32>
    %190 = vector.extract_strided_slice %6 {offsets = [8, 0], sizes = [8, 96], strides = [1, 1]} : vector<64x96xf32> to vector<8x96xf32>
    %cst_35 = arith.constant dense<0.000000e+00> : vector<8x96xf32>
    %191 = tpu.matmul %189, %7, %cst_35 {dimension_numbers = #tpu.dot_dimension_numbers<[1], [0], [0], [1], [0, 0, 1, 1], [], []>} : vector<8x32xf32>, vector<32x96xf32>, vector<8x96xf32> -> vector<8x96xf32>
    %192 = vector.broadcast %8 : vector<1x96xf32> to vector<8x96xf32>
    %193 = arith.addf %191, %192 : vector<8x96xf32>
    %194 = vector.extract_strided_slice %190 {offsets = [0, 0], sizes = [8, 32], strides = [1, 1]} : vector<8x96xf32> to vector<8x32xf32>
    %195 = vector.extract_strided_slice %193 {offsets = [0, 0], sizes = [8, 32], strides = [1, 1]} : vector<8x96xf32> to vector<8x32xf32>
    %196 = arith.addf %194, %195 : vector<8x32xf32>
    %197 = arith.negf %196 : vector<8x32xf32>
    %198 = math.exp %197 : vector<8x32xf32>
    %cst_36 = arith.constant 1.000000e+00 : f32
    %199 = vector.broadcast %cst_36 : f32 to vector<8x32xf32>
    %200 = arith.addf %199, %198 : vector<8x32xf32>
    %201 = arith.divf %199, %200 : vector<8x32xf32>
    %202 = vector.extract_strided_slice %190 {offsets = [0, 32], sizes = [8, 32], strides = [1, 1]} : vector<8x96xf32> to vector<8x32xf32>
    %203 = vector.extract_strided_slice %193 {offsets = [0, 32], sizes = [8, 32], strides = [1, 1]} : vector<8x96xf32> to vector<8x32xf32>
    %204 = arith.addf %202, %203 : vector<8x32xf32>
    %205 = arith.negf %204 : vector<8x32xf32>
    %206 = math.exp %205 : vector<8x32xf32>
    %cst_37 = arith.constant 1.000000e+00 : f32
    %207 = vector.broadcast %cst_37 : f32 to vector<8x32xf32>
    %208 = arith.addf %207, %206 : vector<8x32xf32>
    %209 = arith.divf %207, %208 : vector<8x32xf32>
    %210 = vector.extract_strided_slice %190 {offsets = [0, 64], sizes = [8, 32], strides = [1, 1]} : vector<8x96xf32> to vector<8x32xf32>
    %211 = vector.extract_strided_slice %193 {offsets = [0, 64], sizes = [8, 32], strides = [1, 1]} : vector<8x96xf32> to vector<8x32xf32>
    %212 = arith.mulf %201, %211 : vector<8x32xf32>
    %213 = arith.addf %210, %212 : vector<8x32xf32>
    %214 = math.tanh %213 : vector<8x32xf32>
    %cst_38 = arith.constant 1.000000e+00 : f32
    %215 = vector.broadcast %cst_38 : f32 to vector<8x32xf32>
    %216 = arith.subf %215, %209 : vector<8x32xf32>
    %217 = arith.mulf %216, %214 : vector<8x32xf32>
    %218 = arith.mulf %209, %189 : vector<8x32xf32>
    %219 = arith.addf %217, %218 : vector<8x32xf32>
    %220 = vector.extract_strided_slice %6 {offsets = [0, 0], sizes = [8, 96], strides = [1, 1]} : vector<64x96xf32> to vector<8x96xf32>
    %cst_39 = arith.constant dense<0.000000e+00> : vector<8x96xf32>
    %221 = tpu.matmul %219, %7, %cst_39 {dimension_numbers = #tpu.dot_dimension_numbers<[1], [0], [0], [1], [0, 0, 1, 1], [], []>} : vector<8x32xf32>, vector<32x96xf32>, vector<8x96xf32> -> vector<8x96xf32>
    %222 = vector.broadcast %8 : vector<1x96xf32> to vector<8x96xf32>
    %223 = arith.addf %221, %222 : vector<8x96xf32>
    %224 = vector.extract_strided_slice %220 {offsets = [0, 0], sizes = [8, 32], strides = [1, 1]} : vector<8x96xf32> to vector<8x32xf32>
    %225 = vector.extract_strided_slice %223 {offsets = [0, 0], sizes = [8, 32], strides = [1, 1]} : vector<8x96xf32> to vector<8x32xf32>
    %226 = arith.addf %224, %225 : vector<8x32xf32>
    %227 = arith.negf %226 : vector<8x32xf32>
    %228 = math.exp %227 : vector<8x32xf32>
    %cst_40 = arith.constant 1.000000e+00 : f32
    %229 = vector.broadcast %cst_40 : f32 to vector<8x32xf32>
    %230 = arith.addf %229, %228 : vector<8x32xf32>
    %231 = arith.divf %229, %230 : vector<8x32xf32>
    %232 = vector.extract_strided_slice %220 {offsets = [0, 32], sizes = [8, 32], strides = [1, 1]} : vector<8x96xf32> to vector<8x32xf32>
    %233 = vector.extract_strided_slice %223 {offsets = [0, 32], sizes = [8, 32], strides = [1, 1]} : vector<8x96xf32> to vector<8x32xf32>
    %234 = arith.addf %232, %233 : vector<8x32xf32>
    %235 = arith.negf %234 : vector<8x32xf32>
    %236 = math.exp %235 : vector<8x32xf32>
    %cst_41 = arith.constant 1.000000e+00 : f32
    %237 = vector.broadcast %cst_41 : f32 to vector<8x32xf32>
    %238 = arith.addf %237, %236 : vector<8x32xf32>
    %239 = arith.divf %237, %238 : vector<8x32xf32>
    %240 = vector.extract_strided_slice %220 {offsets = [0, 64], sizes = [8, 32], strides = [1, 1]} : vector<8x96xf32> to vector<8x32xf32>
    %241 = vector.extract_strided_slice %223 {offsets = [0, 64], sizes = [8, 32], strides = [1, 1]} : vector<8x96xf32> to vector<8x32xf32>
    %242 = arith.mulf %231, %241 : vector<8x32xf32>
    %243 = arith.addf %240, %242 : vector<8x32xf32>
    %244 = math.tanh %243 : vector<8x32xf32>
    %cst_42 = arith.constant 1.000000e+00 : f32
    %245 = vector.broadcast %cst_42 : f32 to vector<8x32xf32>
    %246 = arith.subf %245, %239 : vector<8x32xf32>
    %247 = arith.mulf %246, %244 : vector<8x32xf32>
    %248 = arith.mulf %239, %219 : vector<8x32xf32>
    %249 = arith.addf %247, %248 : vector<8x32xf32>
    %250 = tpu.concatenate %249, %219, %189, %159, %129, %99, %69, %39 in 0 : vector<8x32xf32>, vector<8x32xf32>, vector<8x32xf32>, vector<8x32xf32>, vector<8x32xf32>, vector<8x32xf32>, vector<8x32xf32>, vector<8x32xf32> -> vector<64x32xf32>
    %c0_43 = arith.constant 0 : index
    %c0_44 = arith.constant 0 : index
    %251 = vector.load %arg7[%c0_43, %c0_44] : memref<32x8xf32, #tpu.memory_space<vmem>>, vector<32x8xf32>
    %cst_45 = arith.constant dense<0.000000e+00> : vector<64x8xf32>
    %252 = tpu.matmul %250, %251, %cst_45 {dimension_numbers = #tpu.dot_dimension_numbers<[1], [0], [0], [1], [0, 0, 1, 1], [], []>} : vector<64x32xf32>, vector<32x8xf32>, vector<64x8xf32> -> vector<64x8xf32>
    %c0_46 = arith.constant 0 : index
    %c0_47 = arith.constant 0 : index
    %253 = vector.load %arg8[%c0_46, %c0_47] : memref<1x8xf32, #tpu.memory_space<vmem>>, vector<1x8xf32>
    %254 = vector.broadcast %253 : vector<1x8xf32> to vector<64x8xf32>
    %255 = arith.addf %252, %254 : vector<64x8xf32>
    %256 = vector.extract_strided_slice %255 {offsets = [0, 0], sizes = [8, 8], strides = [1, 1]} : vector<64x8xf32> to vector<8x8xf32>
    %c0_48 = arith.constant 0 : index
    %c0_49 = arith.constant 0 : index
    %257 = vector.load %arg9[%c0_48, %c0_49] : memref<8x8xf32, #tpu.memory_space<vmem>>, vector<8x8xf32>
    %cst_50 = arith.constant dense<0.000000e+00> : vector<8x8xf32>
    %258 = tpu.matmul %256, %257, %cst_50 {dimension_numbers = #tpu.dot_dimension_numbers<[1], [0], [0], [1], [0, 0, 1, 1], [], []>} : vector<8x8xf32>, vector<8x8xf32>, vector<8x8xf32> -> vector<8x8xf32>
    %c0_51 = arith.constant 0 : index
    %c0_52 = arith.constant 0 : index
    %259 = vector.load %arg10[%c0_51, %c0_52] : memref<1x8xf32, #tpu.memory_space<vmem>>, vector<1x8xf32>
    %260 = vector.broadcast %259 : vector<1x8xf32> to vector<8x8xf32>
    %261 = arith.addf %258, %260 : vector<8x8xf32>
    %262 = vector.extract_strided_slice %261 {offsets = [0, 0], sizes = [8, 4], strides = [1, 1]} : vector<8x8xf32> to vector<8x4xf32>
    %263 = vector.extract_strided_slice %261 {offsets = [0, 4], sizes = [8, 4], strides = [1, 1]} : vector<8x8xf32> to vector<8x4xf32>
    %264 = math.exp %263 : vector<8x4xf32>
    %c0_53 = arith.constant 0 : index
    %c0_54 = arith.constant 0 : index
    %265 = vector.load %arg1[%c0_53, %c0_54] : memref<8x4xf32, #tpu.memory_space<vmem>>, vector<8x4xf32>
    %266 = arith.mulf %264, %265 : vector<8x4xf32>
    %267 = arith.addf %262, %266 : vector<8x4xf32>
    %c0_55 = arith.constant 0 : index
    %c0_56 = arith.constant 0 : index
    %268 = vector.load %arg21[%c0_55, %c0_56] : memref<1x4xf32, #tpu.memory_space<vmem>>, vector<1x4xf32>
    %c0_57 = arith.constant 0 : index
    %c0_58 = arith.constant 0 : index
    %269 = vector.load %arg22[%c0_57, %c0_58] : memref<1x4xf32, #tpu.memory_space<vmem>>, vector<1x4xf32>
    %270 = vector.broadcast %269 : vector<1x4xf32> to vector<8x4xf32>
    %271 = arith.subf %270, %263 : vector<8x4xf32>
    %cst_59 = arith.constant 2.000000e+00 : f32
    %272 = vector.broadcast %cst_59 : f32 to vector<8x4xf32>
    %273 = arith.mulf %272, %263 : vector<8x4xf32>
    %274 = math.exp %273 : vector<8x4xf32>
    %275 = vector.broadcast %268 : vector<1x4xf32> to vector<8x4xf32>
    %276 = arith.subf %262, %275 : vector<8x4xf32>
    %277 = arith.mulf %276, %276 : vector<8x4xf32>
    %278 = arith.addf %274, %277 : vector<8x4xf32>
    %cst_60 = arith.constant 2.000000e+00 : f32
    %279 = vector.broadcast %cst_60 : f32 to vector<1x4xf32>
    %280 = arith.mulf %279, %269 : vector<1x4xf32>
    %281 = math.exp %280 : vector<1x4xf32>
    %cst_61 = arith.constant 2.000000e+00 : f32
    %282 = vector.broadcast %cst_61 : f32 to vector<1x4xf32>
    %283 = arith.mulf %282, %281 : vector<1x4xf32>
    %284 = vector.broadcast %283 : vector<1x4xf32> to vector<8x4xf32>
    %285 = arith.divf %278, %284 : vector<8x4xf32>
    %286 = arith.addf %271, %285 : vector<8x4xf32>
    %cst_62 = arith.constant 5.000000e-01 : f32
    %287 = vector.broadcast %cst_62 : f32 to vector<8x4xf32>
    %288 = arith.subf %286, %287 : vector<8x4xf32>
    %289 = vector.shape_cast %288 : vector<8x4xf32> to vector<1x8x4xf32>
    %cst_63 = arith.constant dense<0.000000e+00> : vector<1xf32>
    %290 = vector.multi_reduction <add>, %289, %cst_63 [1, 2] : vector<1x8x4xf32> to vector<1xf32>
    %291 = vector.shape_cast %290 : vector<1xf32> to vector<1x1x1xf32>
    %292 = vector.extract %291[0, 0, 0] : f32 from vector<1x1x1xf32>
    %293 = vector.broadcast %292 : f32 to vector<1x1xf32>
    %cst_64 = arith.constant 8.000000e+00 : f32
    %294 = vector.broadcast %cst_64 : f32 to vector<1x1xf32>
    %295 = arith.divf %293, %294 : vector<1x1xf32>
    %c0_65 = arith.constant 0 : index
    %c0_66 = arith.constant 0 : index
    %296 = vector.load %arg11[%c0_65, %c0_66] : memref<8x64xf32, #tpu.memory_space<vmem>>, vector<8x64xf32>
    %cst_67 = arith.constant dense<0.000000e+00> : vector<64x64xf32>
    %297 = tpu.matmul %255, %296, %cst_67 {dimension_numbers = #tpu.dot_dimension_numbers<[1], [0], [0], [1], [0, 0, 1, 1], [], []>} : vector<64x8xf32>, vector<8x64xf32>, vector<64x64xf32> -> vector<64x64xf32>
    %c0_68 = arith.constant 0 : index
    %c0_69 = arith.constant 0 : index
    %298 = vector.load %arg12[%c0_68, %c0_69] : memref<1x64xf32, #tpu.memory_space<vmem>>, vector<1x64xf32>
    %299 = vector.broadcast %298 : vector<1x64xf32> to vector<64x64xf32>
    %300 = arith.addf %297, %299 : vector<64x64xf32>
    %c0_70 = arith.constant 0 : index
    %c0_71 = arith.constant 0 : index
    %301 = vector.load %arg13[%c0_70, %c0_71] : memref<1x128xf32, #tpu.memory_space<vmem>>, vector<1x128xf32>
    %302 = vector.shape_cast %301 : vector<1x128xf32> to vector<1x128xf32>
    %303 = vector.broadcast %302 : vector<1x128xf32> to vector<64x128xf32>
    %304 = tpu.concatenate %300, %303 in 1 : vector<64x64xf32>, vector<64x128xf32> -> vector<64x192xf32>
    %c0_72 = arith.constant 0 : index
    %c0_73 = arith.constant 0 : index
    %305 = vector.load %arg14[%c0_72, %c0_73] : memref<4x192xf32, #tpu.memory_space<vmem>>, vector<4x192xf32>
    %c0_74 = arith.constant 0 : index
    %c0_75 = arith.constant 0 : index
    %306 = vector.load %arg15[%c0_74, %c0_75] : memref<192x68xf32, #tpu.memory_space<vmem>>, vector<192x68xf32>
    %c0_76 = arith.constant 0 : index
    %c0_77 = arith.constant 0 : index
    %307 = vector.load %arg16[%c0_76, %c0_77] : memref<1x68xf32, #tpu.memory_space<vmem>>, vector<1x68xf32>
    %c0_78 = arith.constant 0 : index
    %c0_79 = arith.constant 0 : index
    %308 = vector.load %arg17[%c0_78, %c0_79] : memref<64x8xf32, #tpu.memory_space<vmem>>, vector<64x8xf32>
    %c0_80 = arith.constant 0 : index
    %c0_81 = arith.constant 0 : index
    %309 = vector.load %arg18[%c0_80, %c0_81] : memref<1x8xf32, #tpu.memory_space<vmem>>, vector<1x8xf32>
    %c0_82 = arith.constant 0 : index
    %c0_83 = arith.constant 0 : index
    %c0_84 = arith.constant 0 : index
    %310 = vector.load %arg2[%c0_82, %c0_83, %c0_84] : memref<7x8x4xf32, #tpu.memory_space<vmem>>, vector<7x8x4xf32>
    %cst_85 = arith.constant 0.000000e+00 : f32
    %311 = vector.broadcast %cst_85 : f32 to vector<8x1xf32>
    %cst_86 = arith.constant dense<0.000000e+00> : vector<8x192xf32>
    %312 = tpu.matmul %267, %305, %cst_86 {dimension_numbers = #tpu.dot_dimension_numbers<[1], [0], [0], [1], [0, 0, 1, 1], [], []>} : vector<8x4xf32>, vector<4x192xf32>, vector<8x192xf32> -> vector<8x192xf32>
    %313 = vector.extract_strided_slice %304 {offsets = [8, 0], sizes = [8, 192], strides = [1, 1]} : vector<64x192xf32> to vector<8x192xf32>
    %314 = arith.addf %312, %313 : vector<8x192xf32>
    %cst_87 = arith.constant 0.000000e+00 : f32
    %315 = vector.broadcast %cst_87 : f32 to vector<8x192xf32>
    %316 = arith.maximumf %314, %315 : vector<8x192xf32>
    %317 = vector.broadcast %cst_87 : f32 to vector<8x192xf32>
    %318 = arith.subf %314, %317 : vector<8x192xf32>
    %319 = arith.cmpf one, %318, %318 : vector<8x192xf32>
    %320 = vector.broadcast %cst_87 : f32 to vector<8x192xf32>
    %321 = arith.addf %314, %320 : vector<8x192xf32>
    %322 = math.absf %318 : vector<8x192xf32>
    %cst_88 = arith.constant 0.000000e+00 : f32
    %323 = vector.broadcast %cst_88 : f32 to vector<8x192xf32>
    %324 = arith.subf %323, %322 : vector<8x192xf32>
    %325 = math.exp %324 : vector<8x192xf32>
    %326 = math.log1p %325 : vector<8x192xf32>
    %327 = arith.addf %316, %326 : vector<8x192xf32>
    %328 = arith.select %319, %321, %327 : vector<8x192xi1>, vector<8x192xf32>
    %cst_89 = arith.constant dense<0.000000e+00> : vector<8x68xf32>
    %329 = tpu.matmul %328, %306, %cst_89 {dimension_numbers = #tpu.dot_dimension_numbers<[1], [0], [0], [1], [0, 0, 1, 1], [], []>} : vector<8x192xf32>, vector<192x68xf32>, vector<8x68xf32> -> vector<8x68xf32>
    %330 = vector.broadcast %307 : vector<1x68xf32> to vector<8x68xf32>
    %331 = arith.addf %329, %330 : vector<8x68xf32>
    %332 = vector.extract_strided_slice %331 {offsets = [0, 0], sizes = [8, 64], strides = [1, 1]} : vector<8x68xf32> to vector<8x64xf32>
    %cst_90 = arith.constant 0.000000e+00 : f32
    %333 = vector.broadcast %cst_90 : f32 to vector<8x64xf32>
    %334 = arith.maximumf %332, %333 : vector<8x64xf32>
    %335 = vector.broadcast %cst_90 : f32 to vector<8x64xf32>
    %336 = arith.subf %332, %335 : vector<8x64xf32>
    %337 = arith.cmpf one, %336, %336 : vector<8x64xf32>
    %338 = vector.broadcast %cst_90 : f32 to vector<8x64xf32>
    %339 = arith.addf %332, %338 : vector<8x64xf32>
    %340 = math.absf %336 : vector<8x64xf32>
    %cst_91 = arith.constant 0.000000e+00 : f32
    %341 = vector.broadcast %cst_91 : f32 to vector<8x64xf32>
    %342 = arith.subf %341, %340 : vector<8x64xf32>
    %343 = math.exp %342 : vector<8x64xf32>
    %344 = math.log1p %343 : vector<8x64xf32>
    %345 = arith.addf %334, %344 : vector<8x64xf32>
    %346 = arith.select %337, %339, %345 : vector<8x64xi1>, vector<8x64xf32>
    %347 = vector.extract_strided_slice %331 {offsets = [0, 64], sizes = [8, 4], strides = [1, 1]} : vector<8x68xf32> to vector<8x4xf32>
    %348 = arith.negf %347 : vector<8x4xf32>
    %349 = math.exp %348 : vector<8x4xf32>
    %cst_92 = arith.constant 1.000000e+00 : f32
    %350 = vector.broadcast %cst_92 : f32 to vector<8x4xf32>
    %351 = arith.addf %350, %349 : vector<8x4xf32>
    %352 = arith.divf %350, %351 : vector<8x4xf32>
    %cst_93 = arith.constant dense<0.000000e+00> : vector<8x8xf32>
    %353 = tpu.matmul %346, %308, %cst_93 {dimension_numbers = #tpu.dot_dimension_numbers<[1], [0], [0], [1], [0, 0, 1, 1], [], []>} : vector<8x64xf32>, vector<64x8xf32>, vector<8x8xf32> -> vector<8x8xf32>
    %354 = vector.broadcast %309 : vector<1x8xf32> to vector<8x8xf32>
    %355 = arith.addf %353, %354 : vector<8x8xf32>
    %356 = vector.extract_strided_slice %355 {offsets = [0, 0], sizes = [8, 4], strides = [1, 1]} : vector<8x8xf32> to vector<8x4xf32>
    %357 = vector.extract_strided_slice %355 {offsets = [0, 4], sizes = [8, 4], strides = [1, 1]} : vector<8x8xf32> to vector<8x4xf32>
    %358 = arith.subf %356, %357 : vector<8x4xf32>
    %359 = arith.divf %358, %352 : vector<8x4xf32>
    %cst_94 = arith.constant 0.00999999977 : f32
    %360 = vector.broadcast %cst_94 : f32 to vector<8x4xf32>
    %361 = arith.mulf %356, %360 : vector<8x4xf32>
    %362 = arith.addf %267, %361 : vector<8x4xf32>
    %363 = vector.extract_strided_slice %310 {offsets = [0, 0, 0], sizes = [1, 8, 4], strides = [1, 1, 1]} : vector<7x8x4xf32> to vector<1x8x4xf32>
    %364 = vector.shape_cast %363 : vector<1x8x4xf32> to vector<8x4xf32>
    %365 = arith.mulf %352, %364 : vector<8x4xf32>
    %366 = arith.addf %362, %365 : vector<8x4xf32>
    %367 = arith.mulf %359, %359 : vector<8x4xf32>
    %cst_95 = arith.constant dense<0.000000e+00> : vector<8xf32>
    %368 = vector.multi_reduction <add>, %367, %cst_95 [1] : vector<8x4xf32> to vector<8xf32>
    %369 = vector.shape_cast %368 : vector<8xf32> to vector<8x1xf32>
    %cst_96 = arith.constant 5.000000e-03 : f32
    %370 = vector.broadcast %cst_96 : f32 to vector<8x1xf32>
    %371 = arith.mulf %370, %369 : vector<8x1xf32>
    %372 = arith.addf %311, %371 : vector<8x1xf32>
    %cst_97 = arith.constant dense<0.000000e+00> : vector<8x192xf32>
    %373 = tpu.matmul %366, %305, %cst_97 {dimension_numbers = #tpu.dot_dimension_numbers<[1], [0], [0], [1], [0, 0, 1, 1], [], []>} : vector<8x4xf32>, vector<4x192xf32>, vector<8x192xf32> -> vector<8x192xf32>
    %374 = vector.extract_strided_slice %304 {offsets = [16, 0], sizes = [8, 192], strides = [1, 1]} : vector<64x192xf32> to vector<8x192xf32>
    %375 = arith.addf %373, %374 : vector<8x192xf32>
    %cst_98 = arith.constant 0.000000e+00 : f32
    %376 = vector.broadcast %cst_98 : f32 to vector<8x192xf32>
    %377 = arith.maximumf %375, %376 : vector<8x192xf32>
    %378 = vector.broadcast %cst_98 : f32 to vector<8x192xf32>
    %379 = arith.subf %375, %378 : vector<8x192xf32>
    %380 = arith.cmpf one, %379, %379 : vector<8x192xf32>
    %381 = vector.broadcast %cst_98 : f32 to vector<8x192xf32>
    %382 = arith.addf %375, %381 : vector<8x192xf32>
    %383 = math.absf %379 : vector<8x192xf32>
    %cst_99 = arith.constant 0.000000e+00 : f32
    %384 = vector.broadcast %cst_99 : f32 to vector<8x192xf32>
    %385 = arith.subf %384, %383 : vector<8x192xf32>
    %386 = math.exp %385 : vector<8x192xf32>
    %387 = math.log1p %386 : vector<8x192xf32>
    %388 = arith.addf %377, %387 : vector<8x192xf32>
    %389 = arith.select %380, %382, %388 : vector<8x192xi1>, vector<8x192xf32>
    %cst_100 = arith.constant dense<0.000000e+00> : vector<8x68xf32>
    %390 = tpu.matmul %389, %306, %cst_100 {dimension_numbers = #tpu.dot_dimension_numbers<[1], [0], [0], [1], [0, 0, 1, 1], [], []>} : vector<8x192xf32>, vector<192x68xf32>, vector<8x68xf32> -> vector<8x68xf32>
    %391 = vector.broadcast %307 : vector<1x68xf32> to vector<8x68xf32>
    %392 = arith.addf %390, %391 : vector<8x68xf32>
    %393 = vector.extract_strided_slice %392 {offsets = [0, 0], sizes = [8, 64], strides = [1, 1]} : vector<8x68xf32> to vector<8x64xf32>
    %cst_101 = arith.constant 0.000000e+00 : f32
    %394 = vector.broadcast %cst_101 : f32 to vector<8x64xf32>
    %395 = arith.maximumf %393, %394 : vector<8x64xf32>
    %396 = vector.broadcast %cst_101 : f32 to vector<8x64xf32>
    %397 = arith.subf %393, %396 : vector<8x64xf32>
    %398 = arith.cmpf one, %397, %397 : vector<8x64xf32>
    %399 = vector.broadcast %cst_101 : f32 to vector<8x64xf32>
    %400 = arith.addf %393, %399 : vector<8x64xf32>
    %401 = math.absf %397 : vector<8x64xf32>
    %cst_102 = arith.constant 0.000000e+00 : f32
    %402 = vector.broadcast %cst_102 : f32 to vector<8x64xf32>
    %403 = arith.subf %402, %401 : vector<8x64xf32>
    %404 = math.exp %403 : vector<8x64xf32>
    %405 = math.log1p %404 : vector<8x64xf32>
    %406 = arith.addf %395, %405 : vector<8x64xf32>
    %407 = arith.select %398, %400, %406 : vector<8x64xi1>, vector<8x64xf32>
    %408 = vector.extract_strided_slice %392 {offsets = [0, 64], sizes = [8, 4], strides = [1, 1]} : vector<8x68xf32> to vector<8x4xf32>
    %409 = arith.negf %408 : vector<8x4xf32>
    %410 = math.exp %409 : vector<8x4xf32>
    %cst_103 = arith.constant 1.000000e+00 : f32
    %411 = vector.broadcast %cst_103 : f32 to vector<8x4xf32>
    %412 = arith.addf %411, %410 : vector<8x4xf32>
    %413 = arith.divf %411, %412 : vector<8x4xf32>
    %cst_104 = arith.constant dense<0.000000e+00> : vector<8x8xf32>
    %414 = tpu.matmul %407, %308, %cst_104 {dimension_numbers = #tpu.dot_dimension_numbers<[1], [0], [0], [1], [0, 0, 1, 1], [], []>} : vector<8x64xf32>, vector<64x8xf32>, vector<8x8xf32> -> vector<8x8xf32>
    %415 = vector.broadcast %309 : vector<1x8xf32> to vector<8x8xf32>
    %416 = arith.addf %414, %415 : vector<8x8xf32>
    %417 = vector.extract_strided_slice %416 {offsets = [0, 0], sizes = [8, 4], strides = [1, 1]} : vector<8x8xf32> to vector<8x4xf32>
    %418 = vector.extract_strided_slice %416 {offsets = [0, 4], sizes = [8, 4], strides = [1, 1]} : vector<8x8xf32> to vector<8x4xf32>
    %419 = arith.subf %417, %418 : vector<8x4xf32>
    %420 = arith.divf %419, %413 : vector<8x4xf32>
    %cst_105 = arith.constant 0.00999999977 : f32
    %421 = vector.broadcast %cst_105 : f32 to vector<8x4xf32>
    %422 = arith.mulf %417, %421 : vector<8x4xf32>
    %423 = arith.addf %366, %422 : vector<8x4xf32>
    %424 = vector.extract_strided_slice %310 {offsets = [1, 0, 0], sizes = [1, 8, 4], strides = [1, 1, 1]} : vector<7x8x4xf32> to vector<1x8x4xf32>
    %425 = vector.shape_cast %424 : vector<1x8x4xf32> to vector<8x4xf32>
    %426 = arith.mulf %413, %425 : vector<8x4xf32>
    %427 = arith.addf %423, %426 : vector<8x4xf32>
    %428 = arith.mulf %420, %420 : vector<8x4xf32>
    %cst_106 = arith.constant dense<0.000000e+00> : vector<8xf32>
    %429 = vector.multi_reduction <add>, %428, %cst_106 [1] : vector<8x4xf32> to vector<8xf32>
    %430 = vector.shape_cast %429 : vector<8xf32> to vector<8x1xf32>
    %cst_107 = arith.constant 5.000000e-03 : f32
    %431 = vector.broadcast %cst_107 : f32 to vector<8x1xf32>
    %432 = arith.mulf %431, %430 : vector<8x1xf32>
    %433 = arith.addf %372, %432 : vector<8x1xf32>
    %cst_108 = arith.constant dense<0.000000e+00> : vector<8x192xf32>
    %434 = tpu.matmul %427, %305, %cst_108 {dimension_numbers = #tpu.dot_dimension_numbers<[1], [0], [0], [1], [0, 0, 1, 1], [], []>} : vector<8x4xf32>, vector<4x192xf32>, vector<8x192xf32> -> vector<8x192xf32>
    %435 = vector.extract_strided_slice %304 {offsets = [24, 0], sizes = [8, 192], strides = [1, 1]} : vector<64x192xf32> to vector<8x192xf32>
    %436 = arith.addf %434, %435 : vector<8x192xf32>
    %cst_109 = arith.constant 0.000000e+00 : f32
    %437 = vector.broadcast %cst_109 : f32 to vector<8x192xf32>
    %438 = arith.maximumf %436, %437 : vector<8x192xf32>
    %439 = vector.broadcast %cst_109 : f32 to vector<8x192xf32>
    %440 = arith.subf %436, %439 : vector<8x192xf32>
    %441 = arith.cmpf one, %440, %440 : vector<8x192xf32>
    %442 = vector.broadcast %cst_109 : f32 to vector<8x192xf32>
    %443 = arith.addf %436, %442 : vector<8x192xf32>
    %444 = math.absf %440 : vector<8x192xf32>
    %cst_110 = arith.constant 0.000000e+00 : f32
    %445 = vector.broadcast %cst_110 : f32 to vector<8x192xf32>
    %446 = arith.subf %445, %444 : vector<8x192xf32>
    %447 = math.exp %446 : vector<8x192xf32>
    %448 = math.log1p %447 : vector<8x192xf32>
    %449 = arith.addf %438, %448 : vector<8x192xf32>
    %450 = arith.select %441, %443, %449 : vector<8x192xi1>, vector<8x192xf32>
    %cst_111 = arith.constant dense<0.000000e+00> : vector<8x68xf32>
    %451 = tpu.matmul %450, %306, %cst_111 {dimension_numbers = #tpu.dot_dimension_numbers<[1], [0], [0], [1], [0, 0, 1, 1], [], []>} : vector<8x192xf32>, vector<192x68xf32>, vector<8x68xf32> -> vector<8x68xf32>
    %452 = vector.broadcast %307 : vector<1x68xf32> to vector<8x68xf32>
    %453 = arith.addf %451, %452 : vector<8x68xf32>
    %454 = vector.extract_strided_slice %453 {offsets = [0, 0], sizes = [8, 64], strides = [1, 1]} : vector<8x68xf32> to vector<8x64xf32>
    %cst_112 = arith.constant 0.000000e+00 : f32
    %455 = vector.broadcast %cst_112 : f32 to vector<8x64xf32>
    %456 = arith.maximumf %454, %455 : vector<8x64xf32>
    %457 = vector.broadcast %cst_112 : f32 to vector<8x64xf32>
    %458 = arith.subf %454, %457 : vector<8x64xf32>
    %459 = arith.cmpf one, %458, %458 : vector<8x64xf32>
    %460 = vector.broadcast %cst_112 : f32 to vector<8x64xf32>
    %461 = arith.addf %454, %460 : vector<8x64xf32>
    %462 = math.absf %458 : vector<8x64xf32>
    %cst_113 = arith.constant 0.000000e+00 : f32
    %463 = vector.broadcast %cst_113 : f32 to vector<8x64xf32>
    %464 = arith.subf %463, %462 : vector<8x64xf32>
    %465 = math.exp %464 : vector<8x64xf32>
    %466 = math.log1p %465 : vector<8x64xf32>
    %467 = arith.addf %456, %466 : vector<8x64xf32>
    %468 = arith.select %459, %461, %467 : vector<8x64xi1>, vector<8x64xf32>
    %469 = vector.extract_strided_slice %453 {offsets = [0, 64], sizes = [8, 4], strides = [1, 1]} : vector<8x68xf32> to vector<8x4xf32>
    %470 = arith.negf %469 : vector<8x4xf32>
    %471 = math.exp %470 : vector<8x4xf32>
    %cst_114 = arith.constant 1.000000e+00 : f32
    %472 = vector.broadcast %cst_114 : f32 to vector<8x4xf32>
    %473 = arith.addf %472, %471 : vector<8x4xf32>
    %474 = arith.divf %472, %473 : vector<8x4xf32>
    %cst_115 = arith.constant dense<0.000000e+00> : vector<8x8xf32>
    %475 = tpu.matmul %468, %308, %cst_115 {dimension_numbers = #tpu.dot_dimension_numbers<[1], [0], [0], [1], [0, 0, 1, 1], [], []>} : vector<8x64xf32>, vector<64x8xf32>, vector<8x8xf32> -> vector<8x8xf32>
    %476 = vector.broadcast %309 : vector<1x8xf32> to vector<8x8xf32>
    %477 = arith.addf %475, %476 : vector<8x8xf32>
    %478 = vector.extract_strided_slice %477 {offsets = [0, 0], sizes = [8, 4], strides = [1, 1]} : vector<8x8xf32> to vector<8x4xf32>
    %479 = vector.extract_strided_slice %477 {offsets = [0, 4], sizes = [8, 4], strides = [1, 1]} : vector<8x8xf32> to vector<8x4xf32>
    %480 = arith.subf %478, %479 : vector<8x4xf32>
    %481 = arith.divf %480, %474 : vector<8x4xf32>
    %cst_116 = arith.constant 0.00999999977 : f32
    %482 = vector.broadcast %cst_116 : f32 to vector<8x4xf32>
    %483 = arith.mulf %478, %482 : vector<8x4xf32>
    %484 = arith.addf %427, %483 : vector<8x4xf32>
    %485 = vector.extract_strided_slice %310 {offsets = [2, 0, 0], sizes = [1, 8, 4], strides = [1, 1, 1]} : vector<7x8x4xf32> to vector<1x8x4xf32>
    %486 = vector.shape_cast %485 : vector<1x8x4xf32> to vector<8x4xf32>
    %487 = arith.mulf %474, %486 : vector<8x4xf32>
    %488 = arith.addf %484, %487 : vector<8x4xf32>
    %489 = arith.mulf %481, %481 : vector<8x4xf32>
    %cst_117 = arith.constant dense<0.000000e+00> : vector<8xf32>
    %490 = vector.multi_reduction <add>, %489, %cst_117 [1] : vector<8x4xf32> to vector<8xf32>
    %491 = vector.shape_cast %490 : vector<8xf32> to vector<8x1xf32>
    %cst_118 = arith.constant 5.000000e-03 : f32
    %492 = vector.broadcast %cst_118 : f32 to vector<8x1xf32>
    %493 = arith.mulf %492, %491 : vector<8x1xf32>
    %494 = arith.addf %433, %493 : vector<8x1xf32>
    %cst_119 = arith.constant dense<0.000000e+00> : vector<8x192xf32>
    %495 = tpu.matmul %488, %305, %cst_119 {dimension_numbers = #tpu.dot_dimension_numbers<[1], [0], [0], [1], [0, 0, 1, 1], [], []>} : vector<8x4xf32>, vector<4x192xf32>, vector<8x192xf32> -> vector<8x192xf32>
    %496 = vector.extract_strided_slice %304 {offsets = [32, 0], sizes = [8, 192], strides = [1, 1]} : vector<64x192xf32> to vector<8x192xf32>
    %497 = arith.addf %495, %496 : vector<8x192xf32>
    %cst_120 = arith.constant 0.000000e+00 : f32
    %498 = vector.broadcast %cst_120 : f32 to vector<8x192xf32>
    %499 = arith.maximumf %497, %498 : vector<8x192xf32>
    %500 = vector.broadcast %cst_120 : f32 to vector<8x192xf32>
    %501 = arith.subf %497, %500 : vector<8x192xf32>
    %502 = arith.cmpf one, %501, %501 : vector<8x192xf32>
    %503 = vector.broadcast %cst_120 : f32 to vector<8x192xf32>
    %504 = arith.addf %497, %503 : vector<8x192xf32>
    %505 = math.absf %501 : vector<8x192xf32>
    %cst_121 = arith.constant 0.000000e+00 : f32
    %506 = vector.broadcast %cst_121 : f32 to vector<8x192xf32>
    %507 = arith.subf %506, %505 : vector<8x192xf32>
    %508 = math.exp %507 : vector<8x192xf32>
    %509 = math.log1p %508 : vector<8x192xf32>
    %510 = arith.addf %499, %509 : vector<8x192xf32>
    %511 = arith.select %502, %504, %510 : vector<8x192xi1>, vector<8x192xf32>
    %cst_122 = arith.constant dense<0.000000e+00> : vector<8x68xf32>
    %512 = tpu.matmul %511, %306, %cst_122 {dimension_numbers = #tpu.dot_dimension_numbers<[1], [0], [0], [1], [0, 0, 1, 1], [], []>} : vector<8x192xf32>, vector<192x68xf32>, vector<8x68xf32> -> vector<8x68xf32>
    %513 = vector.broadcast %307 : vector<1x68xf32> to vector<8x68xf32>
    %514 = arith.addf %512, %513 : vector<8x68xf32>
    %515 = vector.extract_strided_slice %514 {offsets = [0, 0], sizes = [8, 64], strides = [1, 1]} : vector<8x68xf32> to vector<8x64xf32>
    %cst_123 = arith.constant 0.000000e+00 : f32
    %516 = vector.broadcast %cst_123 : f32 to vector<8x64xf32>
    %517 = arith.maximumf %515, %516 : vector<8x64xf32>
    %518 = vector.broadcast %cst_123 : f32 to vector<8x64xf32>
    %519 = arith.subf %515, %518 : vector<8x64xf32>
    %520 = arith.cmpf one, %519, %519 : vector<8x64xf32>
    %521 = vector.broadcast %cst_123 : f32 to vector<8x64xf32>
    %522 = arith.addf %515, %521 : vector<8x64xf32>
    %523 = math.absf %519 : vector<8x64xf32>
    %cst_124 = arith.constant 0.000000e+00 : f32
    %524 = vector.broadcast %cst_124 : f32 to vector<8x64xf32>
    %525 = arith.subf %524, %523 : vector<8x64xf32>
    %526 = math.exp %525 : vector<8x64xf32>
    %527 = math.log1p %526 : vector<8x64xf32>
    %528 = arith.addf %517, %527 : vector<8x64xf32>
    %529 = arith.select %520, %522, %528 : vector<8x64xi1>, vector<8x64xf32>
    %530 = vector.extract_strided_slice %514 {offsets = [0, 64], sizes = [8, 4], strides = [1, 1]} : vector<8x68xf32> to vector<8x4xf32>
    %531 = arith.negf %530 : vector<8x4xf32>
    %532 = math.exp %531 : vector<8x4xf32>
    %cst_125 = arith.constant 1.000000e+00 : f32
    %533 = vector.broadcast %cst_125 : f32 to vector<8x4xf32>
    %534 = arith.addf %533, %532 : vector<8x4xf32>
    %535 = arith.divf %533, %534 : vector<8x4xf32>
    %cst_126 = arith.constant dense<0.000000e+00> : vector<8x8xf32>
    %536 = tpu.matmul %529, %308, %cst_126 {dimension_numbers = #tpu.dot_dimension_numbers<[1], [0], [0], [1], [0, 0, 1, 1], [], []>} : vector<8x64xf32>, vector<64x8xf32>, vector<8x8xf32> -> vector<8x8xf32>
    %537 = vector.broadcast %309 : vector<1x8xf32> to vector<8x8xf32>
    %538 = arith.addf %536, %537 : vector<8x8xf32>
    %539 = vector.extract_strided_slice %538 {offsets = [0, 0], sizes = [8, 4], strides = [1, 1]} : vector<8x8xf32> to vector<8x4xf32>
    %540 = vector.extract_strided_slice %538 {offsets = [0, 4], sizes = [8, 4], strides = [1, 1]} : vector<8x8xf32> to vector<8x4xf32>
    %541 = arith.subf %539, %540 : vector<8x4xf32>
    %542 = arith.divf %541, %535 : vector<8x4xf32>
    %cst_127 = arith.constant 0.00999999977 : f32
    %543 = vector.broadcast %cst_127 : f32 to vector<8x4xf32>
    %544 = arith.mulf %539, %543 : vector<8x4xf32>
    %545 = arith.addf %488, %544 : vector<8x4xf32>
    %546 = vector.extract_strided_slice %310 {offsets = [3, 0, 0], sizes = [1, 8, 4], strides = [1, 1, 1]} : vector<7x8x4xf32> to vector<1x8x4xf32>
    %547 = vector.shape_cast %546 : vector<1x8x4xf32> to vector<8x4xf32>
    %548 = arith.mulf %535, %547 : vector<8x4xf32>
    %549 = arith.addf %545, %548 : vector<8x4xf32>
    %550 = arith.mulf %542, %542 : vector<8x4xf32>
    %cst_128 = arith.constant dense<0.000000e+00> : vector<8xf32>
    %551 = vector.multi_reduction <add>, %550, %cst_128 [1] : vector<8x4xf32> to vector<8xf32>
    %552 = vector.shape_cast %551 : vector<8xf32> to vector<8x1xf32>
    %cst_129 = arith.constant 5.000000e-03 : f32
    %553 = vector.broadcast %cst_129 : f32 to vector<8x1xf32>
    %554 = arith.mulf %553, %552 : vector<8x1xf32>
    %555 = arith.addf %494, %554 : vector<8x1xf32>
    %cst_130 = arith.constant dense<0.000000e+00> : vector<8x192xf32>
    %556 = tpu.matmul %549, %305, %cst_130 {dimension_numbers = #tpu.dot_dimension_numbers<[1], [0], [0], [1], [0, 0, 1, 1], [], []>} : vector<8x4xf32>, vector<4x192xf32>, vector<8x192xf32> -> vector<8x192xf32>
    %557 = vector.extract_strided_slice %304 {offsets = [40, 0], sizes = [8, 192], strides = [1, 1]} : vector<64x192xf32> to vector<8x192xf32>
    %558 = arith.addf %556, %557 : vector<8x192xf32>
    %cst_131 = arith.constant 0.000000e+00 : f32
    %559 = vector.broadcast %cst_131 : f32 to vector<8x192xf32>
    %560 = arith.maximumf %558, %559 : vector<8x192xf32>
    %561 = vector.broadcast %cst_131 : f32 to vector<8x192xf32>
    %562 = arith.subf %558, %561 : vector<8x192xf32>
    %563 = arith.cmpf one, %562, %562 : vector<8x192xf32>
    %564 = vector.broadcast %cst_131 : f32 to vector<8x192xf32>
    %565 = arith.addf %558, %564 : vector<8x192xf32>
    %566 = math.absf %562 : vector<8x192xf32>
    %cst_132 = arith.constant 0.000000e+00 : f32
    %567 = vector.broadcast %cst_132 : f32 to vector<8x192xf32>
    %568 = arith.subf %567, %566 : vector<8x192xf32>
    %569 = math.exp %568 : vector<8x192xf32>
    %570 = math.log1p %569 : vector<8x192xf32>
    %571 = arith.addf %560, %570 : vector<8x192xf32>
    %572 = arith.select %563, %565, %571 : vector<8x192xi1>, vector<8x192xf32>
    %cst_133 = arith.constant dense<0.000000e+00> : vector<8x68xf32>
    %573 = tpu.matmul %572, %306, %cst_133 {dimension_numbers = #tpu.dot_dimension_numbers<[1], [0], [0], [1], [0, 0, 1, 1], [], []>} : vector<8x192xf32>, vector<192x68xf32>, vector<8x68xf32> -> vector<8x68xf32>
    %574 = vector.broadcast %307 : vector<1x68xf32> to vector<8x68xf32>
    %575 = arith.addf %573, %574 : vector<8x68xf32>
    %576 = vector.extract_strided_slice %575 {offsets = [0, 0], sizes = [8, 64], strides = [1, 1]} : vector<8x68xf32> to vector<8x64xf32>
    %cst_134 = arith.constant 0.000000e+00 : f32
    %577 = vector.broadcast %cst_134 : f32 to vector<8x64xf32>
    %578 = arith.maximumf %576, %577 : vector<8x64xf32>
    %579 = vector.broadcast %cst_134 : f32 to vector<8x64xf32>
    %580 = arith.subf %576, %579 : vector<8x64xf32>
    %581 = arith.cmpf one, %580, %580 : vector<8x64xf32>
    %582 = vector.broadcast %cst_134 : f32 to vector<8x64xf32>
    %583 = arith.addf %576, %582 : vector<8x64xf32>
    %584 = math.absf %580 : vector<8x64xf32>
    %cst_135 = arith.constant 0.000000e+00 : f32
    %585 = vector.broadcast %cst_135 : f32 to vector<8x64xf32>
    %586 = arith.subf %585, %584 : vector<8x64xf32>
    %587 = math.exp %586 : vector<8x64xf32>
    %588 = math.log1p %587 : vector<8x64xf32>
    %589 = arith.addf %578, %588 : vector<8x64xf32>
    %590 = arith.select %581, %583, %589 : vector<8x64xi1>, vector<8x64xf32>
    %591 = vector.extract_strided_slice %575 {offsets = [0, 64], sizes = [8, 4], strides = [1, 1]} : vector<8x68xf32> to vector<8x4xf32>
    %592 = arith.negf %591 : vector<8x4xf32>
    %593 = math.exp %592 : vector<8x4xf32>
    %cst_136 = arith.constant 1.000000e+00 : f32
    %594 = vector.broadcast %cst_136 : f32 to vector<8x4xf32>
    %595 = arith.addf %594, %593 : vector<8x4xf32>
    %596 = arith.divf %594, %595 : vector<8x4xf32>
    %cst_137 = arith.constant dense<0.000000e+00> : vector<8x8xf32>
    %597 = tpu.matmul %590, %308, %cst_137 {dimension_numbers = #tpu.dot_dimension_numbers<[1], [0], [0], [1], [0, 0, 1, 1], [], []>} : vector<8x64xf32>, vector<64x8xf32>, vector<8x8xf32> -> vector<8x8xf32>
    %598 = vector.broadcast %309 : vector<1x8xf32> to vector<8x8xf32>
    %599 = arith.addf %597, %598 : vector<8x8xf32>
    %600 = vector.extract_strided_slice %599 {offsets = [0, 0], sizes = [8, 4], strides = [1, 1]} : vector<8x8xf32> to vector<8x4xf32>
    %601 = vector.extract_strided_slice %599 {offsets = [0, 4], sizes = [8, 4], strides = [1, 1]} : vector<8x8xf32> to vector<8x4xf32>
    %602 = arith.subf %600, %601 : vector<8x4xf32>
    %603 = arith.divf %602, %596 : vector<8x4xf32>
    %cst_138 = arith.constant 0.00999999977 : f32
    %604 = vector.broadcast %cst_138 : f32 to vector<8x4xf32>
    %605 = arith.mulf %600, %604 : vector<8x4xf32>
    %606 = arith.addf %549, %605 : vector<8x4xf32>
    %607 = vector.extract_strided_slice %310 {offsets = [4, 0, 0], sizes = [1, 8, 4], strides = [1, 1, 1]} : vector<7x8x4xf32> to vector<1x8x4xf32>
    %608 = vector.shape_cast %607 : vector<1x8x4xf32> to vector<8x4xf32>
    %609 = arith.mulf %596, %608 : vector<8x4xf32>
    %610 = arith.addf %606, %609 : vector<8x4xf32>
    %611 = arith.mulf %603, %603 : vector<8x4xf32>
    %cst_139 = arith.constant dense<0.000000e+00> : vector<8xf32>
    %612 = vector.multi_reduction <add>, %611, %cst_139 [1] : vector<8x4xf32> to vector<8xf32>
    %613 = vector.shape_cast %612 : vector<8xf32> to vector<8x1xf32>
    %cst_140 = arith.constant 5.000000e-03 : f32
    %614 = vector.broadcast %cst_140 : f32 to vector<8x1xf32>
    %615 = arith.mulf %614, %613 : vector<8x1xf32>
    %616 = arith.addf %555, %615 : vector<8x1xf32>
    %cst_141 = arith.constant dense<0.000000e+00> : vector<8x192xf32>
    %617 = tpu.matmul %610, %305, %cst_141 {dimension_numbers = #tpu.dot_dimension_numbers<[1], [0], [0], [1], [0, 0, 1, 1], [], []>} : vector<8x4xf32>, vector<4x192xf32>, vector<8x192xf32> -> vector<8x192xf32>
    %618 = vector.extract_strided_slice %304 {offsets = [48, 0], sizes = [8, 192], strides = [1, 1]} : vector<64x192xf32> to vector<8x192xf32>
    %619 = arith.addf %617, %618 : vector<8x192xf32>
    %cst_142 = arith.constant 0.000000e+00 : f32
    %620 = vector.broadcast %cst_142 : f32 to vector<8x192xf32>
    %621 = arith.maximumf %619, %620 : vector<8x192xf32>
    %622 = vector.broadcast %cst_142 : f32 to vector<8x192xf32>
    %623 = arith.subf %619, %622 : vector<8x192xf32>
    %624 = arith.cmpf one, %623, %623 : vector<8x192xf32>
    %625 = vector.broadcast %cst_142 : f32 to vector<8x192xf32>
    %626 = arith.addf %619, %625 : vector<8x192xf32>
    %627 = math.absf %623 : vector<8x192xf32>
    %cst_143 = arith.constant 0.000000e+00 : f32
    %628 = vector.broadcast %cst_143 : f32 to vector<8x192xf32>
    %629 = arith.subf %628, %627 : vector<8x192xf32>
    %630 = math.exp %629 : vector<8x192xf32>
    %631 = math.log1p %630 : vector<8x192xf32>
    %632 = arith.addf %621, %631 : vector<8x192xf32>
    %633 = arith.select %624, %626, %632 : vector<8x192xi1>, vector<8x192xf32>
    %cst_144 = arith.constant dense<0.000000e+00> : vector<8x68xf32>
    %634 = tpu.matmul %633, %306, %cst_144 {dimension_numbers = #tpu.dot_dimension_numbers<[1], [0], [0], [1], [0, 0, 1, 1], [], []>} : vector<8x192xf32>, vector<192x68xf32>, vector<8x68xf32> -> vector<8x68xf32>
    %635 = vector.broadcast %307 : vector<1x68xf32> to vector<8x68xf32>
    %636 = arith.addf %634, %635 : vector<8x68xf32>
    %637 = vector.extract_strided_slice %636 {offsets = [0, 0], sizes = [8, 64], strides = [1, 1]} : vector<8x68xf32> to vector<8x64xf32>
    %cst_145 = arith.constant 0.000000e+00 : f32
    %638 = vector.broadcast %cst_145 : f32 to vector<8x64xf32>
    %639 = arith.maximumf %637, %638 : vector<8x64xf32>
    %640 = vector.broadcast %cst_145 : f32 to vector<8x64xf32>
    %641 = arith.subf %637, %640 : vector<8x64xf32>
    %642 = arith.cmpf one, %641, %641 : vector<8x64xf32>
    %643 = vector.broadcast %cst_145 : f32 to vector<8x64xf32>
    %644 = arith.addf %637, %643 : vector<8x64xf32>
    %645 = math.absf %641 : vector<8x64xf32>
    %cst_146 = arith.constant 0.000000e+00 : f32
    %646 = vector.broadcast %cst_146 : f32 to vector<8x64xf32>
    %647 = arith.subf %646, %645 : vector<8x64xf32>
    %648 = math.exp %647 : vector<8x64xf32>
    %649 = math.log1p %648 : vector<8x64xf32>
    %650 = arith.addf %639, %649 : vector<8x64xf32>
    %651 = arith.select %642, %644, %650 : vector<8x64xi1>, vector<8x64xf32>
    %652 = vector.extract_strided_slice %636 {offsets = [0, 64], sizes = [8, 4], strides = [1, 1]} : vector<8x68xf32> to vector<8x4xf32>
    %653 = arith.negf %652 : vector<8x4xf32>
    %654 = math.exp %653 : vector<8x4xf32>
    %cst_147 = arith.constant 1.000000e+00 : f32
    %655 = vector.broadcast %cst_147 : f32 to vector<8x4xf32>
    %656 = arith.addf %655, %654 : vector<8x4xf32>
    %657 = arith.divf %655, %656 : vector<8x4xf32>
    %cst_148 = arith.constant dense<0.000000e+00> : vector<8x8xf32>
    %658 = tpu.matmul %651, %308, %cst_148 {dimension_numbers = #tpu.dot_dimension_numbers<[1], [0], [0], [1], [0, 0, 1, 1], [], []>} : vector<8x64xf32>, vector<64x8xf32>, vector<8x8xf32> -> vector<8x8xf32>
    %659 = vector.broadcast %309 : vector<1x8xf32> to vector<8x8xf32>
    %660 = arith.addf %658, %659 : vector<8x8xf32>
    %661 = vector.extract_strided_slice %660 {offsets = [0, 0], sizes = [8, 4], strides = [1, 1]} : vector<8x8xf32> to vector<8x4xf32>
    %662 = vector.extract_strided_slice %660 {offsets = [0, 4], sizes = [8, 4], strides = [1, 1]} : vector<8x8xf32> to vector<8x4xf32>
    %663 = arith.subf %661, %662 : vector<8x4xf32>
    %664 = arith.divf %663, %657 : vector<8x4xf32>
    %cst_149 = arith.constant 0.00999999977 : f32
    %665 = vector.broadcast %cst_149 : f32 to vector<8x4xf32>
    %666 = arith.mulf %661, %665 : vector<8x4xf32>
    %667 = arith.addf %610, %666 : vector<8x4xf32>
    %668 = vector.extract_strided_slice %310 {offsets = [5, 0, 0], sizes = [1, 8, 4], strides = [1, 1, 1]} : vector<7x8x4xf32> to vector<1x8x4xf32>
    %669 = vector.shape_cast %668 : vector<1x8x4xf32> to vector<8x4xf32>
    %670 = arith.mulf %657, %669 : vector<8x4xf32>
    %671 = arith.addf %667, %670 : vector<8x4xf32>
    %672 = arith.mulf %664, %664 : vector<8x4xf32>
    %cst_150 = arith.constant dense<0.000000e+00> : vector<8xf32>
    %673 = vector.multi_reduction <add>, %672, %cst_150 [1] : vector<8x4xf32> to vector<8xf32>
    %674 = vector.shape_cast %673 : vector<8xf32> to vector<8x1xf32>
    %cst_151 = arith.constant 5.000000e-03 : f32
    %675 = vector.broadcast %cst_151 : f32 to vector<8x1xf32>
    %676 = arith.mulf %675, %674 : vector<8x1xf32>
    %677 = arith.addf %616, %676 : vector<8x1xf32>
    %cst_152 = arith.constant dense<0.000000e+00> : vector<8x192xf32>
    %678 = tpu.matmul %671, %305, %cst_152 {dimension_numbers = #tpu.dot_dimension_numbers<[1], [0], [0], [1], [0, 0, 1, 1], [], []>} : vector<8x4xf32>, vector<4x192xf32>, vector<8x192xf32> -> vector<8x192xf32>
    %679 = vector.extract_strided_slice %304 {offsets = [56, 0], sizes = [8, 192], strides = [1, 1]} : vector<64x192xf32> to vector<8x192xf32>
    %680 = arith.addf %678, %679 : vector<8x192xf32>
    %cst_153 = arith.constant 0.000000e+00 : f32
    %681 = vector.broadcast %cst_153 : f32 to vector<8x192xf32>
    %682 = arith.maximumf %680, %681 : vector<8x192xf32>
    %683 = vector.broadcast %cst_153 : f32 to vector<8x192xf32>
    %684 = arith.subf %680, %683 : vector<8x192xf32>
    %685 = arith.cmpf one, %684, %684 : vector<8x192xf32>
    %686 = vector.broadcast %cst_153 : f32 to vector<8x192xf32>
    %687 = arith.addf %680, %686 : vector<8x192xf32>
    %688 = math.absf %684 : vector<8x192xf32>
    %cst_154 = arith.constant 0.000000e+00 : f32
    %689 = vector.broadcast %cst_154 : f32 to vector<8x192xf32>
    %690 = arith.subf %689, %688 : vector<8x192xf32>
    %691 = math.exp %690 : vector<8x192xf32>
    %692 = math.log1p %691 : vector<8x192xf32>
    %693 = arith.addf %682, %692 : vector<8x192xf32>
    %694 = arith.select %685, %687, %693 : vector<8x192xi1>, vector<8x192xf32>
    %cst_155 = arith.constant dense<0.000000e+00> : vector<8x68xf32>
    %695 = tpu.matmul %694, %306, %cst_155 {dimension_numbers = #tpu.dot_dimension_numbers<[1], [0], [0], [1], [0, 0, 1, 1], [], []>} : vector<8x192xf32>, vector<192x68xf32>, vector<8x68xf32> -> vector<8x68xf32>
    %696 = vector.broadcast %307 : vector<1x68xf32> to vector<8x68xf32>
    %697 = arith.addf %695, %696 : vector<8x68xf32>
    %698 = vector.extract_strided_slice %697 {offsets = [0, 0], sizes = [8, 64], strides = [1, 1]} : vector<8x68xf32> to vector<8x64xf32>
    %cst_156 = arith.constant 0.000000e+00 : f32
    %699 = vector.broadcast %cst_156 : f32 to vector<8x64xf32>
    %700 = arith.maximumf %698, %699 : vector<8x64xf32>
    %701 = vector.broadcast %cst_156 : f32 to vector<8x64xf32>
    %702 = arith.subf %698, %701 : vector<8x64xf32>
    %703 = arith.cmpf one, %702, %702 : vector<8x64xf32>
    %704 = vector.broadcast %cst_156 : f32 to vector<8x64xf32>
    %705 = arith.addf %698, %704 : vector<8x64xf32>
    %706 = math.absf %702 : vector<8x64xf32>
    %cst_157 = arith.constant 0.000000e+00 : f32
    %707 = vector.broadcast %cst_157 : f32 to vector<8x64xf32>
    %708 = arith.subf %707, %706 : vector<8x64xf32>
    %709 = math.exp %708 : vector<8x64xf32>
    %710 = math.log1p %709 : vector<8x64xf32>
    %711 = arith.addf %700, %710 : vector<8x64xf32>
    %712 = arith.select %703, %705, %711 : vector<8x64xi1>, vector<8x64xf32>
    %713 = vector.extract_strided_slice %697 {offsets = [0, 64], sizes = [8, 4], strides = [1, 1]} : vector<8x68xf32> to vector<8x4xf32>
    %714 = arith.negf %713 : vector<8x4xf32>
    %715 = math.exp %714 : vector<8x4xf32>
    %cst_158 = arith.constant 1.000000e+00 : f32
    %716 = vector.broadcast %cst_158 : f32 to vector<8x4xf32>
    %717 = arith.addf %716, %715 : vector<8x4xf32>
    %718 = arith.divf %716, %717 : vector<8x4xf32>
    %cst_159 = arith.constant dense<0.000000e+00> : vector<8x8xf32>
    %719 = tpu.matmul %712, %308, %cst_159 {dimension_numbers = #tpu.dot_dimension_numbers<[1], [0], [0], [1], [0, 0, 1, 1], [], []>} : vector<8x64xf32>, vector<64x8xf32>, vector<8x8xf32> -> vector<8x8xf32>
    %720 = vector.broadcast %309 : vector<1x8xf32> to vector<8x8xf32>
    %721 = arith.addf %719, %720 : vector<8x8xf32>
    %722 = vector.extract_strided_slice %721 {offsets = [0, 0], sizes = [8, 4], strides = [1, 1]} : vector<8x8xf32> to vector<8x4xf32>
    %723 = vector.extract_strided_slice %721 {offsets = [0, 4], sizes = [8, 4], strides = [1, 1]} : vector<8x8xf32> to vector<8x4xf32>
    %724 = arith.subf %722, %723 : vector<8x4xf32>
    %725 = arith.divf %724, %718 : vector<8x4xf32>
    %cst_160 = arith.constant 0.00999999977 : f32
    %726 = vector.broadcast %cst_160 : f32 to vector<8x4xf32>
    %727 = arith.mulf %722, %726 : vector<8x4xf32>
    %728 = arith.addf %671, %727 : vector<8x4xf32>
    %729 = vector.extract_strided_slice %310 {offsets = [6, 0, 0], sizes = [1, 8, 4], strides = [1, 1, 1]} : vector<7x8x4xf32> to vector<1x8x4xf32>
    %730 = vector.shape_cast %729 : vector<1x8x4xf32> to vector<8x4xf32>
    %731 = arith.mulf %718, %730 : vector<8x4xf32>
    %732 = arith.addf %728, %731 : vector<8x4xf32>
    %733 = arith.mulf %725, %725 : vector<8x4xf32>
    %cst_161 = arith.constant dense<0.000000e+00> : vector<8xf32>
    %734 = vector.multi_reduction <add>, %733, %cst_161 [1] : vector<8x4xf32> to vector<8xf32>
    %735 = vector.shape_cast %734 : vector<8xf32> to vector<8x1xf32>
    %cst_162 = arith.constant 5.000000e-03 : f32
    %736 = vector.broadcast %cst_162 : f32 to vector<8x1xf32>
    %737 = arith.mulf %736, %735 : vector<8x1xf32>
    %738 = arith.addf %677, %737 : vector<8x1xf32>
    %739 = vector.shape_cast %738 : vector<8x1xf32> to vector<1x8x1xf32>
    %cst_163 = arith.constant dense<0.000000e+00> : vector<1xf32>
    %740 = vector.multi_reduction <add>, %739, %cst_163 [1, 2] : vector<1x8x1xf32> to vector<1xf32>
    %741 = vector.shape_cast %740 : vector<1xf32> to vector<1x1x1xf32>
    %742 = vector.extract %741[0, 0, 0] : f32 from vector<1x1x1xf32>
    %743 = vector.broadcast %742 : f32 to vector<1x1xf32>
    %cst_164 = arith.constant 8.000000e+00 : f32
    %744 = vector.broadcast %cst_164 : f32 to vector<1x1xf32>
    %745 = arith.divf %743, %744 : vector<1x1xf32>
    %746 = tpu.concatenate %267, %366, %427, %488, %549, %610, %671, %732 in 0 : vector<8x4xf32>, vector<8x4xf32>, vector<8x4xf32>, vector<8x4xf32>, vector<8x4xf32>, vector<8x4xf32>, vector<8x4xf32>, vector<8x4xf32> -> vector<64x4xf32>
    %c0_165 = arith.constant 0 : index
    %c0_166 = arith.constant 0 : index
    %747 = vector.load %arg19[%c0_165, %c0_166] : memref<4x4xf32, #tpu.memory_space<vmem>>, vector<4x4xf32>
    %cst_167 = arith.constant dense<0.000000e+00> : vector<64x4xf32>
    %748 = tpu.matmul %746, %747, %cst_167 {dimension_numbers = #tpu.dot_dimension_numbers<[1], [0], [0], [1], [0, 0, 1, 1], [], []>} : vector<64x4xf32>, vector<4x4xf32>, vector<64x4xf32> -> vector<64x4xf32>
    %c0_168 = arith.constant 0 : index
    %c0_169 = arith.constant 0 : index
    %749 = vector.load %arg20[%c0_168, %c0_169] : memref<1x4xf32, #tpu.memory_space<vmem>>, vector<1x4xf32>
    %750 = vector.broadcast %749 : vector<1x4xf32> to vector<64x4xf32>
    %751 = arith.addf %748, %750 : vector<64x4xf32>
    %752 = arith.subf %1, %751 : vector<64x4xf32>
    %cst_170 = arith.constant -5.000000e-01 : f32
    %753 = vector.broadcast %cst_170 : f32 to vector<64x4xf32>
    %754 = arith.mulf %753, %752 : vector<64x4xf32>
    %755 = arith.mulf %754, %752 : vector<64x4xf32>
    %cst_171 = arith.constant 4.000000e+00 : f32
    %756 = vector.broadcast %cst_171 : f32 to vector<64x4xf32>
    %757 = arith.mulf %755, %756 : vector<64x4xf32>
    %cst_172 = arith.constant 0.22579135 : f32
    %758 = vector.broadcast %cst_172 : f32 to vector<64x4xf32>
    %759 = arith.subf %757, %758 : vector<64x4xf32>
    %760 = vector.shape_cast %759 : vector<64x4xf32> to vector<1x64x4xf32>
    %cst_173 = arith.constant dense<0.000000e+00> : vector<1xf32>
    %761 = vector.multi_reduction <add>, %760, %cst_173 [1, 2] : vector<1x64x4xf32> to vector<1xf32>
    %762 = vector.shape_cast %761 : vector<1xf32> to vector<1x1x1xf32>
    %763 = vector.extract %762[0, 0, 0] : f32 from vector<1x1x1xf32>
    %764 = vector.broadcast %763 : f32 to vector<1x1xf32>
    %cst_174 = arith.constant 8.000000e+00 : f32
    %765 = vector.broadcast %cst_174 : f32 to vector<1x1xf32>
    %766 = arith.divf %764, %765 : vector<1x1xf32>
    %767 = arith.mulf %752, %752 : vector<64x4xf32>
    %768 = vector.shape_cast %767 : vector<64x4xf32> to vector<1x64x4xf32>
    %cst_175 = arith.constant dense<0.000000e+00> : vector<1xf32>
    %769 = vector.multi_reduction <add>, %768, %cst_175 [1, 2] : vector<1x64x4xf32> to vector<1xf32>
    %770 = vector.shape_cast %769 : vector<1xf32> to vector<1x1x1xf32>
    %771 = vector.extract %770[0, 0, 0] : f32 from vector<1x1x1xf32>
    %772 = vector.broadcast %771 : f32 to vector<1x1xf32>
    %cst_176 = arith.constant 2.560000e+02 : f32
    %773 = vector.broadcast %cst_176 : f32 to vector<1x1xf32>
    %774 = arith.divf %772, %773 : vector<1x1xf32>
    %775 = arith.addf %295, %745 : vector<1x1xf32>
    %776 = tpu.concatenate %766, %775, %774 in 1 : vector<1x1xf32>, vector<1x1xf32>, vector<1x1xf32> -> vector<1x3xf32>
    %c0_177 = arith.constant 0 : index
    %c0_178 = arith.constant 0 : index
    %777 = vector.load %arg23[%c0_177, %c0_178] : memref<1x3xf32, #tpu.memory_space<vmem>>, vector<1x3xf32>
    tpu.vector_store %arg23[%c0_177, %c0_178], %776 {strides = array<i32>} : memref<1x3xf32, #tpu.memory_space<vmem>>, vector<1x3xf32>,
    return
  }
}

</mosaic_0001>

<bundles_post_ra>
// kernel: tpu_custom_call.1
= control target key start
LH: loop header
LB: loop body
LE: loop exit
PB: predicated region body
PF: predicated region fallthrough
CT: control target
= control target key end

     0   :  { %s6287_s0 = inlined_call_operand.vmem [shape: f32[8,8,4], index: 0, kind: input, shape index: {}]   ;;  %s6288_s1 = inlined_call_operand.vmem [shape: f32[8,4], index: 1, kind: input, shape index: {}]   ;;  %s6289_s2 = inlined_call_operand.vmem [shape: f32[7,8,4], index: 2, kind: input, shape index: {}]   ;;  %s6290_s3 = inlined_call_operand.vmem [shape: f32[4,96], index: 3, kind: input, shape index: {}]   ;;  %s6291_s4 = inlined_call_operand.vmem [shape: f32[32,96], index: 4, kind: input, shape index: {}]   ;;  %s6292_s5 = inlined_call_operand.vmem [shape: f32[1,96], index: 5, kind: input, shape index: {}]   ;;  %s6293_s6 = inlined_call_operand.vmem [shape: f32[1,96], index: 6, kind: input, shape index: {}]   ;;  %s6294_s7 = inlined_call_operand.vmem [shape: f32[32,8], index: 7, kind: input, shape index: {}]   ;;  %s6295_s8 = inlined_call_operand.vmem [shape: f32[1,8], index: 8, kind: input, shape index: {}]   ;;  %s6296_s9 = inlined_call_operand.vmem [shape: f32[8,8], index: 9, kind: input, shape index: {}]   ;;  %s6297_s10 = inlined_call_operand.vmem [shape: f32[1,8], index: 10, kind: input, shape index: {}]   ;;  %s6298_s11 = inlined_call_operand.vmem [shape: f32[8,64], index: 11, kind: input, shape index: {}]   ;;  %s6299_s12 = inlined_call_operand.vmem [shape: f32[1,64], index: 12, kind: input, shape index: {}]   ;;  %s6300_s13 = inlined_call_operand.vmem [shape: f32[1,128], index: 13, kind: input, shape index: {}]   ;;  %s6301_s14 = inlined_call_operand.vmem [shape: f32[4,192], index: 14, kind: input, shape index: {}]   ;;  %s6302_s15 = inlined_call_operand.vmem [shape: f32[192,68], index: 15, kind: input, shape index: {}]   ;;  %s6303_s16 = inlined_call_operand.vmem [shape: f32[1,68], index: 16, kind: input, shape index: {}]   ;;  %s6304_s17 = inlined_call_operand.vmem [shape: f32[64,8], index: 17, kind: input, shape index: {}]   ;;  %s6305_s18 = inlined_call_operand.vmem [shape: f32[1,8], index: 18, kind: input, shape index: {}]   ;;  %s6306_s19 = inlined_call_operand.vmem [shape: f32[4,4], index: 19, kind: input, shape index: {}]   ;;  %s6307_s20 = inlined_call_operand.vmem [shape: f32[1,4], index: 20, kind: input, shape index: {}]   ;;  %s6308_s21 = inlined_call_operand.vmem [shape: f32[1,4], index: 21, kind: input, shape index: {}]   ;;  %s6309_s22 = inlined_call_operand.vmem [shape: f32[1,4], index: 22, kind: input, shape index: {}]   ;;  %s6310_s23 = inlined_call_operand.hbm [shape: f32[1,3], index: 23, kind: output, shape index: {}]  }
   0x1   :  { %6315 = sst [smem:[#allocation5_spill]] %s6287_s0 }
   0x2   :  { %6316 = sst [smem:[#allocation6_spill]] %s6288_s1 }
   0x3   :  { %6317 = sst [smem:[#allocation7_spill]] %s6289_s2 }
   0x4   :  { %6318 = sst [smem:[#allocation8_spill]] %s6290_s3 }
   0x5   :  { %6319 = sst [smem:[#allocation9_spill]] %s6291_s4 }
   0x6   :  { %6320 = sst [smem:[#allocation10_spill]] %s6292_s5 }
   0x7   :  { %6321 = sst [smem:[#allocation11_spill]] %s6293_s6 }
   0x8   :  { %6322 = sst [smem:[#allocation12_spill]] %s6294_s7 }
   0x9   :  { %s6323_s24 = sld [smem:[#allocation8_spill]]  ;;  %vm116_vm0 = vcmask 1043456   ;;  %s6324_s1 = sld [smem:[#allocation5_spill]]  ;;  %vm91_vm1 = vcmask 31744   ;;  %v5116_v5 = vmov 0.0|0.0   ;;  %vm5117_vm2 = vmmov 0  }
   0xa   :  { %s6325_s7 = sld [smem:[#allocation9_spill]]  ;;  %4490 = vmatprep.subr.bf16.mxu1 %v5116_v5  ;;  %v5118_v10 = vmov 0.0  }
   0xb   :  { %4224 = vmatprep.mubr.msk.f32.mxu1 %vm5117_vm2, %v5118_v10 }
   0xf   :  { %v83_v0 = vld [vmem:[%s6323_s24] sm:$0xf]  ;;  %v76_v2 = vld [vmem:[%s6324_s1 + $0x8] sm:$0xff]  ;;  %v77_v7 = vld [vmem:[%s6324_s1 + $0x10] sm:$0xff] }
  0x10   :  { %v75_v1 = vld [vmem:[%s6324_s1] sm:$0xff]  ;;  %4202 = vmatprep.subr.msk.mxu0 %vm116_vm0, %v83_v0  ;;  %v226_v4 = vld [vmem:[%s6325_s7 + $0x8] sm:$0xff]  ;;  %v227_v8 = vld [vmem:[%s6325_s7 + $0x10] sm:$0xff] }
  0x11   :  { %4204 = vmatprep.mubr.msk.f32.mxu0 %vm91_vm1, %v75_v1  ;;  %v225_v3 = vld [vmem:[%s6325_s7] sm:$0xff]  ;;  %4203 = vmatpush3.msk.msra.mxu0 %vm116_vm0, %v83_v0  ;;  %v228_v9 = vld [vmem:[%s6325_s7 + $0x18] sm:$0xff] }
  0x12   :  { %v5263_v6 = vpack.c.bf16 %v226_v4, %v225_v3  ;;  %4205 = vmatmul.mubr.msk.f32.vlgmr.msra.gmra.mrb[0].mxu0 %vm91_vm1, %v76_v2  ;;  %v78_v11 = vld [vmem:[%s6324_s1 + $0x18] sm:$0xff]  ;;  %v5282_v12 = vpack.c.bf16 %v228_v9, %v227_v8 }
  0x13   :  { %4207 = vmatprep.mubr.msk.f32.mxu0 %vm91_vm1, %v77_v7 }
  0x14   :  { %4492 = vmatpush3.bf16.msra.mxu1 %v5263_v6 }
  0x15   :  { %28 = vsyncpa [#allocation3], 0  ;;  %4493 = vmatprep.subr.bf16.mxu1 %v5116_v5  ;;  %v79_v13 = vld [vmem:[%s6324_s1 + $0x20] sm:$0xff]  ;;  %4502 = vmatprep.subr.bf16.mxu0 %v5116_v5  ;;  %v80_v14 = vld [vmem:[%s6324_s1 + $0x28] sm:$0xff]  ;;  %s6326_s24 = sld [smem:[#allocation10_spill]]  ;;  %s6327_s26 = sld [smem:[#allocation11_spill]] }
  0x16   :  { %4504 = vmatpush3.bf16.msra.mxu0 %v5263_v6  ;;  %v81_v15 = vld [vmem:[%s6324_s1 + $0x30] sm:$0xff]  ;;  %v82_v16 = vld [vmem:[%s6324_s1 + $0x38] sm:$0xff]  ;;  %s5119_s2 = smov 64   ;;  %s5120_s6 = smov 96   ;;  %vm236_vm3 = vcmask 261120   ;;  %vm1172_vm4 = vcmask 64512  }
  0x17   :  { %4208 = vmatmul.mubr.msk.f32.gmra.mrb[2].mxu0 %vm91_vm1, %v78_v11  ;;  %4505 = vmatprep.subr.bf16.mxu0 %v5116_v5  ;;  %s6328_s28 = sld [smem:[#allocation12_spill]]  ;;  %s6329_s7 = sld [smem:[#allocation6_spill]]  ;;  %vm1463_vm5 = vcmask 523264  }
  0x18   :  { %4495 = vmatpush3.bf16.msra.mxu1 %v5282_v12  ;;  %4210 = vmatprep.mubr.msk.f32.mxu0 %vm91_vm1, %v79_v13  ;;  %s5122_s29 = smov 124   ;;  %s6330_s25 = sld [smem:[#allocation7_spill]] }
  0x19   :  { %4496 = vmatprep.subr.bf16.mxu1 %v5116_v5 }
  0x1a   :  { %4507 = vmatpush3.bf16.msra.mxu0 %v5282_v12 }
  0x1b   :  { %4225 = vmatmul.mubr.f32.vlgmr.msra.gmra.mrb[0].mxu1 %v5118_v10  ;;  %4211 = vmatmul.mubr.msk.f32.gmra.mrb[4].mxu0 %vm91_vm1, %v80_v14  ;;  %v3947_v18 = vld [vmem:[%s6326_s24] ss:$0 sm:$0xff] }
  0x1c   :  { %4213 = vmatprep.mubr.msk.f32.mxu0 %vm91_vm1, %v81_v15  ;;  %4498 = vmatpush3.bf16.msra.mxu1 %v5263_v6  ;;  %v5330_v25 = vld [vmem:[%s6327_s26] ss:$0 sm:$0xff] }
  0x1d   :  { %4499 = vmatprep.subr.bf16.mxu1 %v5116_v5  ;;  %4235 = vmatprep.mubr.msk.f32.mxu1 %vm5117_vm2, %v5118_v10 }
  0x1e   :  { %4514 = vmatprep.subr.bf16.mxu0 %v5116_v5 }
  0x1f   :  { %4214 = vmatmul.mubr.msk.f32.gmra.mrb[6].mxu0 %vm91_vm1, %v82_v16 }
  0x20   :  { %4501 = vmatpush3.bf16.msra.mxu1 %v5282_v12  ;;  %4246 = vmatprep.mubr.msk.f32.mxu0 %vm5117_vm2, %v5118_v10 }
  0x21   :  { %4508 = vmatprep.subr.bf16.mxu1 %v5116_v5 }
  0xe5   :  { %v4206_v17 = vpop.f32.mrb[0].mxu0 }
  0xe6   :  { %v5321_v19 = vadd.f32 %v4206_v17, %v3947_v18  ;;  %v186_v20 = vpop.f32.mrb[1].mxu0 }
  0xe7   :  { %v5323_v21 = vadd.f32 %v3947_v18, %v186_v20 }
  0xea   :  { %v4209_v22 = vpop.f32.mrb[2].mxu0 }
  0xeb   :  { %v5325_v23 = vadd.f32 %v4209_v22, %v3947_v18  ;;  %v196_v24 = vpop.f32.mrb[3].mxu0 }
  0xec   :  { %v5332_v26 = vadd.f32 %v3947_v18, %v196_v24 }
  0xee   :  { %v306_v27 = vpop.f32.mrb[0].mxu1  ;;  %v4212_v28 = vpop.f32.mrb[4].mxu0 }
  0xef   :  { %v307_v29 = vadd.f32 %v5330_v25, %v306_v27  ;;  %v4226_v30 = vpop.f32.mrb[1].mxu1  ;;  %v5335_v31 = vadd.f32 %v4212_v28, %v3947_v18  ;;  %v206_v32 = vpop.f32.mrb[5].mxu0 }
  0xf0   :  { %v5337_v33 = vadd.f32 %v3947_v18, %v206_v32 }
  0xf1   :  { %318 = vrot.lane.b32.xlu0 %v307_v29, %s5119_s2 }
  0xf2   :  { %v4215_v34 = vpop.f32.mrb[6].mxu0 }
  0xf3   :  { %v216_v35 = vpop.f32.mrb[7].mxu0  ;;  %v222_v37 = vadd.f32 %v4215_v34, %v3947_v18 }
  0xf4   :  { %v217_v36 = vadd.f32 %v3947_v18, %v216_v35 }
  0xf5   :  { %v310_v38 = vadd.f32 %v307_v29, %v222_v37 }
  0xf7   :  { %v3958_v39 = vmul.f32 -1.442695, %v310_v38 }
  0xf9   :  { %4899 = vpow2.f32 %v3958_v39 }
 0x103   :  { %v4900_v40 = vpop.eup %4899 }
 0x104   :  { %v314_v41 = vadd.f32 1.0, %v4900_v40 }
 0x106   :  { %4901 = vrcp.f32 %v314_v41 }
 0x110   :  { %v4902_v42 = vpop.eup %4901 }
 0x111   :  { %v328_v48 = vsub.f32 1.0, %v4902_v42  ;;  %v334_v50 = vmul.f32 0.0, %v4902_v42 }
 0x163   :  { %v319_v43 = vpop.permute.xlu0 %318 }
 0x164   :  { %v321_v44 = vmul.f32 %v4902_v42, %v319_v43 }
 0x166   :  { %323 = vrot.lane.b32.xlu0 %v321_v44, %s5119_s2 }
 0x1d8   :  { %v324_v45 = vpop.permute.xlu0 %323 }
 0x1d9   :  { %v326_v46 = vadd.f32 %v324_v45, %v222_v37 }
 0x1db   :  { %4903 = vtanh.f32 %v326_v46 }
 0x1e5   :  { %v4904_v47 = vpop.eup %4903 }
 0x1e6   :  { %330 = vrot.lane.b32.xlu1 %v4904_v47, %s5120_s6 }
 0x258   :  { %v331_v49 = vpop.permute.xlu1 %330 }
 0x259   :  { %v333_v51 = vmul.f32 %v331_v49, %v328_v48 }
 0x25b   :  { %v335_v52 = vadd.f32 %v334_v50, %v333_v51 }
 0x25d   :  { %337 = vrot.lane.b32.xlu1 %v335_v52, %s5120_s6 }
 0x2cf   :  { %v5343_v53 = vpop.permute.xlu1 %337 }
 0x2d0   :  { %4236 = vmatmul.mubr.msk.f32.vlgmr.msra.gmra.mrb[2].mxu1 %vm236_vm3, %v5343_v53 }
 0x2d1   :  { %4510 = vmatpush3.bf16.msra.mxu1 %v5263_v6  ;;  %4257 = vmatprep.mubr.msk.f32.mxu1 %vm5117_vm2, %v5118_v10 }
 0x2d2   :  { %4511 = vmatprep.subr.bf16.mxu1 %v5116_v5 }
 0x2d5   :  { %4513 = vmatpush3.bf16.msra.mxu1 %v5282_v12 }
 0x2d6   :  { %4520 = vmatprep.subr.bf16.mxu1 %v5116_v5 }
 0x3a3   :  { %v407_v54 = vpop.f32.mrb[2].mxu1 }
 0x3a4   :  { %v408_v55 = vadd.f32 %v5330_v25, %v407_v54  ;;  %v4237_v56 = vpop.f32.mrb[3].mxu1 }
 0x3a6   :  { %419 = vrot.lane.b32.xlu0 %v408_v55, %s5119_s2  ;;  %v411_v57 = vadd.f32 %v408_v55, %v217_v36 }
 0x3a8   :  { %v3960_v58 = vmul.f32 -1.442695, %v411_v57 }
 0x3aa   :  { %4905 = vpow2.f32 %v3960_v58 }
 0x3b4   :  { %v4906_v59 = vpop.eup %4905 }
 0x3b5   :  { %v415_v60 = vadd.f32 1.0, %v4906_v59 }
 0x3b7   :  { %4907 = vrcp.f32 %v415_v60 }
 0x3c1   :  { %v4908_v61 = vpop.eup %4907 }
 0x3c2   :  { %v429_v3 = vsub.f32 1.0, %v4908_v61  ;;  %v435_v7 = vmul.f32 %v4908_v61, %v335_v52 }
 0x418   :  { %v420_v62 = vpop.permute.xlu0 %419 }
 0x419   :  { %v422_v63 = vmul.f32 %v4908_v61, %v420_v62 }
 0x41b   :  { %424 = vrot.lane.b32.xlu1 %v422_v63, %s5119_s2 }
 0x48d   :  { %v425_v0 = vpop.permute.xlu1 %424 }
 0x48e   :  { %v427_v1 = vadd.f32 %v425_v0, %v217_v36 }
 0x490   :  { %4909 = vtanh.f32 %v427_v1 }
 0x49a   :  { %v4910_v2 = vpop.eup %4909 }
 0x49b   :  { %431 = vrot.lane.b32.xlu0 %v4910_v2, %s5120_s6 }
 0x50d   :  { %v432_v4 = vpop.permute.xlu0 %431 }
 0x50e   :  { %v434_v8 = vmul.f32 %v432_v4, %v429_v3 }
 0x510   :  { %v436_v9 = vadd.f32 %v435_v7, %v434_v8 }
 0x512   :  { %438 = vrot.lane.b32.xlu1 %v436_v9, %s5120_s6 }
 0x584   :  { %v5358_v11 = vpop.permute.xlu1 %438 }
 0x585   :  { %4247 = vmatmul.mubr.msk.f32.vlgmr.msra.gmra.mrb[8].mxu0 %vm236_vm3, %v5358_v11 }
 0x586   :  { %4516 = vmatpush3.bf16.msra.mxu0 %v5263_v6  ;;  %4268 = vmatprep.mubr.msk.f32.mxu0 %vm5117_vm2, %v5118_v10 }
 0x587   :  { %4517 = vmatprep.subr.bf16.mxu0 %v5116_v5 }
 0x58a   :  { %4519 = vmatpush3.bf16.msra.mxu0 %v5282_v12 }
 0x58b   :  { %4526 = vmatprep.subr.bf16.mxu0 %v5116_v5 }
 0x658   :  { %v508_v13 = vpop.f32.mrb[8].mxu0 }
 0x659   :  { %v509_v14 = vadd.f32 %v5330_v25, %v508_v13  ;;  %v4248_v15 = vpop.f32.mrb[9].mxu0 }
 0x65b   :  { %520 = vrot.lane.b32.xlu0 %v509_v14, %s5119_s2  ;;  %v512_v16 = vadd.f32 %v509_v14, %v5335_v31 }
 0x65d   :  { %v3962_v17 = vmul.f32 -1.442695, %v512_v16 }
 0x65f   :  { %4911 = vpow2.f32 %v3962_v17 }
 0x669   :  { %v4912_v18 = vpop.eup %4911 }
 0x66a   :  { %v516_v20 = vadd.f32 1.0, %v4912_v18 }
 0x66c   :  { %4913 = vrcp.f32 %v516_v20 }
 0x676   :  { %v4914_v22 = vpop.eup %4913 }
 0x677   :  { %v530_v32 = vsub.f32 1.0, %v4914_v22  ;;  %v536_v35 = vmul.f32 %v4914_v22, %v436_v9 }
 0x6cd   :  { %v521_v24 = vpop.permute.xlu0 %520 }
 0x6ce   :  { %v523_v27 = vmul.f32 %v4914_v22, %v521_v24 }
 0x6d0   :  { %525 = vrot.lane.b32.xlu1 %v523_v27, %s5119_s2 }
 0x742   :  { %v526_v28 = vpop.permute.xlu1 %525 }
 0x743   :  { %v528_v29 = vadd.f32 %v526_v28, %v5335_v31 }
 0x745   :  { %4915 = vtanh.f32 %v528_v29 }
 0x74f   :  { %v4916_v30 = vpop.eup %4915 }
 0x750   :  { %532 = vrot.lane.b32.xlu0 %v4916_v30, %s5120_s6 }
 0x7c2   :  { %v533_v34 = vpop.permute.xlu0 %532 }
 0x7c3   :  { %v535_v36 = vmul.f32 %v533_v34, %v530_v32 }
 0x7c5   :  { %v537_v37 = vadd.f32 %v536_v35, %v535_v36 }
 0x7c7   :  { %539 = vrot.lane.b32.xlu1 %v537_v37, %s5120_s6 }
 0x839   :  { %v5375_v38 = vpop.permute.xlu1 %539 }
 0x83a   :  { %4258 = vmatmul.mubr.msk.f32.vlgmr.msra.gmra.mrb[4].mxu1 %vm236_vm3, %v5375_v38 }
 0x83b   :  { %4522 = vmatpush3.bf16.msra.mxu1 %v5263_v6  ;;  %4279 = vmatprep.mubr.msk.f32.mxu1 %vm5117_vm2, %v5118_v10 }
 0x83c   :  { %4523 = vmatprep.subr.bf16.mxu1 %v5116_v5 }
 0x83f   :  { %4525 = vmatpush3.bf16.msra.mxu1 %v5282_v12 }
 0x840   :  { %4532 = vmatprep.subr.bf16.mxu1 %v5116_v5 }
 0x90d   :  { %v609_v31 = vpop.f32.mrb[4].mxu1 }
 0x90e   :  { %v610_v39 = vadd.f32 %v5330_v25, %v609_v31  ;;  %v4259_v40 = vpop.f32.mrb[5].mxu1 }
 0x910   :  { %621 = vrot.lane.b32.xlu0 %v610_v39, %s5119_s2  ;;  %v613_v41 = vadd.f32 %v610_v39, %v5337_v33 }
 0x912   :  { %v3964_v42 = vmul.f32 -1.442695, %v613_v41 }
 0x914   :  { %4917 = vpow2.f32 %v3964_v42 }
 0x91e   :  { %v4918_v43 = vpop.eup %4917 }
 0x91f   :  { %v617_v44 = vadd.f32 1.0, %v4918_v43 }
 0x921   :  { %4919 = vrcp.f32 %v617_v44 }
 0x92b   :  { %v4920_v45 = vpop.eup %4919 }
 0x92c   :  { %v631_v51 = vsub.f32 1.0, %v4920_v45  ;;  %v637_v54 = vmul.f32 %v4920_v45, %v537_v37 }
 0x982   :  { %v622_v46 = vpop.permute.xlu0 %621 }
 0x983   :  { %v624_v47 = vmul.f32 %v4920_v45, %v622_v46 }
 0x985   :  { %626 = vrot.lane.b32.xlu1 %v624_v47, %s5119_s2 }
 0x9f7   :  { %v627_v48 = vpop.permute.xlu1 %626 }
 0x9f8   :  { %v629_v49 = vadd.f32 %v627_v48, %v5337_v33 }
 0x9fa   :  { %4921 = vtanh.f32 %v629_v49 }
 0xa04   :  { %v4922_v50 = vpop.eup %4921 }
 0xa05   :  { %633 = vrot.lane.b32.xlu0 %v4922_v50, %s5120_s6 }
 0xa77   :  { %v634_v52 = vpop.permute.xlu0 %633 }
 0xa78   :  { %v636_v55 = vmul.f32 %v634_v52, %v631_v51 }
 0xa7a   :  { %v638_v56 = vadd.f32 %v637_v54, %v636_v55 }
 0xa7c   :  { %640 = vrot.lane.b32.xlu1 %v638_v56, %s5120_s6 }
 0xaee   :  { %v5392_v57 = vpop.permute.xlu1 %640 }
 0xaef   :  { %4269 = vmatmul.mubr.msk.f32.vlgmr.msra.gmra.mrb[10].mxu0 %vm236_vm3, %v5392_v57 }
 0xaf0   :  { %4528 = vmatpush3.bf16.msra.mxu0 %v5263_v6  ;;  %4290 = vmatprep.mubr.msk.f32.mxu0 %vm5117_vm2, %v5118_v10 }
 0xaf1   :  { %4529 = vmatprep.subr.bf16.mxu0 %v5116_v5 }
 0xaf4   :  { %4531 = vmatpush3.bf16.msra.mxu0 %v5282_v12 }
 0xbc2   :  { %v710_v33 = vpop.f32.mrb[10].mxu0 }
 0xbc3   :  { %v711_v58 = vadd.f32 %v5330_v25, %v710_v33  ;;  %v4270_v59 = vpop.f32.mrb[11].mxu0 }
 0xbc5   :  { %722 = vrot.lane.b32.xlu0 %v711_v58, %s5119_s2  ;;  %v714_v60 = vadd.f32 %v711_v58, %v5325_v23 }
 0xbc7   :  { %v3966_v61 = vmul.f32 -1.442695, %v714_v60 }
 0xbc9   :  { %4923 = vpow2.f32 %v3966_v61 }
 0xbd3   :  { %v4924_v62 = vpop.eup %4923 }
 0xbd4   :  { %v718_v63 = vadd.f32 1.0, %v4924_v62 }
 0xbd6   :  { %4925 = vrcp.f32 %v718_v63 }
 0xbe0   :  { %v4926_v0 = vpop.eup %4925 }
 0xbe1   :  { %v732_v8 = vsub.f32 1.0, %v4926_v0  ;;  %v738_v13 = vmul.f32 %v4926_v0, %v638_v56 }
 0xc37   :  { %v723_v1 = vpop.permute.xlu0 %722 }
 0xc38   :  { %v725_v2 = vmul.f32 %v4926_v0, %v723_v1 }
 0xc3a   :  { %727 = vrot.lane.b32.xlu1 %v725_v2, %s5119_s2 }
 0xcac   :  { %v728_v3 = vpop.permute.xlu1 %727 }
 0xcad   :  { %v730_v4 = vadd.f32 %v728_v3, %v5325_v23 }
 0xcaf   :  { %4927 = vtanh.f32 %v730_v4 }
 0xcb9   :  { %v4928_v7 = vpop.eup %4927 }
 0xcba   :  { %734 = vrot.lane.b32.xlu0 %v4928_v7, %s5120_s6 }
 0xd2c   :  { %v735_v9 = vpop.permute.xlu0 %734 }
 0xd2d   :  { %v737_v14 = vmul.f32 %v735_v9, %v732_v8  ;;  %v1044_v8 = vld [vmem:[%s6328_s28 + $0x8] sm:$0xff]  ;;  %v1045_v9 = vld [vmem:[%s6328_s28 + $0x10] sm:$0xff] }
 0xd2f   :  { %v739_v15 = vadd.f32 %v738_v13, %v737_v14  ;;  %v1046_v14 = vld [vmem:[%s6328_s28 + $0x18] sm:$0xff] }
 0xd31   :  { %741 = vrot.lane.b32.xlu1 %v739_v15, %s5120_s6 }
 0xda3   :  { %v5408_v16 = vpop.permute.xlu1 %741 }
 0xda4   :  { %4280 = vmatmul.mubr.msk.f32.vlgmr.msra.gmra.mrb[6].mxu1 %vm236_vm3, %v5408_v16 }
 0xda5   :  { %4534 = vmatpush3.bf16.msra.mxu1 %v5263_v6  ;;  %4301 = vmatprep.mubr.msk.f32.mxu1 %vm5117_vm2, %v5118_v10 }
 0xda6   :  { %4535 = vmatprep.subr.bf16.mxu1 %v5116_v5 }
 0xda9   :  { %4537 = vmatpush3.bf16.msra.mxu1 %v5282_v12 }
 0xe77   :  { %v811_v23 = vpop.f32.mrb[6].mxu1 }
 0xe78   :  { %v812_v17 = vadd.f32 %v5330_v25, %v811_v23  ;;  %v4281_v18 = vpop.f32.mrb[7].mxu1 }
 0xe7a   :  { %823 = vrot.lane.b32.xlu0 %v812_v17, %s5119_s2  ;;  %v815_v20 = vadd.f32 %v812_v17, %v5332_v26 }
 0xe7c   :  { %v3968_v22 = vmul.f32 -1.442695, %v815_v20 }
 0xe7e   :  { %4929 = vpow2.f32 %v3968_v22 }
 0xe88   :  { %v4930_v24 = vpop.eup %4929 }
 0xe89   :  { %v819_v27 = vadd.f32 1.0, %v4930_v24 }
 0xe8b   :  { %4931 = vrcp.f32 %v819_v27  ;;  %v1164_v27 = vld [vmem:[%s6296_s9] sm:$0xff] }
 0xe95   :  { %v4932_v6 = vpop.eup %4931 }
 0xe96   :  { %v833_v34 = vsub.f32 1.0, %v4932_v6  ;;  %v839_v36 = vmul.f32 %v4932_v6, %v739_v15  ;;  %v4542_v15 = vpack.c.bf16 %v1046_v14, %v1045_v9 }
 0xeec   :  { %v824_v28 = vpop.permute.xlu0 %823 }
 0xeed   :  { %v826_v29 = vmul.f32 %v4932_v6, %v824_v28  ;;  %v1321_v6 = vld [vmem:[%s6298_s11] sm:$0xff] }
 0xeee   :  { %4329 = vmatprep.subr.mxu1 %v1321_v6 }
 0xeef   :  { %828 = vrot.lane.b32.xlu1 %v826_v29, %s5119_s2 }
 0xf61   :  { %v829_v30 = vpop.permute.xlu1 %828 }
 0xf62   :  { %v831_v12 = vadd.f32 %v829_v30, %v5332_v26 }
 0xf64   :  { %4933 = vtanh.f32 %v831_v12 }
 0xf6e   :  { %v4934_v32 = vpop.eup %4933 }
 0xf6f   :  { %835 = vrot.lane.b32.xlu0 %v4934_v32, %s5120_s6 }
 0xfe1   :  { %v836_v35 = vpop.permute.xlu0 %835 }
 0xfe2   :  { %v838_v37 = vmul.f32 %v836_v35, %v833_v34 }
 0xfe4   :  { %v840_v31 = vadd.f32 %v839_v36, %v838_v37 }
 0xfe6   :  { %842 = vrot.lane.b32.xlu1 %v840_v31, %s5120_s6 }
0x1058   :  { %v5424_v39 = vpop.permute.xlu1 %842 }
0x1059   :  { %4291 = vmatmul.mubr.msk.f32.vlgmr.msra.gmra.mrb[12].mxu0 %vm236_vm3, %v5424_v39 }
0x112c   :  { %v912_v40 = vpop.f32.mrb[12].mxu0 }
0x112d   :  { %v913_v41 = vadd.f32 %v5330_v25, %v912_v40  ;;  %v4292_v26 = vpop.f32.mrb[13].mxu0 }
0x112f   :  { %924 = vrot.lane.b32.xlu0 %v913_v41, %s5119_s2  ;;  %v916_v42 = vadd.f32 %v913_v41, %v5321_v19 }
0x1131   :  { %v3970_v43 = vmul.f32 -1.442695, %v916_v42  ;;  %v5503_v42 = vld [vmem:[%s6301_s14] sm:$0xff] }
0x1133   :  { %4935 = vpow2.f32 %v3970_v43  ;;  %v5507_v43 = vcombine.high %v5503_v42, %v5503_v42 }
0x113d   :  { %v4936_v44 = vpop.eup %4935 }
0x113e   :  { %v920_v45 = vadd.f32 1.0, %v4936_v44  ;;  %v3982_v44 = vld [vmem:[%s6297_s10] ss:$0 sm:$0xff] }
0x1140   :  { %4937 = vrcp.f32 %v920_v45 }
0x114a   :  { %v4938_v46 = vpop.eup %4937 }
0x114b   :  { %v934_v52 = vsub.f32 1.0, %v4938_v46  ;;  %v940_v55 = vmul.f32 %v4938_v46, %v840_v31 }
0x11a1   :  { %v925_v47 = vpop.permute.xlu0 %924 }
0x11a2   :  { %v927_v48 = vmul.f32 %v4938_v46, %v925_v47 }
0x11a4   :  { %929 = vrot.lane.b32.xlu1 %v927_v48, %s5119_s2 }
0x1216   :  { %v930_v49 = vpop.permute.xlu1 %929 }
0x1217   :  { %v932_v50 = vadd.f32 %v930_v49, %v5321_v19 }
0x1219   :  { %4939 = vtanh.f32 %v932_v50 }
0x1223   :  { %v4940_v51 = vpop.eup %4939 }
0x1224   :  { %936 = vrot.lane.b32.xlu0 %v4940_v51, %s5120_s6  ;;  %v5525_v51 = vld [vmem:[%s6299_s12] ss:$0 sm:$0xff] }
0x1296   :  { %v937_v54 = vpop.permute.xlu0 %936 }
0x1297   :  { %v939_v56 = vmul.f32 %v937_v54, %v934_v52 }
0x1299   :  { %v941_v33 = vadd.f32 %v940_v55, %v939_v56 }
0x129b   :  { %943 = vrot.lane.b32.xlu1 %v941_v33, %s5120_s6 }
0x130d   :  { %v944_v58 = vpop.permute.xlu1 %943 }
0x130e   :  { %4302 = vmatmul.mubr.msk.f32.vlgmr.msra.gmra.mrb[8].mxu1 %vm236_vm3, %v944_v58 }
0x130f   :  { %4330 = vmatpush3.msra.mxu1 %v1321_v6  ;;  %v1482_v6 = vld [vmem:[%s6302_s15 + $0x50] sm:$0xff] }
0x1310   :  { %4546 = vmatprep.subr.bf16.mxu1 %v5116_v5 }
0x13e1   :  { %v1013_v59 = vpop.f32.mrb[8].mxu1 }
0x13e2   :  { %v1014_v60 = vadd.f32 %v5330_v25, %v1013_v59  ;;  %v4303_v61 = vpop.f32.mrb[9].mxu1  ;;  %v1043_v25 = vld [vmem:[%s6328_s28] sm:$0xff]  ;;  %s5121_s28 = smov 4   ;;  %v1474_v59 = vld [vmem:[%s6302_s15 + $0x10] sm:$0xff] }
0x13e3   :  { %v4538_v13 = vpack.c.bf16 %v1044_v8, %v1043_v25  ;;  %v1475_v61 = vld [vmem:[%s6302_s15 + $0x18] sm:$0xff] }
0x13e4   :  { %1025 = vrot.lane.b32.xlu0 %v1014_v60, %s5119_s2  ;;  %v1017_v19 = vadd.f32 %v1014_v60, %v5323_v21 }
0x13e5   :  { %4539 = vmatprep.subr.bf16.mxu0 %v4538_v13 }
0x13e6   :  { %v3972_v62 = vmul.f32 -1.442695, %v1017_v19  ;;  %4541 = vmatpush3.bf16.msra.mxu0 %v4538_v13 }
0x13e7   :  { %4543 = vmatprep.subr.bf16.mxu0 %v4542_v15 }
0x13e8   :  { %4941 = vpow2.f32 %v3972_v62 }
0x13ea   :  { %4545 = vmatpush3.bf16.msra.mxu0 %v4542_v15  ;;  %v1476_v15 = vld [vmem:[%s6302_s15 + $0x20] sm:$0xff] }
0x13eb   :  { %4324 = vmatprep.subr.mxu0 %v5118_v10 }
0x13f2   :  { %v4942_v63 = vpop.eup %4941 }
0x13f3   :  { %v1021_v0 = vadd.f32 1.0, %v4942_v63 }
0x13f5   :  { %4943 = vrcp.f32 %v1021_v0  ;;  %v5551_v0 = vpack.c.bf16 %v1475_v61, %v1474_v59 }
0x13ff   :  { %v4944_v1 = vpop.eup %4943 }
0x1400   :  { %v1035_v23 = vsub.f32 1.0, %v4944_v1  ;;  %v1041_v18 = vmul.f32 %v4944_v1, %v941_v33  ;;  %v1472_v33 = vld [vmem:[%s6302_s15] sm:$0xff] }
0x1456   :  { %v1026_v2 = vpop.permute.xlu0 %1025 }
0x1457   :  { %v1028_v3 = vmul.f32 %v4944_v1, %v1026_v2 }
0x1459   :  { %1030 = vrot.lane.b32.xlu1 %v1028_v3, %s5119_s2 }
0x14cb   :  { %v1031_v4 = vpop.permute.xlu1 %1030 }
0x14cc   :  { %v1033_v7 = vadd.f32 %v1031_v4, %v5323_v21 }
0x14ce   :  { %4945 = vtanh.f32 %v1033_v7 }
0x14d8   :  { %v4946_v21 = vpop.eup %4945 }
0x14d9   :  { %1037 = vrot.lane.b32.xlu0 %v4946_v21, %s5120_s6  ;;  %v1477_v21 = vld [vmem:[%s6302_s15 + $0x28] sm:$0xff] }
0x154b   :  { %v1038_v17 = vpop.permute.xlu0 %1037 }
0x154c   :  { %v1040_v20 = vmul.f32 %v1038_v17, %v1035_v23  ;;  %v5579_v23 = vpack.c.bf16 %v1477_v21, %v1476_v15  ;;  %v1478_v17 = vld [vmem:[%s6302_s15 + $0x30] sm:$0xff] }
0x154e   :  { %v1042_v22 = vadd.f32 %v1041_v18, %v1040_v20  ;;  %v1479_v18 = vld [vmem:[%s6302_s15 + $0x38] sm:$0xff] }
0x154f   :  { %v5589_v20 = vpack.c.bf16 %v1479_v18, %v1478_v17 }
0x1550   :  { %1055 = vrot.lane.b32.xlu1 %v1042_v22, %s5120_s6  ;;  %v1480_v22 = vld [vmem:[%s6302_s15 + $0x40] sm:$0xff] }
0x15c2   :  { %v1056_v24 = vpop.permute.xlu1 %1055 }
0x15c3   :  { %4312 = vmatprep.mubr.msk.f32.mxu0 %vm236_vm3, %v1056_v24  ;;  %v1481_v24 = vld [vmem:[%s6302_s15 + $0x48] sm:$0xff] }
0x15c4   :  { %4313 = vmatmul.mubr.msk.f32.vlgmr.msra.gmra.mrb[14].mxu0 %vm236_vm3, %v944_v58  ;;  %v1473_v58 = vld [vmem:[%s6302_s15 + $0x8] sm:$0xff] }
0x15c5   :  { %4315 = vmatprep.mubr.msk.f32.mxu0 %vm236_vm3, %v5424_v39  ;;  %4325 = vmatpush3.msra.mxu0 %v1164_v27  ;;  %v5542_v60 = vpack.c.bf16 %v1473_v58, %v1472_v33  ;;  %v5599_v27 = vpack.c.bf16 %v1481_v24, %v1480_v22 }
0x15c6   :  { %3996 = vmatprep.subr.msk.mxu0 %vm116_vm0, %v5507_v43 }
0x15c8   :  { %4316 = vmatmul.mubr.msk.f32.gmra.mrb[16].mxu0 %vm236_vm3, %v5408_v16 }
0x15c9   :  { %4318 = vmatprep.mubr.msk.f32.mxu0 %vm236_vm3, %v5392_v57 }
0x15cc   :  { %4319 = vmatmul.mubr.msk.f32.gmra.mrb[18].mxu0 %vm236_vm3, %v5375_v38  ;;  %v1248_v38 = vld [vmem:[%s6329_s7] sm:$0xff] }
0x15cd   :  { %4321 = vmatprep.mubr.msk.f32.mxu0 %vm236_vm3, %v5358_v11  ;;  %1250 = vrot.lane.b32.xlu0 %v1248_v38, %s5121_s28  ;;  %v3973_v11 = vld [vmem:[%s6295_s8] ss:$0 sm:$0xff]  ;;  %v1483_v38 = vld [vmem:[%s6302_s15 + $0x58] sm:$0xff] }
0x15d0   :  { %4322 = vmatmul.mubr.msk.f32.gmra.mrb[20].mxu0 %vm236_vm3, %v5343_v53  ;;  %v3995_v53 = vld [vmem:[%s6300_s13] ss:$0 sm:$0xff] }
0x15d1   :  { %4326 = vmatprep.mubr.msk.f32.mxu0 %vm5117_vm2, %v5118_v10  ;;  %1460 = vrot.lane.b32.xlu0 %v3995_v53, %s5119_s2  ;;  %v5609_v53 = vpack.c.bf16 %v1483_v38, %v1482_v6 }
0x163f   :  { %v1251_v25 = vpop.permute.xlu0 %1250 }
0x1697   :  { %v4314_v57 = vpop.f32.mrb[14].mxu0 }
0x1698   :  { %v1125_v16 = vpop.f32.mrb[15].mxu0  ;;  %v1131_v29 = vadd.f32 %v4314_v57, %v3973_v11  ;;  %v1485_v57 = vld [vmem:[%s6302_s15 + $0x68] sm:$0xff] }
0x1699   :  { %v1126_v28 = vadd.f32 %v3973_v11, %v1125_v16 }
0x169b   :  { %v4317_v30 = vpop.f32.mrb[16].mxu0  ;;  %4327 = vmatmul.mubr.msk.f32.vlgmr.msra.gmra.mrb[22].mxu0 %vm1172_vm4, %v1126_v28  ;;  %4331 = vmatprep.mubr.msk.f32.mxu1 %vm1172_vm4, %v1126_v28  ;;  %v1486_v28 = vld [vmem:[%s6302_s15 + $0x70] sm:$0xff] }
0x169c   :  { %v1135_v12 = vpop.f32.mrb[17].mxu0  ;;  %4332 = vmatmul.mubr.msk.f32.vlgmr.msra.gmra.mrb[10].mxu1 %vm1172_vm4, %v1131_v29  ;;  %1586 = vmatprep.mubr.f32.mxu0 %v5118_v10  ;;  %v1141_v34 = vadd.f32 %v4317_v30, %v3973_v11  ;;  %v1487_v29 = vld [vmem:[%s6302_s15 + $0x78] sm:$0xff] }
0x169d   :  { %v1136_v32 = vadd.f32 %v3973_v11, %v1135_v12  ;;  %3997 = vmatpush1.msk.msra.mxu0 %vm116_vm0, %v5503_v42  ;;  %4548 = vmatpush1.bf16.msra.mxu1 %v5542_v60  ;;  %v5628_v30 = vpack.c.bf16 %v1487_v29, %v1486_v28  ;;  %v1488_v12 = vld [vmem:[%s6302_s15 + $0x80] sm:$0xff] }
0x169e   :  { %4582 = vmatprep.subr.bf16.mxu0 %v5116_v5  ;;  %4549 = vmatprep.subr.bf16.mxu1 %v5116_v5 }
0x169f   :  { %v4320_v35 = vpop.f32.mrb[18].mxu0  ;;  %4334 = vmatprep.mubr.msk.f32.mxu1 %vm1172_vm4, %v1136_v32  ;;  %v1489_v32 = vld [vmem:[%s6302_s15 + $0x88] sm:$0xff] }
0x16a0   :  { %v1145_v36 = vpop.f32.mrb[19].mxu0  ;;  %4335 = vmatmul.mubr.msk.f32.gmra.mrb[12].mxu1 %vm1172_vm4, %v1141_v34  ;;  %v1151_v31 = vadd.f32 %v4320_v35, %v3973_v11  ;;  %v5638_v34 = vpack.c.bf16 %v1489_v32, %v1488_v12  ;;  %v1490_v35 = vld [vmem:[%s6302_s15 + $0x90] sm:$0xff] }
0x16a1   :  { %v1146_v37 = vadd.f32 %v3973_v11, %v1145_v36  ;;  %4551 = vmatpush1.bf16.msra.mxu1 %v5551_v0  ;;  %v1491_v36 = vld [vmem:[%s6302_s15 + $0x98] sm:$0xff] }
0x16a2   :  { %4552 = vmatprep.subr.bf16.mxu1 %v5116_v5 }
0x16a3   :  { %v4323_v39 = vpop.f32.mrb[20].mxu0  ;;  %4337 = vmatprep.mubr.msk.f32.mxu1 %vm1172_vm4, %v1146_v37  ;;  %v5648_v37 = vpack.c.bf16 %v1491_v36, %v1490_v35 }
0x16a4   :  { %v1155_v40 = vpop.f32.mrb[21].mxu0  ;;  %4338 = vmatmul.mubr.msk.f32.gmra.mrb[14].mxu1 %vm1172_vm4, %v1151_v31  ;;  %v1161_v26 = vadd.f32 %v4323_v39, %v3973_v11  ;;  %v1492_v31 = vld [vmem:[%s6302_s15 + $0xa0] sm:$0xff]  ;;  %v1493_v39 = vld [vmem:[%s6302_s15 + $0xa8] sm:$0xff] }
0x16a5   :  { %v1156_v41 = vadd.f32 %v3973_v11, %v1155_v40  ;;  %4554 = vmatpush1.bf16.msra.mxu1 %v5579_v23  ;;  %v1484_v11 = vld [vmem:[%s6302_s15 + $0x60] sm:$0xff]  ;;  %v5658_v40 = vpack.c.bf16 %v1493_v39, %v1492_v31 }
0x16a6   :  { %4555 = vmatprep.subr.bf16.mxu1 %v5116_v5  ;;  %v5618_v16 = vpack.c.bf16 %v1485_v57, %v1484_v11 }
0x16a7   :  { %4340 = vmatprep.mubr.msk.f32.mxu1 %vm1172_vm4, %v1156_v41  ;;  %v1494_v41 = vld [vmem:[%s6302_s15 + $0xb0] sm:$0xff] }
0x16a8   :  { %4341 = vmatmul.mubr.msk.f32.gmra.mrb[16].mxu1 %vm1172_vm4, %v1161_v26  ;;  %v1495_v26 = vld [vmem:[%s6302_s15 + $0xb8] sm:$0xff] }
0x16a9   :  { %4557 = vmatpush1.bf16.msra.mxu1 %v5589_v20 }
0x16aa   :  { %4558 = vmatprep.subr.bf16.mxu1 %v5116_v5 }
0x16ad   :  { %4560 = vmatpush1.bf16.msra.mxu1 %v5599_v27 }
0x16ae   :  { %4561 = vmatprep.subr.bf16.mxu1 %v5116_v5 }
0x16b1   :  { %4563 = vmatpush1.bf16.msra.mxu1 %v5609_v53 }
0x16b2   :  { %4564 = vmatprep.subr.bf16.mxu1 %v5116_v5 }
0x16b5   :  { %4566 = vmatpush1.bf16.msra.mxu1 %v5618_v16 }
0x16b6   :  { %4567 = vmatprep.subr.bf16.mxu1 %v5116_v5 }
0x16b9   :  { %4569 = vmatpush1.bf16.msra.mxu1 %v5628_v30 }
0x16ba   :  { %4570 = vmatprep.subr.bf16.mxu1 %v5116_v5 }
0x16bd   :  { %4572 = vmatpush1.bf16.msra.mxu1 %v5638_v34 }
0x16be   :  { %4573 = vmatprep.subr.bf16.mxu1 %v5116_v5 }
0x16c1   :  { %4575 = vmatpush1.bf16.msra.mxu1 %v5648_v37 }
0x16c2   :  { %4576 = vmatprep.subr.bf16.mxu1 %v5116_v5 }
0x16c5   :  { %4578 = vmatpush1.bf16.msra.mxu1 %v5658_v40 }
0x16c6   :  { %4579 = vmatprep.subr.bf16.mxu1 %v5116_v5 }
0x176e   :  { %v1242_v45 = vpop.f32.mrb[22].mxu0 }
0x176f   :  { %v5517_v46 = vadd.f32 %v3982_v44, %v1242_v45  ;;  %v4328_v47 = vpop.f32.mrb[23].mxu0  ;;  %v5519_v48 = vpop.f32.mrb[10].mxu1  ;;  %v5668_v44 = vpack.c.bf16 %v1495_v26, %v1494_v41  ;;  %v1506_v45 = vld [vmem:[%s6330_s25] sm:$0xff]  ;;  %v1507_v41 = vld [vmem:[%s6330_s25 + $0x8] sm:$0xff]  ;;  %v1508_v26 = vld [vmem:[%s6330_s25 + $0x10] sm:$0xff] }
0x1770   :  { %v1416_v49 = vpop.f32.mrb[11].mxu1  ;;  %v1421_v47 = vadd.f32 %v5519_v48, %v5525_v51 }
0x1771   :  { %v1246_v50 = vmul.f32 1.442695, %v5517_v46  ;;  %4581 = vmatpush1.bf16.msra.mxu1 %v5668_v44  ;;  %v5679_v49 = vpop.permute.xlu0 %1460 }
0x1772   :  { %4630 = vmatprep.subr.bf16.mxu1 %v5116_v5 }
0x1773   :  { %4947 = vpow2.f32 %v1246_v50  ;;  %v4336_v52 = vpop.f32.mrb[12].mxu1  ;;  %v1464_v50 = vsel %vm1463_vm5, %v1421_v47, %v5679_v49  ;;  %v1497_v47 = vld [vmem:[%s6304_s17] sm:$0xff] }
0x1774   :  { %v5528_v54 = vadd.f32 %v4336_v52, %v5525_v51  ;;  %v1425_v55 = vpop.f32.mrb[13].mxu1 }
0x1775   :  { %v5531_v56 = vadd.f32 %v5525_v51, %v1425_v55 }
0x1777   :  { %v4339_v19 = vpop.f32.mrb[14].mxu1 }
0x1778   :  { %v5548_v62 = vadd.f32 %v4339_v19, %v5525_v51  ;;  %v1435_v63 = vpop.f32.mrb[15].mxu1 }
0x1779   :  { %v5554_v1 = vadd.f32 %v5525_v51, %v1435_v63 }
0x177b   :  { %v4342_v2 = vpop.f32.mrb[16].mxu1 }
0x177c   :  { %v5558_v3 = vadd.f32 %v4342_v2, %v5525_v51  ;;  %v1445_v4 = vpop.f32.mrb[17].mxu1 }
0x177d   :  { %v4948_v7 = vpop.eup %4947  ;;  %v5562_v8 = vadd.f32 %v5525_v51, %v1445_v4 }
0x177e   :  { %v1253_v9 = vmul.f32 %v4948_v7, %v1251_v25 }
0x1780   :  { %1255 = vrot.lane.b32.xlu1 %v1253_v9, %s5122_s29 }
0x1784   :  { %1825 = vrot.lane.b32.xlu1 %v1506_v45, %s5119_s2  ;;  %v1509_v45 = vld [vmem:[%s6330_s25 + $0x18] sm:$0xff] }
0x1788   :  { %2134 = vrot.lane.b32.xlu1 %v1507_v41, %s5119_s2 }
0x178c   :  { %2443 = vrot.lane.b32.xlu1 %v1508_v26, %s5119_s2 }
0x1790   :  { %2752 = vrot.lane.b32.xlu1 %v1509_v45, %s5119_s2 }
0x17f2   :  { %v1256_v13 = vpop.permute.xlu1 %1255 }
0x17f3   :  { %v5567_v14 = vadd.f32 %v1256_v13, %v5517_v46 }
0x17f5   :  { %3998 = vmatmul.mubr.msk.f32.vlgmr.msra.gmra.mrb[24].mxu0 %vm91_vm1, %v5567_v14 }
0x17f6   :  { %4359 = vmatprep.mubr.msk.f32.mxu0 %vm5117_vm2, %v5118_v10 }
0x18c8   :  { %v1588_v52 = vpop.f32.mrb[24].mxu0 }
0x18c9   :  { %v1589_v55 = vadd.f32 %v1588_v52, %v1464_v50  ;;  %v1590_v33 = vpop.f32.mrb[25].mxu0  ;;  %v1498_v50 = vld [vmem:[%s6304_s17 + $0x8] sm:$0xff] }
0x18ca   :  { %v1591_v58 = vadd.f32 %v1590_v33, %v5679_v49  ;;  %v5704_v52 = vpack.c.bf16 %v1498_v50, %v1497_v47  ;;  %v1500_v33 = vld [vmem:[%s6304_s17 + $0x18] sm:$0xff]  ;;  %v5777_v50 = vld [vmem:[%s6305_s18] ss:$0 sm:$0xff] }
0x18cb   :  { %v1599_v59 = vand.u32 2147483647, %v1589_v55  ;;  %v1593_v11 = vmax.f32 %v1589_v55, 0.0  ;;  %vm1595_vm9 = vcmp.ne.f32.partialorder %v1589_v55, %v1589_v55 }
0x18cc   :  { %v1600_v61 = vand.u32 2147483647, %v1591_v58  ;;  %v1594_v29 = vmax.f32 %v1591_v58, 0.0  ;;  %vm1596_vm8 = vcmp.ne.f32.partialorder %v1591_v58, %v1591_v58  ;;  %4584 = vmatpush3.bf16.msra.mxu0 %v5704_v52 }
0x18cd   :  { %v1601_v19 = vsub.f32 0.0, %v1599_v59  ;;  %v1510_v59 = vld [vmem:[%s6330_s25 + $0x20] sm:$0xff]  ;;  %4585 = vmatprep.subr.bf16.mxu0 %v5116_v5 }
0x18ce   :  { %v1602_v63 = vsub.f32 0.0, %v1600_v61  ;;  %3061 = vrot.lane.b32.xlu1 %v1510_v59, %s5119_s2  ;;  %v1511_v61 = vld [vmem:[%s6330_s25 + $0x28] sm:$0xff] }
0x18cf   :  { %v1603_v2 = vmul.f32 1.442695, %v1601_v19  ;;  %v1512_v19 = vld [vmem:[%s6330_s25 + $0x30] sm:$0xff] }
0x18d0   :  { %v1605_v4 = vmul.f32 1.442695, %v1602_v63  ;;  %v1501_v63 = vld [vmem:[%s6304_s17 + $0x20] sm:$0xff] }
0x18d1   :  { %4949 = vpow2.f32 %v1603_v2  ;;  %v1502_v2 = vld [vmem:[%s6304_s17 + $0x28] sm:$0xff] }
0x18d2   :  { %4951 = vpow2.f32 %v1605_v4  ;;  %3370 = vrot.lane.b32.xlu1 %v1511_v61, %s5119_s2  ;;  %v5741_v4 = vpack.c.bf16 %v1502_v2, %v1501_v63 }
0x18d6   :  { %3679 = vrot.lane.b32.xlu1 %v1512_v19, %s5119_s2 }
0x18db   :  { %v4950_v48 = vpop.eup %4949 }
0x18dc   :  { %v4952_v51 = vpop.eup %4951  ;;  %v1607_v7 = vadd.f32 1.0, %v4950_v48  ;;  %v1610_v9 = vmul.f32 -0.5, %v4950_v48  ;;  %v1613_v17 = vand.u32 2147483647, %v4950_v48 }
0x18dd   :  { %v1616_v25 = vadd.f32 1.0, %v4952_v51  ;;  %v1619_v13 = vmul.f32 -0.5, %v4952_v51  ;;  %v1622_v18 = vand.u32 2147483647, %v4952_v51 }
0x18de   :  { %4953 = vlog2.f32 %v1607_v7  ;;  %v1611_v15 = vadd.f32 1.0, %v1610_v9  ;;  %vm1614_vm6 = vcmp.lt.f32.partialorder %v1613_v17, 0.0004427343 }
0x18df   :  { %4955 = vlog2.f32 %v1616_v25  ;;  %v1620_v21 = vadd.f32 1.0, %v1619_v13  ;;  %vm1623_vm7 = vcmp.lt.f32.partialorder %v1622_v18, 0.0004427343  ;;  %v5764_v25 = vld [vmem:[%s6303_s16] ss:$0 sm:$0xff] }
0x18e0   :  { %v1612_v38 = vmul.f32 %v4950_v48, %v1611_v15  ;;  %v1503_v48 = vld [vmem:[%s6304_s17 + $0x30] sm:$0xff] }
0x18e1   :  { %v1621_v28 = vmul.f32 %v4952_v51, %v1620_v21  ;;  %v1504_v51 = vld [vmem:[%s6304_s17 + $0x38] sm:$0xff] }
0x18e2   :  { %v5750_v7 = vpack.c.bf16 %v1504_v51, %v1503_v48  ;;  %v1465_v48 = vsel %vm1463_vm5, %v5531_v56, %v5679_v49 }
0x18e8   :  { %v4954_v22 = vpop.eup %4953 }
0x18e9   :  { %v4956_v24 = vpop.eup %4955  ;;  %v1609_v6 = vmul.f32 0.6931472, %v4954_v22 }
0x18ea   :  { %v1618_v57 = vmul.f32 0.6931472, %v4956_v24 }
0x18eb   :  { %v1615_v12 = vsel %vm1614_vm6, %v1612_v38, %v1609_v6 }
0x18ec   :  { %v1624_v32 = vsel %vm1623_vm7, %v1621_v28, %v1618_v57  ;;  %v1625_v35 = vadd.f32 %v1615_v12, %v1593_v11  ;;  %v1826_v28 = vpop.permute.xlu1 %1825 }
0x18ed   :  { %v1626_v36 = vadd.f32 %v1624_v32, %v1594_v29 }
0x18ee   :  { %v1627_v39 = vsel %vm1595_vm9, %v1589_v55, %v1625_v35  ;;  %v1499_v55 = vld [vmem:[%s6304_s17 + $0x10] sm:$0xff] }
0x18ef   :  { %v1628_v31 = vsel %vm1596_vm8, %v1591_v58, %v1626_v36  ;;  %v5714_v58 = vpack.c.bf16 %v1500_v33, %v1499_v55 }
0x18f0   :  { %4000 = vmatprep.mubr.msk.f32.mxu1 %vm1463_vm5, %v1628_v31 }
0x18f1   :  { %1703 = vmatmul.mubr.f32.vlgmr.msra.gmra.mrb[18].mxu1 %v1627_v39  ;;  %4587 = vmatpush3.bf16.msra.mxu0 %v5714_v58 }
0x18f2   :  { %4378 = vmatprep.mubr.msk.f32.mxu1 %vm5117_vm2, %v5118_v10  ;;  %4632 = vmatpush3.bf16.msra.mxu1 %v5704_v52 }
0x18f3   :  { %4633 = vmatprep.subr.bf16.mxu1 %v5116_v5  ;;  %4588 = vmatprep.subr.bf16.mxu0 %v5116_v5 }
0x18f5   :  { %4590 = vmatpush3.bf16.msra.mxu0 %v5741_v4 }
0x18f6   :  { %4635 = vmatpush3.bf16.msra.mxu1 %v5714_v58  ;;  %4591 = vmatprep.subr.bf16.mxu0 %v5116_v5 }
0x18f7   :  { %4636 = vmatprep.subr.bf16.mxu1 %v5116_v5 }
0x18f9   :  { %4593 = vmatpush3.bf16.msra.mxu0 %v5750_v7 }
0x18fa   :  { %4638 = vmatpush3.bf16.msra.mxu1 %v5741_v4  ;;  %4004 = vmatprep.subr.msk.mxu0 %vm116_vm0, %v5507_v43 }
0x18fb   :  { %4639 = vmatprep.subr.bf16.mxu1 %v5116_v5 }
0x18fe   :  { %4641 = vmatpush3.bf16.msra.mxu1 %v5750_v7 }
0x18ff   :  { %4010 = vmatprep.subr.msk.mxu1 %vm116_vm0, %v5507_v43 }
0x19c4   :  { %v1704_v9 = vpop.f32.mrb[18].mxu1 }
0x19c5   :  { %v1705_v13 = vadd.f32 %v5764_v25, %v1704_v9  ;;  %v1706_v15 = vpop.f32.mrb[19].mxu1 }
0x19c7   :  { %v1711_v21 = vand.u32 2147483647, %v1705_v13  ;;  %v4001_v17 = vmul.f32 -1.442695, %v1705_v13  ;;  %v1708_v41 = vmax.f32 %v1705_v13, 0.0  ;;  %vm1709_vm11 = vcmp.ne.f32.partialorder %v1705_v13, %v1705_v13 }
0x19c9   :  { %v1712_v18 = vsub.f32 0.0, %v1711_v21  ;;  %4957 = vpow2.f32 %v4001_v17 }
0x19cb   :  { %v1713_v22 = vmul.f32 1.442695, %v1712_v18 }
0x19cd   :  { %4959 = vpow2.f32 %v1713_v22 }
0x19d3   :  { %v4958_v24 = vpop.eup %4957 }
0x19d4   :  { %v1729_v6 = vadd.f32 1.0, %v4958_v24 }
0x19d6   :  { %4961 = vrcp.f32 %v1729_v6 }
0x19d7   :  { %v4960_v38 = vpop.eup %4959 }
0x19d8   :  { %v1715_v11 = vadd.f32 1.0, %v4960_v38  ;;  %v1718_v57 = vmul.f32 -0.5, %v4960_v38  ;;  %v1721_v35 = vand.u32 2147483647, %v4960_v38 }
0x19da   :  { %4963 = vlog2.f32 %v1715_v11  ;;  %v1719_v32 = vadd.f32 1.0, %v1718_v57  ;;  %vm1722_vm10 = vcmp.lt.f32.partialorder %v1721_v35, 0.0004427343 }
0x19dc   :  { %v1720_v39 = vmul.f32 %v4960_v38, %v1719_v32 }
0x19e0   :  { %v4962_v29 = vpop.eup %4961 }
0x19e1   :  { %v1828_v12 = vmul.f32 %v4962_v29, %v1826_v28  ;;  %1817 = vrot.lane.b32.xlu1 %v4962_v29, %s5119_s2 }
0x19e3   :  { %1830 = vrot.lane.b32.xlu0 %v1828_v12, %s5119_s2 }
0x19e4   :  { %v4964_v36 = vpop.eup %4963 }
0x19e5   :  { %v1717_v31 = vmul.f32 0.6931472, %v4964_v36 }
0x19e7   :  { %v1723_v26 = vsel %vm1722_vm10, %v1720_v39, %v1717_v31 }
0x19e8   :  { %v1724_v45 = vadd.f32 %v1723_v26, %v1708_v41 }
0x19ea   :  { %v1725_v47 = vsel %vm1709_vm11, %v1705_v13, %v1724_v45 }
0x19eb   :  { %4360 = vmatmul.mubr.msk.f32.vlgmr.msra.gmra.mrb[26].mxu0 %vm1463_vm5, %v1725_v47 }
0x19ec   :  { %4005 = vmatpush1.msk.msra.mxu0 %vm116_vm0, %v5503_v42  ;;  %1907 = vmatprep.mubr.f32.mxu0 %v5118_v10 }
0x19ed   :  { %4594 = vmatprep.subr.bf16.mxu0 %v5116_v5 }
0x1a55   :  { %v1831_v63 = vpop.permute.xlu0 %1830 }
0x1abe   :  { %v1807_v55 = vpop.f32.mrb[26].mxu0 }
0x1abf   :  { %v5780_v33 = vadd.f32 %v5777_v50, %v1807_v55  ;;  %v4361_v59 = vpop.f32.mrb[27].mxu0 }
0x1ac1   :  { %v1822_v61 = vmul.f32 0.01, %v5780_v33 }
0x1ac3   :  { %v1823_v19 = vadd.f32 %v1822_v61, %v5567_v14 }
0x1ac5   :  { %v5784_v2 = vadd.f32 %v1831_v63, %v1823_v19 }
0x1ac7   :  { %4006 = vmatmul.mubr.msk.f32.vlgmr.msra.gmra.mrb[28].mxu0 %vm91_vm1, %v5784_v2 }
0x1ac8   :  { %4596 = vmatpush1.bf16.msra.mxu0 %v5542_v60 }
0x1ac9   :  { %4597 = vmatprep.subr.bf16.mxu0 %v5116_v5 }
0x1acc   :  { %4599 = vmatpush1.bf16.msra.mxu0 %v5551_v0 }
0x1acd   :  { %4600 = vmatprep.subr.bf16.mxu0 %v5116_v5 }
0x1ad0   :  { %4602 = vmatpush1.bf16.msra.mxu0 %v5579_v23 }
0x1ad1   :  { %4603 = vmatprep.subr.bf16.mxu0 %v5116_v5 }
0x1ad4   :  { %4605 = vmatpush1.bf16.msra.mxu0 %v5589_v20 }
0x1ad5   :  { %4606 = vmatprep.subr.bf16.mxu0 %v5116_v5 }
0x1ad8   :  { %4608 = vmatpush1.bf16.msra.mxu0 %v5599_v27 }
0x1ad9   :  { %4609 = vmatprep.subr.bf16.mxu0 %v5116_v5 }
0x1adc   :  { %4611 = vmatpush1.bf16.msra.mxu0 %v5609_v53 }
0x1add   :  { %4612 = vmatprep.subr.bf16.mxu0 %v5116_v5 }
0x1ae0   :  { %4614 = vmatpush1.bf16.msra.mxu0 %v5618_v16 }
0x1ae1   :  { %4615 = vmatprep.subr.bf16.mxu0 %v5116_v5 }
0x1ae4   :  { %4617 = vmatpush1.bf16.msra.mxu0 %v5628_v30 }
0x1ae5   :  { %4618 = vmatprep.subr.bf16.mxu0 %v5116_v5 }
0x1ae8   :  { %4620 = vmatpush1.bf16.msra.mxu0 %v5638_v34 }
0x1ae9   :  { %4621 = vmatprep.subr.bf16.mxu0 %v5116_v5 }
0x1aec   :  { %4623 = vmatpush1.bf16.msra.mxu0 %v5648_v37 }
0x1aed   :  { %4624 = vmatprep.subr.bf16.mxu0 %v5116_v5 }
0x1af0   :  { %4626 = vmatpush1.bf16.msra.mxu0 %v5658_v40 }
0x1af1   :  { %4627 = vmatprep.subr.bf16.mxu0 %v5116_v5 }
0x1af4   :  { %4629 = vmatpush1.bf16.msra.mxu0 %v5668_v44 }
0x1af5   :  { %4678 = vmatprep.subr.bf16.mxu0 %v5116_v5 }
0x1b9a   :  { %v1909_v51 = vpop.f32.mrb[28].mxu0 }
0x1b9b   :  { %v1910_v9 = vadd.f32 %v1909_v51, %v1465_v48  ;;  %v1911_v13 = vpop.f32.mrb[29].mxu0 }
0x1b9c   :  { %v1912_v15 = vadd.f32 %v1911_v13, %v5679_v49 }
0x1b9d   :  { %v1920_v21 = vand.u32 2147483647, %v1910_v9  ;;  %v1914_v45 = vmax.f32 %v1910_v9, 0.0  ;;  %vm1916_vm15 = vcmp.ne.f32.partialorder %v1910_v9, %v1910_v9 }
0x1b9e   :  { %v1921_v17 = vand.u32 2147483647, %v1912_v15  ;;  %v1915_v59 = vmax.f32 %v1912_v15, 0.0  ;;  %vm1917_vm14 = vcmp.ne.f32.partialorder %v1912_v15, %v1912_v15 }
0x1b9f   :  { %v1922_v18 = vsub.f32 0.0, %v1920_v21 }
0x1ba0   :  { %v1923_v22 = vsub.f32 0.0, %v1921_v17 }
0x1ba1   :  { %v1924_v24 = vmul.f32 1.442695, %v1922_v18 }
0x1ba2   :  { %v1926_v6 = vmul.f32 1.442695, %v1923_v22 }
0x1ba3   :  { %4965 = vpow2.f32 %v1924_v24 }
0x1ba4   :  { %4967 = vpow2.f32 %v1926_v6 }
0x1bad   :  { %v4966_v38 = vpop.eup %4965 }
0x1bae   :  { %v4968_v11 = vpop.eup %4967  ;;  %v1928_v57 = vadd.f32 1.0, %v4966_v38  ;;  %v1931_v56 = vmul.f32 -0.5, %v4966_v38  ;;  %v1934_v35 = vand.u32 2147483647, %v4966_v38 }
0x1baf   :  { %v1937_v28 = vadd.f32 1.0, %v4968_v11  ;;  %v1940_v29 = vmul.f32 -0.5, %v4968_v11  ;;  %v1943_v36 = vand.u32 2147483647, %v4968_v11 }
0x1bb0   :  { %4969 = vlog2.f32 %v1928_v57  ;;  %v1932_v12 = vadd.f32 1.0, %v1931_v56  ;;  %vm1935_vm12 = vcmp.lt.f32.partialorder %v1934_v35, 0.0004427343 }
0x1bb1   :  { %4971 = vlog2.f32 %v1937_v28  ;;  %v1941_v32 = vadd.f32 1.0, %v1940_v29  ;;  %vm1944_vm13 = vcmp.lt.f32.partialorder %v1943_v36, 0.0004427343  ;;  %v2135_v29 = vpop.permute.xlu1 %2134 }
0x1bb2   :  { %v1933_v26 = vmul.f32 %v4966_v38, %v1932_v12 }
0x1bb3   :  { %v1942_v55 = vmul.f32 %v4968_v11, %v1941_v32 }
0x1bba   :  { %v4970_v31 = vpop.eup %4969 }
0x1bbb   :  { %v4972_v39 = vpop.eup %4971  ;;  %v1930_v41 = vmul.f32 0.6931472, %v4970_v31 }
0x1bbc   :  { %v1939_v47 = vmul.f32 0.6931472, %v4972_v39 }
0x1bbd   :  { %v1936_v61 = vsel %vm1935_vm12, %v1933_v26, %v1930_v41 }
0x1bbe   :  { %v1945_v19 = vsel %vm1944_vm13, %v1942_v55, %v1939_v47  ;;  %v1946_v63 = vadd.f32 %v1936_v61, %v1914_v45 }
0x1bbf   :  { %v1947_v48 = vadd.f32 %v1945_v19, %v1915_v59 }
0x1bc0   :  { %v1948_v13 = vsel %vm1916_vm15, %v1910_v9, %v1946_v63 }
0x1bc1   :  { %v1949_v51 = vsel %vm1917_vm14, %v1912_v15, %v1947_v48 }
0x1bc2   :  { %4007 = vmatprep.mubr.msk.f32.mxu0 %vm1463_vm5, %v1949_v51 }
0x1bc3   :  { %2018 = vmatmul.mubr.f32.vlgmr.msra.gmra.mrb[30].mxu0 %v1948_v13  ;;  %v1466_v13 = vsel %vm1463_vm5, %v5528_v54, %v5679_v49 }
0x1bc4   :  { %4680 = vmatpush3.bf16.msra.mxu0 %v5704_v52  ;;  %4397 = vmatprep.mubr.msk.f32.mxu0 %vm5117_vm2, %v5118_v10 }
0x1bc5   :  { %4681 = vmatprep.subr.bf16.mxu0 %v5116_v5 }
0x1bc8   :  { %4683 = vmatpush3.bf16.msra.mxu0 %v5714_v58 }
0x1bc9   :  { %4684 = vmatprep.subr.bf16.mxu0 %v5116_v5 }
0x1bcc   :  { %4686 = vmatpush3.bf16.msra.mxu0 %v5741_v4 }
0x1bcd   :  { %4687 = vmatprep.subr.bf16.mxu0 %v5116_v5 }
0x1bd0   :  { %4689 = vmatpush3.bf16.msra.mxu0 %v5750_v7 }
0x1bd1   :  { %4016 = vmatprep.subr.msk.mxu0 %vm116_vm0, %v5507_v43 }
0x1c96   :  { %v2019_v9 = vpop.f32.mrb[30].mxu0 }
0x1c97   :  { %v2020_v15 = vadd.f32 %v5764_v25, %v2019_v9  ;;  %v2021_v21 = vpop.f32.mrb[31].mxu0 }
0x1c99   :  { %v2026_v17 = vand.u32 2147483647, %v2020_v15  ;;  %v4008_v18 = vmul.f32 -1.442695, %v2020_v15  ;;  %v2023_v41 = vmax.f32 %v2020_v15, 0.0  ;;  %vm2024_vm4 = vcmp.ne.f32.partialorder %v2020_v15, %v2020_v15 }
0x1c9b   :  { %v2027_v22 = vsub.f32 0.0, %v2026_v17  ;;  %4973 = vpow2.f32 %v4008_v18 }
0x1c9d   :  { %v2028_v24 = vmul.f32 1.442695, %v2027_v22 }
0x1c9f   :  { %4975 = vpow2.f32 %v2028_v24 }
0x1ca5   :  { %v4974_v6 = vpop.eup %4973 }
0x1ca6   :  { %v2044_v38 = vadd.f32 1.0, %v4974_v6 }
0x1ca8   :  { %4977 = vrcp.f32 %v2044_v38 }
0x1ca9   :  { %v4976_v11 = vpop.eup %4975 }
0x1caa   :  { %v2030_v57 = vadd.f32 1.0, %v4976_v11  ;;  %v2033_v28 = vmul.f32 -0.5, %v4976_v11  ;;  %v2036_v35 = vand.u32 2147483647, %v4976_v11 }
0x1cac   :  { %4979 = vlog2.f32 %v2030_v57  ;;  %v2034_v32 = vadd.f32 1.0, %v2033_v28  ;;  %vm2037_vm3 = vcmp.lt.f32.partialorder %v2036_v35, 0.0004427343 }
0x1cae   :  { %v2035_v39 = vmul.f32 %v4976_v11, %v2034_v32 }
0x1cb2   :  { %v5829_v56 = vpop.eup %4977 }
0x1cb3   :  { %v2137_v12 = vmul.f32 %v5829_v56, %v2135_v29 }
0x1cb5   :  { %2139 = vrot.lane.b32.xlu0 %v2137_v12, %s5119_s2 }
0x1cb6   :  { %v4980_v36 = vpop.eup %4979 }
0x1cb7   :  { %v2032_v31 = vmul.f32 0.6931472, %v4980_v36 }
0x1cb9   :  { %v2038_v26 = vsel %vm2037_vm3, %v2035_v39, %v2032_v31 }
0x1cba   :  { %v2039_v45 = vadd.f32 %v2038_v26, %v2023_v41 }
0x1cbc   :  { %v2040_v47 = vsel %vm2024_vm4, %v2020_v15, %v2039_v45 }
0x1cbd   :  { %4379 = vmatmul.mubr.msk.f32.vlgmr.msra.gmra.mrb[20].mxu1 %vm1463_vm5, %v2040_v47 }
0x1cbe   :  { %4011 = vmatpush1.msk.msra.mxu1 %vm116_vm0, %v5503_v42  ;;  %2216 = vmatprep.mubr.f32.mxu1 %v5118_v10 }
0x1cbf   :  { %4642 = vmatprep.subr.bf16.mxu1 %v5116_v5 }
0x1d27   :  { %v2140_v48 = vpop.permute.xlu0 %2139 }
0x1d90   :  { %v2116_v55 = vpop.f32.mrb[20].mxu1 }
0x1d91   :  { %v5839_v59 = vadd.f32 %v5777_v50, %v2116_v55  ;;  %v4380_v61 = vpop.f32.mrb[21].mxu1 }
0x1d93   :  { %v2131_v19 = vmul.f32 0.01, %v5839_v59 }
0x1d95   :  { %v2132_v63 = vadd.f32 %v2131_v19, %v5784_v2 }
0x1d97   :  { %v5843_v51 = vadd.f32 %v2140_v48, %v2132_v63 }
0x1d99   :  { %4012 = vmatmul.mubr.msk.f32.vlgmr.msra.gmra.mrb[22].mxu1 %vm91_vm1, %v5843_v51 }
0x1d9a   :  { %4644 = vmatpush1.bf16.msra.mxu1 %v5542_v60 }
0x1d9b   :  { %4645 = vmatprep.subr.bf16.mxu1 %v5116_v5 }
0x1d9e   :  { %4647 = vmatpush1.bf16.msra.mxu1 %v5551_v0 }
0x1d9f   :  { %4648 = vmatprep.subr.bf16.mxu1 %v5116_v5 }
0x1da2   :  { %4650 = vmatpush1.bf16.msra.mxu1 %v5579_v23 }
0x1da3   :  { %4651 = vmatprep.subr.bf16.mxu1 %v5116_v5 }
0x1da6   :  { %4653 = vmatpush1.bf16.msra.mxu1 %v5589_v20 }
0x1da7   :  { %4654 = vmatprep.subr.bf16.mxu1 %v5116_v5 }
0x1daa   :  { %4656 = vmatpush1.bf16.msra.mxu1 %v5599_v27 }
0x1dab   :  { %4657 = vmatprep.subr.bf16.mxu1 %v5116_v5 }
0x1dae   :  { %4659 = vmatpush1.bf16.msra.mxu1 %v5609_v53 }
0x1daf   :  { %4660 = vmatprep.subr.bf16.mxu1 %v5116_v5 }
0x1db2   :  { %4662 = vmatpush1.bf16.msra.mxu1 %v5618_v16 }
0x1db3   :  { %4663 = vmatprep.subr.bf16.mxu1 %v5116_v5 }
0x1db6   :  { %4665 = vmatpush1.bf16.msra.mxu1 %v5628_v30 }
0x1db7   :  { %4666 = vmatprep.subr.bf16.mxu1 %v5116_v5 }
0x1dba   :  { %4668 = vmatpush1.bf16.msra.mxu1 %v5638_v34 }
0x1dbb   :  { %4669 = vmatprep.subr.bf16.mxu1 %v5116_v5 }
0x1dbe   :  { %4671 = vmatpush1.bf16.msra.mxu1 %v5648_v37 }
0x1dbf   :  { %4672 = vmatprep.subr.bf16.mxu1 %v5116_v5 }
0x1dc2   :  { %4674 = vmatpush1.bf16.msra.mxu1 %v5658_v40 }
0x1dc3   :  { %4675 = vmatprep.subr.bf16.mxu1 %v5116_v5 }
0x1dc6   :  { %4677 = vmatpush1.bf16.msra.mxu1 %v5668_v44 }
0x1dc7   :  { %4726 = vmatprep.subr.bf16.mxu1 %v5116_v5 }
0x1e6c   :  { %v2218_v9 = vpop.f32.mrb[22].mxu1 }
0x1e6d   :  { %v2219_v15 = vadd.f32 %v2218_v9, %v1466_v13  ;;  %v2220_v21 = vpop.f32.mrb[23].mxu1 }
0x1e6e   :  { %v2221_v17 = vadd.f32 %v2220_v21, %v5679_v49 }
0x1e6f   :  { %v2229_v18 = vand.u32 2147483647, %v2219_v15  ;;  %v2223_v55 = vmax.f32 %v2219_v15, 0.0  ;;  %vm2225_vm9 = vcmp.ne.f32.partialorder %v2219_v15, %v2219_v15 }
0x1e70   :  { %v2230_v22 = vand.u32 2147483647, %v2221_v17  ;;  %v2224_v63 = vmax.f32 %v2221_v17, 0.0  ;;  %vm2226_vm8 = vcmp.ne.f32.partialorder %v2221_v17, %v2221_v17 }
0x1e71   :  { %v2231_v24 = vsub.f32 0.0, %v2229_v18 }
0x1e72   :  { %v2232_v6 = vsub.f32 0.0, %v2230_v22 }
0x1e73   :  { %v2233_v38 = vmul.f32 1.442695, %v2231_v24 }
0x1e74   :  { %v2235_v11 = vmul.f32 1.442695, %v2232_v6 }
0x1e75   :  { %4981 = vpow2.f32 %v2233_v38 }
0x1e76   :  { %4983 = vpow2.f32 %v2235_v11 }
0x1e7f   :  { %v4982_v57 = vpop.eup %4981 }
0x1e80   :  { %v4984_v28 = vpop.eup %4983  ;;  %v2237_v29 = vadd.f32 1.0, %v4982_v57  ;;  %v2240_v54 = vmul.f32 -0.5, %v4982_v57  ;;  %v2243_v31 = vand.u32 2147483647, %v4982_v57 }
0x1e81   :  { %v2246_v12 = vadd.f32 1.0, %v4984_v28  ;;  %v2249_v32 = vmul.f32 -0.5, %v4984_v28  ;;  %v2252_v39 = vand.u32 2147483647, %v4984_v28 }
0x1e82   :  { %4985 = vlog2.f32 %v2237_v29  ;;  %v2241_v35 = vadd.f32 1.0, %v2240_v54  ;;  %vm2244_vm6 = vcmp.lt.f32.partialorder %v2243_v31, 0.0004427343 }
0x1e83   :  { %4987 = vlog2.f32 %v2246_v12  ;;  %v2250_v36 = vadd.f32 1.0, %v2249_v32  ;;  %vm2253_vm7 = vcmp.lt.f32.partialorder %v2252_v39, 0.0004427343 }
0x1e84   :  { %v2242_v47 = vmul.f32 %v4982_v57, %v2241_v35 }
0x1e85   :  { %v2251_v19 = vmul.f32 %v4984_v28, %v2250_v36  ;;  %v2444_v36 = vpop.permute.xlu1 %2443 }
0x1e8c   :  { %v4986_v41 = vpop.eup %4985 }
0x1e8d   :  { %v4988_v26 = vpop.eup %4987  ;;  %v2239_v45 = vmul.f32 0.6931472, %v4986_v41 }
0x1e8e   :  { %v2248_v61 = vmul.f32 0.6931472, %v4988_v26 }
0x1e8f   :  { %v2245_v48 = vsel %vm2244_vm6, %v2242_v47, %v2239_v45 }
0x1e90   :  { %v2254_v13 = vsel %vm2253_vm7, %v2251_v19, %v2248_v61  ;;  %v2255_v9 = vadd.f32 %v2245_v48, %v2223_v55 }
0x1e91   :  { %v2256_v21 = vadd.f32 %v2254_v13, %v2224_v63 }
0x1e92   :  { %v2257_v22 = vsel %vm2225_vm9, %v2219_v15, %v2255_v9 }
0x1e93   :  { %v2258_v18 = vsel %vm2226_vm8, %v2221_v17, %v2256_v21 }
0x1e94   :  { %4013 = vmatprep.mubr.msk.f32.mxu1 %vm1463_vm5, %v2258_v18 }
0x1e95   :  { %2327 = vmatmul.mubr.f32.vlgmr.msra.gmra.mrb[24].mxu1 %v2257_v22 }
0x1e96   :  { %4728 = vmatpush3.bf16.msra.mxu1 %v5704_v52  ;;  %4416 = vmatprep.mubr.msk.f32.mxu1 %vm5117_vm2, %v5118_v10 }
0x1e97   :  { %4729 = vmatprep.subr.bf16.mxu1 %v5116_v5 }
0x1e9a   :  { %4731 = vmatpush3.bf16.msra.mxu1 %v5714_v58 }
0x1e9b   :  { %4732 = vmatprep.subr.bf16.mxu1 %v5116_v5 }
0x1e9e   :  { %4734 = vmatpush3.bf16.msra.mxu1 %v5741_v4 }
0x1e9f   :  { %4735 = vmatprep.subr.bf16.mxu1 %v5116_v5 }
0x1ea2   :  { %4737 = vmatpush3.bf16.msra.mxu1 %v5750_v7 }
0x1ea3   :  { %4022 = vmatprep.subr.msk.mxu1 %vm116_vm0, %v5507_v43 }
0x1f68   :  { %v2328_v15 = vpop.f32.mrb[24].mxu1 }
0x1f69   :  { %v2329_v17 = vadd.f32 %v5764_v25, %v2328_v15  ;;  %v2330_v24 = vpop.f32.mrb[25].mxu1 }
0x1f6b   :  { %v2335_v6 = vand.u32 2147483647, %v2329_v17  ;;  %v4014_v38 = vmul.f32 -1.442695, %v2329_v17  ;;  %v2332_v55 = vmax.f32 %v2329_v17, 0.0  ;;  %vm2333_vm11 = vcmp.ne.f32.partialorder %v2329_v17, %v2329_v17 }
0x1f6d   :  { %v2336_v11 = vsub.f32 0.0, %v2335_v6  ;;  %4989 = vpow2.f32 %v4014_v38 }
0x1f6f   :  { %v2337_v57 = vmul.f32 1.442695, %v2336_v11 }
0x1f71   :  { %4991 = vpow2.f32 %v2337_v57 }
0x1f77   :  { %v4990_v28 = vpop.eup %4989 }
0x1f78   :  { %v2353_v29 = vadd.f32 1.0, %v4990_v28 }
0x1f7a   :  { %4993 = vrcp.f32 %v2353_v29 }
0x1f7b   :  { %v4992_v12 = vpop.eup %4991 }
0x1f7c   :  { %v2339_v54 = vadd.f32 1.0, %v4992_v12  ;;  %v2342_v32 = vmul.f32 -0.5, %v4992_v12  ;;  %v2345_v41 = vand.u32 2147483647, %v4992_v12 }
0x1f7e   :  { %4995 = vlog2.f32 %v2339_v54  ;;  %v2343_v39 = vadd.f32 1.0, %v2342_v32  ;;  %vm2346_vm10 = vcmp.lt.f32.partialorder %v2345_v41, 0.0004427343 }
0x1f80   :  { %v2344_v47 = vmul.f32 %v4992_v12, %v2343_v39 }
0x1f84   :  { %v4994_v35 = vpop.eup %4993 }
0x1f85   :  { %2435 = vrot.lane.b32.xlu1 %v4994_v35, %s5119_s2  ;;  %v2446_v31 = vmul.f32 %v4994_v35, %v2444_v36 }
0x1f87   :  { %2448 = vrot.lane.b32.xlu0 %v2446_v31, %s5119_s2 }
0x1f88   :  { %v4996_v26 = vpop.eup %4995 }
0x1f89   :  { %v2341_v45 = vmul.f32 0.6931472, %v4996_v26 }
0x1f8b   :  { %v2347_v61 = vsel %vm2346_vm10, %v2344_v47, %v2341_v45 }
0x1f8c   :  { %v2348_v19 = vadd.f32 %v2347_v61, %v2332_v55 }
0x1f8e   :  { %v2349_v63 = vsel %vm2333_vm11, %v2329_v17, %v2348_v19 }
0x1f8f   :  { %4398 = vmatmul.mubr.msk.f32.vlgmr.msra.gmra.mrb[32].mxu0 %vm1463_vm5, %v2349_v63 }
0x1f90   :  { %4017 = vmatpush1.msk.msra.mxu0 %vm116_vm0, %v5503_v42  ;;  %2525 = vmatprep.mubr.f32.mxu0 %v5118_v10  ;;  %v1467_v42 = vsel %vm1463_vm5, %v5554_v1, %v5679_v49 }
0x1f91   :  { %4690 = vmatprep.subr.bf16.mxu0 %v5116_v5 }
0x1ff9   :  { %v2449_v22 = vpop.permute.xlu0 %2448 }
0x2062   :  { %v2425_v48 = vpop.f32.mrb[32].mxu0 }
0x2063   :  { %v5896_v13 = vadd.f32 %v5777_v50, %v2425_v48  ;;  %v4399_v9 = vpop.f32.mrb[33].mxu0 }
0x2065   :  { %v2440_v21 = vmul.f32 0.01, %v5896_v13 }
0x2067   :  { %v2441_v18 = vadd.f32 %v2440_v21, %v5843_v51 }
0x2069   :  { %v5900_v15 = vadd.f32 %v2449_v22, %v2441_v18 }
0x206b   :  { %4018 = vmatmul.mubr.msk.f32.vlgmr.msra.gmra.mrb[34].mxu0 %vm91_vm1, %v5900_v15 }
0x206c   :  { %4692 = vmatpush1.bf16.msra.mxu0 %v5542_v60 }
0x206d   :  { %4693 = vmatprep.subr.bf16.mxu0 %v5116_v5 }
0x2070   :  { %4695 = vmatpush1.bf16.msra.mxu0 %v5551_v0 }
0x2071   :  { %4696 = vmatprep.subr.bf16.mxu0 %v5116_v5 }
0x2074   :  { %4698 = vmatpush1.bf16.msra.mxu0 %v5579_v23 }
0x2075   :  { %4699 = vmatprep.subr.bf16.mxu0 %v5116_v5 }
0x2078   :  { %4701 = vmatpush1.bf16.msra.mxu0 %v5589_v20 }
0x2079   :  { %4702 = vmatprep.subr.bf16.mxu0 %v5116_v5 }
0x207c   :  { %4704 = vmatpush1.bf16.msra.mxu0 %v5599_v27 }
0x207d   :  { %4705 = vmatprep.subr.bf16.mxu0 %v5116_v5 }
0x2080   :  { %4707 = vmatpush1.bf16.msra.mxu0 %v5609_v53 }
0x2081   :  { %4708 = vmatprep.subr.bf16.mxu0 %v5116_v5 }
0x2084   :  { %4710 = vmatpush1.bf16.msra.mxu0 %v5618_v16 }
0x2085   :  { %4711 = vmatprep.subr.bf16.mxu0 %v5116_v5 }
0x2088   :  { %4713 = vmatpush1.bf16.msra.mxu0 %v5628_v30 }
0x2089   :  { %4714 = vmatprep.subr.bf16.mxu0 %v5116_v5 }
0x208c   :  { %4716 = vmatpush1.bf16.msra.mxu0 %v5638_v34 }
0x208d   :  { %4717 = vmatprep.subr.bf16.mxu0 %v5116_v5 }
0x2090   :  { %4719 = vmatpush1.bf16.msra.mxu0 %v5648_v37 }
0x2091   :  { %4720 = vmatprep.subr.bf16.mxu0 %v5116_v5 }
0x2094   :  { %4722 = vmatpush1.bf16.msra.mxu0 %v5658_v40 }
0x2095   :  { %4723 = vmatprep.subr.bf16.mxu0 %v5116_v5 }
0x2098   :  { %4725 = vmatpush1.bf16.msra.mxu0 %v5668_v44 }
0x2099   :  { %4774 = vmatprep.subr.bf16.mxu0 %v5116_v5 }
0x213e   :  { %v2527_v17 = vpop.f32.mrb[34].mxu0 }
0x213f   :  { %v2528_v24 = vadd.f32 %v2527_v17, %v1467_v42  ;;  %v2529_v6 = vpop.f32.mrb[35].mxu0 }
0x2140   :  { %v2530_v38 = vadd.f32 %v2529_v6, %v5679_v49 }
0x2141   :  { %v2538_v11 = vand.u32 2147483647, %v2528_v24  ;;  %v2532_v48 = vmax.f32 %v2528_v24, 0.0  ;;  %vm2534_vm15 = vcmp.ne.f32.partialorder %v2528_v24, %v2528_v24 }
0x2142   :  { %v2539_v57 = vand.u32 2147483647, %v2530_v38  ;;  %v2533_v18 = vmax.f32 %v2530_v38, 0.0  ;;  %vm2535_vm14 = vcmp.ne.f32.partialorder %v2530_v38, %v2530_v38 }
0x2143   :  { %v2540_v28 = vsub.f32 0.0, %v2538_v11 }
0x2144   :  { %v2541_v29 = vsub.f32 0.0, %v2539_v57 }
0x2145   :  { %v2542_v12 = vmul.f32 1.442695, %v2540_v28 }
0x2146   :  { %v2544_v54 = vmul.f32 1.442695, %v2541_v29 }
0x2147   :  { %4997 = vpow2.f32 %v2542_v12 }
0x2148   :  { %4999 = vpow2.f32 %v2544_v54 }
0x2151   :  { %v4998_v32 = vpop.eup %4997 }
0x2152   :  { %v5000_v35 = vpop.eup %4999  ;;  %v2546_v36 = vadd.f32 1.0, %v4998_v32  ;;  %v2549_v1 = vmul.f32 -0.5, %v4998_v32  ;;  %v2552_v45 = vand.u32 2147483647, %v4998_v32 }
0x2153   :  { %v2555_v31 = vadd.f32 1.0, %v5000_v35  ;;  %v2558_v39 = vmul.f32 -0.5, %v5000_v35  ;;  %v2561_v47 = vand.u32 2147483647, %v5000_v35 }
0x2154   :  { %5001 = vlog2.f32 %v2546_v36  ;;  %v2550_v41 = vadd.f32 1.0, %v2549_v1  ;;  %vm2553_vm12 = vcmp.lt.f32.partialorder %v2552_v45, 0.0004427343 }
0x2155   :  { %5003 = vlog2.f32 %v2555_v31  ;;  %v2559_v26 = vadd.f32 1.0, %v2558_v39  ;;  %vm2562_vm13 = vcmp.lt.f32.partialorder %v2561_v47, 0.0004427343 }
0x2156   :  { %v2551_v63 = vmul.f32 %v4998_v32, %v2550_v41 }
0x2157   :  { %v2560_v21 = vmul.f32 %v5000_v35, %v2559_v26  ;;  %v2753_v26 = vpop.permute.xlu1 %2752 }
0x215e   :  { %v5002_v55 = vpop.eup %5001 }
0x215f   :  { %v5004_v61 = vpop.eup %5003  ;;  %v2548_v19 = vmul.f32 0.6931472, %v5002_v55 }
0x2160   :  { %v2557_v9 = vmul.f32 0.6931472, %v5004_v61 }
0x2161   :  { %v2554_v22 = vsel %vm2553_vm12, %v2551_v63, %v2548_v19 }
0x2162   :  { %v2563_v42 = vsel %vm2562_vm13, %v2560_v21, %v2557_v9  ;;  %v2564_v17 = vadd.f32 %v2554_v22, %v2532_v48  ;;  %v5953_v22 = vld [vmem:[%s6301_s14] sm:$0xff] }
0x2163   :  { %v2565_v6 = vadd.f32 %v2563_v42, %v2533_v18 }
0x2164   :  { %v2566_v57 = vsel %vm2534_vm15, %v2528_v24, %v2564_v17 }
0x2165   :  { %v2567_v11 = vsel %vm2535_vm14, %v2530_v38, %v2565_v6 }
0x2166   :  { %4019 = vmatprep.mubr.msk.f32.mxu0 %vm1463_vm5, %v2567_v11 }
0x2167   :  { %2636 = vmatmul.mubr.f32.vlgmr.msra.gmra.mrb[36].mxu0 %v2566_v57 }
0x2168   :  { %4776 = vmatpush3.bf16.msra.mxu0 %v5704_v52  ;;  %4435 = vmatprep.mubr.msk.f32.mxu0 %vm5117_vm2, %v5118_v10 }
0x2169   :  { %4777 = vmatprep.subr.bf16.mxu0 %v5116_v5 }
0x216c   :  { %4779 = vmatpush3.bf16.msra.mxu0 %v5714_v58 }
0x216d   :  { %4780 = vmatprep.subr.bf16.mxu0 %v5116_v5 }
0x2170   :  { %4782 = vmatpush3.bf16.msra.mxu0 %v5741_v4 }
0x2171   :  { %4783 = vmatprep.subr.bf16.mxu0 %v5116_v5 }
0x2174   :  { %4785 = vmatpush3.bf16.msra.mxu0 %v5750_v7 }
0x2175   :  { %4028 = vmatprep.subr.msk.mxu0 %vm116_vm0, %v5507_v43 }
0x223a   :  { %v2637_v24 = vpop.f32.mrb[36].mxu0 }
0x223b   :  { %v2638_v38 = vadd.f32 %v5764_v25, %v2637_v24  ;;  %v2639_v28 = vpop.f32.mrb[37].mxu0 }
0x223c   :  { %v1468_v28 = vsel %vm1463_vm5, %v5548_v62, %v5679_v49 }
0x223d   :  { %v2644_v29 = vand.u32 2147483647, %v2638_v38  ;;  %v4020_v12 = vmul.f32 -1.442695, %v2638_v38  ;;  %v2641_v48 = vmax.f32 %v2638_v38, 0.0  ;;  %vm2642_vm4 = vcmp.ne.f32.partialorder %v2638_v38, %v2638_v38 }
0x223f   :  { %v2645_v54 = vsub.f32 0.0, %v2644_v29  ;;  %5005 = vpow2.f32 %v4020_v12 }
0x2241   :  { %v2646_v32 = vmul.f32 1.442695, %v2645_v54 }
0x2243   :  { %5007 = vpow2.f32 %v2646_v32 }
0x2249   :  { %v5006_v35 = vpop.eup %5005 }
0x224a   :  { %v2662_v36 = vadd.f32 1.0, %v5006_v35 }
0x224c   :  { %5009 = vrcp.f32 %v2662_v36 }
0x224d   :  { %v5008_v31 = vpop.eup %5007 }
0x224e   :  { %v2648_v1 = vadd.f32 1.0, %v5008_v31  ;;  %v2651_v39 = vmul.f32 -0.5, %v5008_v31  ;;  %v2654_v55 = vand.u32 2147483647, %v5008_v31 }
0x2250   :  { %5011 = vlog2.f32 %v2648_v1  ;;  %v2652_v47 = vadd.f32 1.0, %v2651_v39  ;;  %vm2655_vm3 = vcmp.lt.f32.partialorder %v2654_v55, 0.0004427343 }
0x2252   :  { %v2653_v63 = vmul.f32 %v5008_v31, %v2652_v47 }
0x2256   :  { %v5945_v41 = vpop.eup %5009 }
0x2257   :  { %v2755_v45 = vmul.f32 %v5945_v41, %v2753_v26 }
0x2259   :  { %2757 = vrot.lane.b32.xlu0 %v2755_v45, %s5119_s2 }
0x225a   :  { %v5012_v61 = vpop.eup %5011 }
0x225b   :  { %v2650_v19 = vmul.f32 0.6931472, %v5012_v61 }
0x225d   :  { %v2656_v9 = vsel %vm2655_vm3, %v2653_v63, %v2650_v19 }
0x225e   :  { %v2657_v21 = vadd.f32 %v2656_v9, %v2641_v48 }
0x2260   :  { %v2658_v18 = vsel %vm2642_vm4, %v2638_v38, %v2657_v21 }
0x2261   :  { %4417 = vmatmul.mubr.msk.f32.vlgmr.msra.gmra.mrb[26].mxu1 %vm1463_vm5, %v2658_v18 }
0x2262   :  { %4023 = vmatpush1.msk.msra.mxu1 %vm116_vm0, %v5953_v22  ;;  %2834 = vmatprep.mubr.f32.mxu1 %v5118_v10 }
0x2263   :  { %4738 = vmatprep.subr.bf16.mxu1 %v5116_v5 }
0x22cb   :  { %v2758_v24 = vpop.permute.xlu0 %2757 }
0x2334   :  { %v2734_v42 = vpop.f32.mrb[26].mxu1 }
0x2335   :  { %v5960_v17 = vadd.f32 %v5777_v50, %v2734_v42  ;;  %v4418_v6 = vpop.f32.mrb[27].mxu1 }
0x2337   :  { %v2749_v11 = vmul.f32 0.01, %v5960_v17 }
0x2339   :  { %v2750_v57 = vadd.f32 %v2749_v11, %v5900_v15 }
0x233b   :  { %v5964_v38 = vadd.f32 %v2758_v24, %v2750_v57 }
0x233d   :  { %4024 = vmatmul.mubr.msk.f32.vlgmr.msra.gmra.mrb[28].mxu1 %vm91_vm1, %v5964_v38 }
0x233e   :  { %4740 = vmatpush1.bf16.msra.mxu1 %v5542_v60 }
0x233f   :  { %4741 = vmatprep.subr.bf16.mxu1 %v5116_v5 }
0x2342   :  { %4743 = vmatpush1.bf16.msra.mxu1 %v5551_v0 }
0x2343   :  { %4744 = vmatprep.subr.bf16.mxu1 %v5116_v5 }
0x2346   :  { %4746 = vmatpush1.bf16.msra.mxu1 %v5579_v23 }
0x2347   :  { %4747 = vmatprep.subr.bf16.mxu1 %v5116_v5 }
0x234a   :  { %4749 = vmatpush1.bf16.msra.mxu1 %v5589_v20 }
0x234b   :  { %4750 = vmatprep.subr.bf16.mxu1 %v5116_v5 }
0x234e   :  { %4752 = vmatpush1.bf16.msra.mxu1 %v5599_v27 }
0x234f   :  { %4753 = vmatprep.subr.bf16.mxu1 %v5116_v5 }
0x2352   :  { %4755 = vmatpush1.bf16.msra.mxu1 %v5609_v53 }
0x2353   :  { %4756 = vmatprep.subr.bf16.mxu1 %v5116_v5 }
0x2356   :  { %4758 = vmatpush1.bf16.msra.mxu1 %v5618_v16 }
0x2357   :  { %4759 = vmatprep.subr.bf16.mxu1 %v5116_v5 }
0x235a   :  { %4761 = vmatpush1.bf16.msra.mxu1 %v5628_v30 }
0x235b   :  { %4762 = vmatprep.subr.bf16.mxu1 %v5116_v5 }
0x235e   :  { %4764 = vmatpush1.bf16.msra.mxu1 %v5638_v34 }
0x235f   :  { %4765 = vmatprep.subr.bf16.mxu1 %v5116_v5 }
0x2362   :  { %4767 = vmatpush1.bf16.msra.mxu1 %v5648_v37 }
0x2363   :  { %4768 = vmatprep.subr.bf16.mxu1 %v5116_v5 }
0x2366   :  { %4770 = vmatpush1.bf16.msra.mxu1 %v5658_v40 }
0x2367   :  { %4771 = vmatprep.subr.bf16.mxu1 %v5116_v5 }
0x236a   :  { %4773 = vmatpush1.bf16.msra.mxu1 %v5668_v44 }
0x236b   :  { %4822 = vmatprep.subr.bf16.mxu1 %v5116_v5 }
0x2410   :  { %v2836_v29 = vpop.f32.mrb[28].mxu1 }
0x2411   :  { %v2837_v12 = vadd.f32 %v2836_v29, %v1468_v28  ;;  %v2838_v54 = vpop.f32.mrb[29].mxu1 }
0x2412   :  { %v2839_v32 = vadd.f32 %v2838_v54, %v5679_v49 }
0x2413   :  { %v2847_v35 = vand.u32 2147483647, %v2837_v12  ;;  %v2841_v57 = vmax.f32 %v2837_v12, 0.0  ;;  %vm2843_vm9 = vcmp.ne.f32.partialorder %v2837_v12, %v2837_v12 }
0x2414   :  { %v2848_v36 = vand.u32 2147483647, %v2839_v32  ;;  %v2842_v29 = vmax.f32 %v2839_v32, 0.0  ;;  %vm2844_vm8 = vcmp.ne.f32.partialorder %v2839_v32, %v2839_v32 }
0x2415   :  { %v2849_v31 = vsub.f32 0.0, %v2847_v35 }
0x2416   :  { %v2850_v1 = vsub.f32 0.0, %v2848_v36 }
0x2417   :  { %v2851_v39 = vmul.f32 1.442695, %v2849_v31 }
0x2418   :  { %v2853_v26 = vmul.f32 1.442695, %v2850_v1 }
0x2419   :  { %5013 = vpow2.f32 %v2851_v39 }
0x241a   :  { %5015 = vpow2.f32 %v2853_v26 }
0x2423   :  { %v5014_v45 = vpop.eup %5013 }
0x2424   :  { %v5016_v47 = vpop.eup %5015  ;;  %v2855_v55 = vadd.f32 1.0, %v5014_v45  ;;  %v2858_v62 = vmul.f32 -0.5, %v5014_v45  ;;  %v2861_v9 = vand.u32 2147483647, %v5014_v45 }
0x2425   :  { %v2864_v61 = vadd.f32 1.0, %v5016_v47  ;;  %v2867_v19 = vmul.f32 -0.5, %v5016_v47  ;;  %v2870_v21 = vand.u32 2147483647, %v5016_v47 }
0x2426   :  { %5017 = vlog2.f32 %v2855_v55  ;;  %v2859_v63 = vadd.f32 1.0, %v2858_v62  ;;  %vm2862_vm6 = vcmp.lt.f32.partialorder %v2861_v9, 0.0004427343 }
0x2427   :  { %5019 = vlog2.f32 %v2864_v61  ;;  %v2868_v48 = vadd.f32 1.0, %v2867_v19  ;;  %vm2871_vm7 = vcmp.lt.f32.partialorder %v2870_v21, 0.0004427343 }
0x2428   :  { %v2860_v11 = vmul.f32 %v5014_v45, %v2859_v63 }
0x2429   :  { %v2869_v28 = vmul.f32 %v5016_v47, %v2868_v48 }
0x2430   :  { %v5018_v18 = vpop.eup %5017 }
0x2431   :  { %v5020_v42 = vpop.eup %5019  ;;  %v2857_v6 = vmul.f32 0.6931472, %v5018_v18  ;;  %v3062_v18 = vpop.permute.xlu1 %3061 }
0x2432   :  { %v2866_v24 = vmul.f32 0.6931472, %v5020_v42 }
0x2433   :  { %v2863_v54 = vsel %vm2862_vm6, %v2860_v11, %v2857_v6 }
0x2434   :  { %v2872_v35 = vsel %vm2871_vm7, %v2869_v28, %v2866_v24  ;;  %v2873_v36 = vadd.f32 %v2863_v54, %v2841_v57 }
0x2435   :  { %v2874_v31 = vadd.f32 %v2872_v35, %v2842_v29 }
0x2436   :  { %v2875_v39 = vsel %vm2843_vm9, %v2837_v12, %v2873_v36 }
0x2437   :  { %v2876_v1 = vsel %vm2844_vm8, %v2839_v32, %v2874_v31 }
0x2438   :  { %4025 = vmatprep.mubr.msk.f32.mxu1 %vm1463_vm5, %v2876_v1 }
0x2439   :  { %2945 = vmatmul.mubr.f32.vlgmr.msra.gmra.mrb[30].mxu1 %v2875_v39 }
0x243a   :  { %4824 = vmatpush3.bf16.msra.mxu1 %v5704_v52  ;;  %4454 = vmatprep.mubr.msk.f32.mxu1 %vm5117_vm2, %v5118_v10 }
0x243b   :  { %4825 = vmatprep.subr.bf16.mxu1 %v5116_v5 }
0x243e   :  { %4827 = vmatpush3.bf16.msra.mxu1 %v5714_v58 }
0x243f   :  { %4828 = vmatprep.subr.bf16.mxu1 %v5116_v5 }
0x2442   :  { %4830 = vmatpush3.bf16.msra.mxu1 %v5741_v4 }
0x2443   :  { %4831 = vmatprep.subr.bf16.mxu1 %v5116_v5 }
0x2446   :  { %4833 = vmatpush3.bf16.msra.mxu1 %v5750_v7 }
0x2447   :  { %4034 = vmatprep.subr.msk.mxu1 %vm116_vm0, %v5507_v43 }
0x250c   :  { %v2946_v12 = vpop.f32.mrb[30].mxu1 }
0x250d   :  { %v2947_v32 = vadd.f32 %v5764_v25, %v2946_v12  ;;  %v2948_v26 = vpop.f32.mrb[31].mxu1 }
0x250f   :  { %v2953_v45 = vand.u32 2147483647, %v2947_v32  ;;  %v4026_v47 = vmul.f32 -1.442695, %v2947_v32  ;;  %v2950_v24 = vmax.f32 %v2947_v32, 0.0  ;;  %vm2951_vm11 = vcmp.ne.f32.partialorder %v2947_v32, %v2947_v32 }
0x2511   :  { %v2954_v55 = vsub.f32 0.0, %v2953_v45  ;;  %5021 = vpow2.f32 %v4026_v47 }
0x2513   :  { %v2955_v61 = vmul.f32 1.442695, %v2954_v55 }
0x2515   :  { %5023 = vpow2.f32 %v2955_v61 }
0x251b   :  { %v5022_v62 = vpop.eup %5021 }
0x251c   :  { %v2971_v19 = vadd.f32 1.0, %v5022_v62 }
0x251e   :  { %5025 = vrcp.f32 %v2971_v19 }
0x251f   :  { %v5024_v63 = vpop.eup %5023 }
0x2520   :  { %v2957_v48 = vadd.f32 1.0, %v5024_v63  ;;  %v2960_v9 = vmul.f32 -0.5, %v5024_v63  ;;  %v2963_v42 = vand.u32 2147483647, %v5024_v63 }
0x2522   :  { %5027 = vlog2.f32 %v2957_v48  ;;  %v2961_v25 = vadd.f32 1.0, %v2960_v9  ;;  %vm2964_vm10 = vcmp.lt.f32.partialorder %v2963_v42, 0.0004427343 }
0x2524   :  { %v2962_v57 = vmul.f32 %v5024_v63, %v2961_v25 }
0x2528   :  { %v5026_v21 = vpop.eup %5025 }
0x2529   :  { %3053 = vrot.lane.b32.xlu1 %v5026_v21, %s5119_s2  ;;  %v3064_v43 = vmul.f32 %v5026_v21, %v3062_v18 }
0x252b   :  { %3066 = vrot.lane.b32.xlu0 %v3064_v43, %s5119_s2 }
0x252c   :  { %v5028_v6 = vpop.eup %5027 }
0x252d   :  { %1812 = vrot.lane.b32.xlu1 %v5780_v33, %s5122_s29  ;;  %v2959_v11 = vmul.f32 0.6931472, %v5028_v6 }
0x252f   :  { %v2965_v28 = vsel %vm2964_vm10, %v2962_v57, %v2959_v11 }
0x2530   :  { %v2966_v29 = vadd.f32 %v2965_v28, %v2950_v24 }
0x2532   :  { %v2967_v54 = vsel %vm2951_vm11, %v2947_v32, %v2966_v29 }
0x2533   :  { %4436 = vmatmul.mubr.msk.f32.vlgmr.msra.gmra.mrb[38].mxu0 %vm1463_vm5, %v2967_v54 }
0x2534   :  { %4029 = vmatpush1.msk.msra.mxu0 %vm116_vm0, %v5953_v22  ;;  %3143 = vmatprep.mubr.f32.mxu0 %v5118_v10 }
0x2535   :  { %4786 = vmatprep.subr.bf16.mxu0 %v5116_v5 }
0x259d   :  { %v3067_v12 = vpop.permute.xlu0 %3066 }
0x2606   :  { %v3043_v35 = vpop.f32.mrb[38].mxu0 }
0x2607   :  { %v6019_v36 = vadd.f32 %v5777_v50, %v3043_v35  ;;  %v4437_v31 = vpop.f32.mrb[39].mxu0  ;;  %v1469_v50 = vsel %vm1463_vm5, %v5562_v8, %v5679_v49 }
0x2609   :  { %v3058_v1 = vmul.f32 0.01, %v6019_v36 }
0x260b   :  { %v3059_v39 = vadd.f32 %v3058_v1, %v5964_v38 }
0x260d   :  { %v6023_v32 = vadd.f32 %v3067_v12, %v3059_v39 }
0x260f   :  { %4030 = vmatmul.mubr.msk.f32.vlgmr.msra.gmra.mrb[40].mxu0 %vm91_vm1, %v6023_v32 }
0x2610   :  { %4788 = vmatpush1.bf16.msra.mxu0 %v5542_v60 }
0x2611   :  { %4789 = vmatprep.subr.bf16.mxu0 %v5116_v5 }
0x2614   :  { %4791 = vmatpush1.bf16.msra.mxu0 %v5551_v0 }
0x2615   :  { %4792 = vmatprep.subr.bf16.mxu0 %v5116_v5 }
0x2618   :  { %4794 = vmatpush1.bf16.msra.mxu0 %v5579_v23 }
0x2619   :  { %4795 = vmatprep.subr.bf16.mxu0 %v5116_v5 }
0x261c   :  { %4797 = vmatpush1.bf16.msra.mxu0 %v5589_v20 }
0x261d   :  { %4798 = vmatprep.subr.bf16.mxu0 %v5116_v5 }
0x2620   :  { %4800 = vmatpush1.bf16.msra.mxu0 %v5599_v27 }
0x2621   :  { %4801 = vmatprep.subr.bf16.mxu0 %v5116_v5 }
0x2624   :  { %4803 = vmatpush1.bf16.msra.mxu0 %v5609_v53 }
0x2625   :  { %4804 = vmatprep.subr.bf16.mxu0 %v5116_v5 }
0x2628   :  { %4806 = vmatpush1.bf16.msra.mxu0 %v5618_v16 }
0x2629   :  { %4807 = vmatprep.subr.bf16.mxu0 %v5116_v5 }
0x262c   :  { %4809 = vmatpush1.bf16.msra.mxu0 %v5628_v30 }
0x262d   :  { %4810 = vmatprep.subr.bf16.mxu0 %v5116_v5 }
0x2630   :  { %4812 = vmatpush1.bf16.msra.mxu0 %v5638_v34 }
0x2631   :  { %4813 = vmatprep.subr.bf16.mxu0 %v5116_v5 }
0x2634   :  { %4815 = vmatpush1.bf16.msra.mxu0 %v5648_v37 }
0x2635   :  { %4816 = vmatprep.subr.bf16.mxu0 %v5116_v5 }
0x2638   :  { %4818 = vmatpush1.bf16.msra.mxu0 %v5658_v40 }
0x2639   :  { %4819 = vmatprep.subr.bf16.mxu0 %v5116_v5 }
0x263c   :  { %4821 = vmatpush1.bf16.msra.mxu0 %v5668_v44 }
0x263d   :  { %4870 = vmatprep.subr.bf16.mxu0 %v5116_v5 }
0x26e2   :  { %v3145_v26 = vpop.f32.mrb[40].mxu0 }
0x26e3   :  { %v3146_v45 = vadd.f32 %v3145_v26, %v1469_v50  ;;  %v3147_v47 = vpop.f32.mrb[41].mxu0 }
0x26e4   :  { %v3148_v55 = vadd.f32 %v3147_v47, %v5679_v49 }
0x26e5   :  { %v3156_v61 = vand.u32 2147483647, %v3146_v45  ;;  %v3150_v31 = vmax.f32 %v3146_v45, 0.0  ;;  %vm3152_vm15 = vcmp.ne.f32.partialorder %v3146_v45, %v3146_v45 }
0x26e6   :  { %v3157_v62 = vand.u32 2147483647, %v3148_v55  ;;  %v3151_v12 = vmax.f32 %v3148_v55, 0.0  ;;  %vm3153_vm14 = vcmp.ne.f32.partialorder %v3148_v55, %v3148_v55 }
0x26e7   :  { %v3158_v19 = vsub.f32 0.0, %v3156_v61 }
0x26e8   :  { %v3159_v63 = vsub.f32 0.0, %v3157_v62 }
0x26e9   :  { %v3160_v48 = vmul.f32 1.442695, %v3158_v19 }
0x26ea   :  { %v3162_v9 = vmul.f32 1.442695, %v3159_v63 }
0x26eb   :  { %5029 = vpow2.f32 %v3160_v48 }
0x26ec   :  { %5031 = vpow2.f32 %v3162_v9 }
0x26f5   :  { %v5030_v21 = vpop.eup %5029 }
0x26f6   :  { %v5032_v18 = vpop.eup %5031  ;;  %v3164_v43 = vadd.f32 1.0, %v5030_v21  ;;  %v3167_v8 = vmul.f32 -0.5, %v5030_v21  ;;  %v3170_v57 = vand.u32 2147483647, %v5030_v21 }
0x26f7   :  { %v3173_v25 = vadd.f32 1.0, %v5032_v18  ;;  %v3176_v42 = vmul.f32 -0.5, %v5032_v18  ;;  %v3179_v24 = vand.u32 2147483647, %v5032_v18 }
0x26f8   :  { %5033 = vlog2.f32 %v3164_v43  ;;  %v3168_v6 = vadd.f32 1.0, %v3167_v8  ;;  %vm3171_vm12 = vcmp.lt.f32.partialorder %v3170_v57, 0.0004427343 }
0x26f9   :  { %5035 = vlog2.f32 %v3173_v25  ;;  %v3177_v11 = vadd.f32 1.0, %v3176_v42  ;;  %vm3180_vm13 = vcmp.lt.f32.partialorder %v3179_v24, 0.0004427343  ;;  %v3371_v42 = vpop.permute.xlu1 %3370 }
0x26fa   :  { %v3169_v35 = vmul.f32 %v5030_v21, %v3168_v6 }
0x26fb   :  { %v3178_v39 = vmul.f32 %v5032_v18, %v3177_v11 }
0x2702   :  { %v5034_v28 = vpop.eup %5033 }
0x2703   :  { %v5036_v29 = vpop.eup %5035  ;;  %v3166_v54 = vmul.f32 0.6931472, %v5034_v28 }
0x2704   :  { %v3175_v1 = vmul.f32 0.6931472, %v5036_v29 }
0x2705   :  { %v3172_v50 = vsel %vm3171_vm12, %v3169_v35, %v3166_v54 }
0x2706   :  { %v3181_v26 = vsel %vm3180_vm13, %v3178_v39, %v3175_v1  ;;  %v3182_v47 = vadd.f32 %v3172_v50, %v3150_v31 }
0x2707   :  { %v3183_v61 = vadd.f32 %v3181_v26, %v3151_v12  ;;  %v6083_v12 = vld [vmem:[%s6305_s18] ss:$0 sm:$0xff] }
0x2708   :  { %v3184_v19 = vsel %vm3152_vm15, %v3146_v45, %v3182_v47 }
0x2709   :  { %v3185_v62 = vsel %vm3153_vm14, %v3148_v55, %v3183_v61 }
0x270a   :  { %4031 = vmatprep.mubr.msk.f32.mxu0 %vm1463_vm5, %v3185_v62 }
0x270b   :  { %3254 = vmatmul.mubr.f32.vlgmr.msra.gmra.mrb[42].mxu0 %v3184_v19 }
0x270c   :  { %4872 = vmatpush3.bf16.msra.mxu0 %v5704_v52  ;;  %4473 = vmatprep.mubr.msk.f32.mxu0 %vm5117_vm2, %v5118_v10  ;;  %v6068_v52 = vld [vmem:[%s6303_s16] ss:$0 sm:$0xff]  ;;  %s5123_s16 = smov [#allocation2]  }
0x270d   :  { %4873 = vmatprep.subr.bf16.mxu0 %v5116_v5  ;;  %s3939_s24 = sshll.u32 %s5123_s16, 4  ;;  %s3940_s24 = int_to_ptr.vmem [resolvable:$true] %s3939_s24 }
0x270e   :  { %s5092_s18 = scalar_lea.vmem %s3940_s24, 16  ;;  %s5096_s15 = scalar_lea.vmem %s3940_s24, 32 }
0x270f   :  { %p5093_p0 = scmp.ne.s32.totalorder %s3940_s24, %s5092_s18  ;;  %p5097_p1 = scmp.lt.s32.totalorder %s3940_s24, %s3940_s24 }
0x2710   :  { %4875 = vmatpush3.bf16.msra.mxu0 %v5714_v58  ;;  %p5098_p2 = scmp.lt.s32.totalorder %s5096_s15, %s5092_s18 }
0x2711   :  { %4876 = vmatprep.subr.bf16.mxu0 %v5116_v5 }
0x2712   :  { %p5099_p3 = por %p5098_p2, %p5097_p1 }
0x2714   :  { %4878 = vmatpush3.bf16.msra.mxu0 %v5741_v4  ;;  %p5100_p4 = pnand %p5099_p3, %p5093_p0 }
0x2715   :  { %4879 = vmatprep.subr.bf16.mxu0 %v5116_v5 }
0x2718   :  { %4881 = vmatpush3.bf16.msra.mxu0 %v5750_v7 }
0x27de   :  { %v3255_v55 = vpop.f32.mrb[42].mxu0 }
0x27df   :  { %v3256_v45 = vadd.f32 %v6068_v52, %v3255_v55  ;;  %v3257_v63 = vpop.f32.mrb[43].mxu0 }
0x27e1   :  { %v3262_v48 = vand.u32 2147483647, %v3256_v45  ;;  %v4032_v9 = vmul.f32 -1.442695, %v3256_v45  ;;  %v3259_v54 = vmax.f32 %v3256_v45, 0.0  ;;  %vm3260_vm3 = vcmp.ne.f32.partialorder %v3256_v45, %v3256_v45 }
0x27e3   :  { %v3263_v58 = vsub.f32 0.0, %v3262_v48  ;;  %5037 = vpow2.f32 %v4032_v9 }
0x27e5   :  { %v3264_v21 = vmul.f32 1.442695, %v3263_v58 }
0x27e7   :  { %5039 = vpow2.f32 %v3264_v21 }
0x27ed   :  { %v5038_v4 = vpop.eup %5037 }
0x27ee   :  { %v3280_v18 = vadd.f32 1.0, %v5038_v4 }
0x27f0   :  { %5041 = vrcp.f32 %v3280_v18 }
0x27f1   :  { %v5040_v43 = vpop.eup %5039 }
0x27f2   :  { %v3266_v7 = vadd.f32 1.0, %v5040_v43  ;;  %v3269_v25 = vmul.f32 -0.5, %v5040_v43  ;;  %v3272_v57 = vand.u32 2147483647, %v5040_v43 }
0x27f4   :  { %5043 = vlog2.f32 %v3266_v7  ;;  %v3270_v11 = vadd.f32 1.0, %v3269_v25  ;;  %vm3273_vm2 = vcmp.lt.f32.partialorder %v3272_v57, 0.0004427343 }
0x27f6   :  { %v3271_v29 = vmul.f32 %v5040_v43, %v3270_v11 }
0x27fa   :  { %v6071_v8 = vpop.eup %5041 }
0x27fb   :  { %v3373_v6 = vmul.f32 %v6071_v8, %v3371_v42 }
0x27fd   :  { %3375 = vrot.lane.b32.xlu0 %v3373_v6, %s5119_s2 }
0x27fe   :  { %v5044_v24 = vpop.eup %5043 }
0x27ff   :  { %v3268_v28 = vmul.f32 0.6931472, %v5044_v24 }
0x2801   :  { %v3274_v35 = vsel %vm3273_vm2, %v3271_v29, %v3268_v28  ;;  %v3707_v29 = vld [vmem:[%s6306_s19] sm:$0xf] }
0x2802   :  { %v3275_v31 = vadd.f32 %v3274_v35, %v3259_v54  ;;  %4476 = vmatprep.subr.msk.mxu0 %vm116_vm0, %v3707_v29 }
0x2804   :  { %v3276_v1 = vsel %vm3260_vm3, %v3256_v45, %v3275_v31 }
0x2805   :  { %4455 = vmatmul.mubr.msk.f32.vlgmr.msra.gmra.mrb[32].mxu1 %vm1463_vm5, %v3276_v1 }
0x2806   :  { %4035 = vmatpush1.msk.msra.mxu1 %vm116_vm0, %v5953_v22  ;;  %3452 = vmatprep.mubr.f32.mxu1 %v5118_v10  ;;  %v1470_v10 = vsel %vm1463_vm5, %v5558_v3, %v5679_v49 }
0x2807   :  { %4834 = vmatprep.subr.bf16.mxu1 %v5116_v5 }
0x286f   :  { %v3376_v62 = vpop.permute.xlu0 %3375 }
0x28d8   :  { %v3352_v39 = vpop.f32.mrb[32].mxu1 }
0x28d9   :  { %v6086_v50 = vadd.f32 %v6083_v12, %v3352_v39  ;;  %v4456_v26 = vpop.f32.mrb[33].mxu1 }
0x28db   :  { %v3367_v47 = vmul.f32 0.01, %v6086_v50 }
0x28dd   :  { %v3368_v61 = vadd.f32 %v3367_v47, %v6023_v32 }
0x28df   :  { %v6090_v22 = vadd.f32 %v3376_v62, %v3368_v61  ;;  %v6130_v61 = vld [vmem:[%s6309_s22] sm:$0x1] }
0x28e0   :  { %v1288_v62 = vmul.f32 2.0, %v6130_v61 }
0x28e1   :  { %4036 = vmatmul.mubr.msk.f32.vlgmr.msra.gmra.mrb[34].mxu1 %vm91_vm1, %v6090_v22 }
0x28e2   :  { %4836 = vmatpush1.bf16.msra.mxu1 %v5542_v60 }
0x28e3   :  { %4837 = vmatprep.subr.bf16.mxu1 %v5116_v5 }
0x28e6   :  { %4839 = vmatpush1.bf16.msra.mxu1 %v5551_v0 }
0x28e7   :  { %4840 = vmatprep.subr.bf16.mxu1 %v5116_v5 }
0x28ea   :  { %4842 = vmatpush1.bf16.msra.mxu1 %v5579_v23 }
0x28eb   :  { %4843 = vmatprep.subr.bf16.mxu1 %v5116_v5 }
0x28ee   :  { %4845 = vmatpush1.bf16.msra.mxu1 %v5589_v20 }
0x28ef   :  { %4846 = vmatprep.subr.bf16.mxu1 %v5116_v5 }
0x28f2   :  { %4848 = vmatpush1.bf16.msra.mxu1 %v5599_v27 }
0x28f3   :  { %4849 = vmatprep.subr.bf16.mxu1 %v5116_v5 }
0x28f6   :  { %4851 = vmatpush1.bf16.msra.mxu1 %v5609_v53 }
0x28f7   :  { %4852 = vmatprep.subr.bf16.mxu1 %v5116_v5 }
0x28fa   :  { %4854 = vmatpush1.bf16.msra.mxu1 %v5618_v16 }
0x28fb   :  { %4855 = vmatprep.subr.bf16.mxu1 %v5116_v5 }
0x28fe   :  { %4857 = vmatpush1.bf16.msra.mxu1 %v5628_v30 }
0x28ff   :  { %4858 = vmatprep.subr.bf16.mxu1 %v5116_v5 }
0x2902   :  { %4860 = vmatpush1.bf16.msra.mxu1 %v5638_v34 }
0x2903   :  { %4861 = vmatprep.subr.bf16.mxu1 %v5116_v5 }
0x2906   :  { %4863 = vmatpush1.bf16.msra.mxu1 %v5648_v37 }
0x2907   :  { %4864 = vmatprep.subr.bf16.mxu1 %v5116_v5 }
0x290a   :  { %4866 = vmatpush1.bf16.msra.mxu1 %v5658_v40 }
0x290b   :  { %4867 = vmatprep.subr.bf16.mxu1 %v5116_v5 }
0x290e   :  { %4869 = vmatpush1.bf16.msra.mxu1 %v5668_v44 }
0x29b4   :  { %v3454_v60 = vpop.f32.mrb[34].mxu1 }
0x29b5   :  { %v3455_v0 = vadd.f32 %v3454_v60, %v1470_v10  ;;  %v3456_v23 = vpop.f32.mrb[35].mxu1 }
0x29b6   :  { %v3457_v20 = vadd.f32 %v3456_v23, %v5679_v49 }
0x29b7   :  { %v3465_v27 = vand.u32 2147483647, %v3455_v0  ;;  %v3459_v18 = vmax.f32 %v3455_v0, 0.0  ;;  %vm3461_vm8 = vcmp.ne.f32.partialorder %v3455_v0, %v3455_v0 }
0x29b8   :  { %v3466_v53 = vand.u32 2147483647, %v3457_v20  ;;  %v3460_v25 = vmax.f32 %v3457_v20, 0.0  ;;  %vm3462_vm7 = vcmp.ne.f32.partialorder %v3457_v20, %v3457_v20 }
0x29b9   :  { %v3467_v16 = vsub.f32 0.0, %v3465_v27  ;;  %v1262_v27 = vlaneseq }
0x29ba   :  { %v3468_v30 = vsub.f32 0.0, %v3466_v53 }
0x29bb   :  { %v3469_v34 = vmul.f32 1.442695, %v3467_v16  ;;  %v3680_v16 = vpop.permute.xlu1 %3679 }
0x29bc   :  { %v3471_v37 = vmul.f32 1.442695, %v3468_v30 }
0x29bd   :  { %5045 = vpow2.f32 %v3469_v34 }
0x29be   :  { %5047 = vpow2.f32 %v3471_v37  ;;  %v6134_v37 = vshrl.u32 %v1262_v27, 7 }
0x29c7   :  { %v5046_v5 = vpop.eup %5045 }
0x29c8   :  { %v5048_v40 = vpop.eup %5047  ;;  %v3473_v44 = vadd.f32 1.0, %v5046_v5  ;;  %v3476_v3 = vmul.f32 -0.5, %v5046_v5  ;;  %v3479_v48 = vand.u32 2147483647, %v5046_v5 }
0x29c9   :  { %v3482_v19 = vadd.f32 1.0, %v5048_v40  ;;  %v3485_v55 = vmul.f32 -0.5, %v5048_v40  ;;  %v3488_v49 = vand.u32 2147483647, %v5048_v40 }
0x29ca   :  { %5049 = vlog2.f32 %v3473_v44  ;;  %v3477_v45 = vadd.f32 1.0, %v3476_v3  ;;  %vm3480_vm4 = vcmp.lt.f32.partialorder %v3479_v48, 0.0004427343 }
0x29cb   :  { %5051 = vlog2.f32 %v3482_v19  ;;  %v3486_v63 = vadd.f32 1.0, %v3485_v55  ;;  %vm3489_vm6 = vcmp.lt.f32.partialorder %v3488_v49, 0.0004427343  ;;  %v1264_v55 = vsub.s32 0, %v6134_v37 }
0x29cc   :  { %v3478_v4 = vmul.f32 %v5046_v5, %v3477_v45 }
0x29cd   :  { %v3487_v7 = vmul.f32 %v5048_v40, %v3486_v63 }
0x29d4   :  { %v5050_v9 = vpop.eup %5049 }
0x29d5   :  { %v5052_v58 = vpop.eup %5051  ;;  %v3475_v21 = vmul.f32 0.6931472, %v5050_v9 }
0x29d6   :  { %v3484_v43 = vmul.f32 0.6931472, %v5052_v58 }
0x29d7   :  { %v3481_v42 = vsel %vm3480_vm4, %v3478_v4, %v3475_v21 }
0x29d8   :  { %v3490_v6 = vsel %vm3489_vm6, %v3487_v7, %v3484_v43  ;;  %v3491_v11 = vadd.f32 %v3481_v42, %v3459_v18 }
0x29d9   :  { %v3492_v57 = vadd.f32 %v3490_v6, %v3460_v25 }
0x29da   :  { %v3493_v28 = vsel %vm3461_vm8, %v3455_v0, %v3491_v11  ;;  %v1289_v0 = vmul.f32 1.442695, %v1288_v62 }
0x29db   :  { %v3494_v24 = vsel %vm3462_vm7, %v3457_v20, %v3492_v57 }
0x29dc   :  { %4037 = vmatprep.mubr.msk.f32.mxu1 %vm1463_vm5, %v3494_v24 }
0x29dd   :  { %3563 = vmatmul.mubr.f32.vlgmr.msra.gmra.mrb[36].mxu1 %v3493_v28 }
0x2ab0   :  { %v3564_v54 = vpop.f32.mrb[36].mxu1 }
0x2ab1   :  { %v3565_v35 = vadd.f32 %v6068_v52, %v3564_v54  ;;  %v3566_v31 = vpop.f32.mrb[37].mxu1 }
0x2ab3   :  { %v3571_v1 = vand.u32 2147483647, %v3565_v35  ;;  %v4038_v39 = vmul.f32 -1.442695, %v3565_v35  ;;  %v3568_v63 = vmax.f32 %v3565_v35, 0.0  ;;  %vm3569_vm10 = vcmp.ne.f32.partialorder %v3565_v35, %v3565_v35 }
0x2ab5   :  { %v3572_v26 = vsub.f32 0.0, %v3571_v1  ;;  %5053 = vpow2.f32 %v4038_v39 }
0x2ab7   :  { %v3573_v47 = vmul.f32 1.442695, %v3572_v26 }
0x2ab9   :  { %5055 = vpow2.f32 %v3573_v47  ;;  %v6199_v47 = vld [vmem:[%s6307_s20] ss:$0 sm:$0xff] }
0x2abf   :  { %v5054_v10 = vpop.eup %5053 }
0x2ac0   :  { %v3589_v60 = vadd.f32 1.0, %v5054_v10 }
0x2ac2   :  { %5057 = vrcp.f32 %v3589_v60 }
0x2ac3   :  { %v5056_v23 = vpop.eup %5055  ;;  %5059 = vpow2.f32 %v1289_v0 }
0x2ac4   :  { %v3575_v52 = vadd.f32 1.0, %v5056_v23  ;;  %v3578_v20 = vmul.f32 -0.5, %v5056_v23  ;;  %v3581_v40 = vand.u32 2147483647, %v5056_v23 }
0x2ac6   :  { %5061 = vlog2.f32 %v3575_v52  ;;  %v3579_v34 = vadd.f32 1.0, %v3578_v20  ;;  %vm3582_vm9 = vcmp.lt.f32.partialorder %v3581_v40, 0.0004427343  ;;  %v5084_v20 = vld [vmem:[%s6324_s1 + $0x8] sm:$0xff] }
0x2ac8   :  { %v3580_v3 = vmul.f32 %v5056_v23, %v3579_v34 }
0x2acc   :  { %v5058_v53 = vpop.eup %5057 }
0x2acd   :  { %3671 = vrot.lane.b32.xlu1 %v5058_v53, %s5119_s2  ;;  %v3682_v30 = vmul.f32 %v5058_v53, %v3680_v16  ;;  %v5060_v5 = vpop.eup %5059  ;;  %v5085_v16 = vld [vmem:[%s6324_s1] sm:$0xff] }
0x2ace   :  { %v1291_v45 = vmul.f32 2.0, %v5060_v5 }
0x2acf   :  { %3684 = vrot.lane.b32.xlu0 %v3682_v30, %s5119_s2 }
0x2ad0   :  { %v5062_v44 = vpop.eup %5061  ;;  %v1296_v9 = vrot.slane %v1291_v45, %v1264_v55 }
0x2ad1   :  { %2739 = vrot.lane.b32.xlu1 %v5960_v17, %s5122_s29  ;;  %v3577_v19 = vmul.f32 0.6931472, %v5062_v44 }
0x2ad3   :  { %2126 = vrot.lane.b32.xlu0 %v5829_v56, %s5119_s2  ;;  %v3583_v48 = vsel %vm3582_vm9, %v3580_v3, %v3577_v19  ;;  %v1818_v56 = vpop.permute.xlu1 %1817 }
0x2ad4   :  { %v3584_v49 = vadd.f32 %v3583_v48, %v3568_v63  ;;  %5063 = vrcp.f32 %v1818_v56 }
0x2ad5   :  { %3357 = vrot.lane.b32.xlu1 %v6086_v50, %s5122_s29 }
0x2ad6   :  { %v3585_v58 = vsel %vm3569_vm10, %v3565_v35, %v3584_v49  ;;  %v5086_v49 = vld [vmem:[%s6324_s1 + $0x18] sm:$0xff] }
0x2ad7   :  { %2744 = vrot.lane.b32.xlu0 %v5945_v41, %s5119_s2  ;;  %4474 = vmatmul.mubr.msk.f32.vlgmr.msra.gmra.mrb[44].mxu0 %vm1463_vm5, %v3585_v58  ;;  %vm3931_vm5 = vcmask 16384  }
0x2ad8   :  { %4478 = vmatprep.mubr.msk.f32.mxu0 %vm91_vm1, %v5567_v14  ;;  %4477 = vmatpush3.msk.msra.mxu0 %vm116_vm0, %v3707_v29  ;;  %v6165_v14 = vpop.permute.xlu1 %2435  ;;  %vm3694_vm0 = vcmask 7168  }
0x2ad9   :  { %1297 = vrot.lane.b32.xlu1 %v1296_v9, %s5121_s28 }
0x2adb   :  { %3362 = vrot.lane.b32.xlu0 %v6071_v8, %s5119_s2  ;;  %4479 = vmatmul.mubr.msk.f32.vlgmr.msra.gmra.mrb[46].mxu0 %vm91_vm1, %v5784_v2 }
0x2adc   :  { %4481 = vmatprep.mubr.msk.f32.mxu0 %vm91_vm1, %v5843_v51  ;;  %v6173_v2 = vpop.permute.xlu1 %3053 }
0x2ade   :  { %v5064_v41 = vpop.eup %5063 }
0x2adf   :  { %2121 = vrot.lane.b32.xlu0 %v5839_v59, %s5122_s29  ;;  %4482 = vmatmul.mubr.msk.f32.gmra.mrb[48].mxu0 %vm91_vm1, %v5900_v15 }
0x2ae0   :  { %4484 = vmatprep.mubr.msk.f32.mxu0 %vm91_vm1, %v5964_v38  ;;  %v1813_v51 = vpop.permute.xlu1 %1812 }
0x2ae1   :  { %v1815_v15 = vsub.f32 %v5780_v33, %v1813_v51  ;;  %v5087_v51 = vld [vmem:[%s6324_s1 + $0x10] sm:$0xff] }
0x2ae3   :  { %2430 = vrot.lane.b32.xlu0 %v5896_v13, %s5122_s29  ;;  %4485 = vmatmul.mubr.msk.f32.gmra.mrb[50].mxu0 %vm91_vm1, %v6023_v32  ;;  %v1821_v38 = vmul.f32 %v5064_v41, %v1815_v15 }
0x2ae4   :  { %4487 = vmatprep.mubr.msk.f32.mxu0 %vm91_vm1, %v6090_v22 }
0x2ae5   :  { %v1834_v8 = vmul.f32 %v1821_v38, %v1821_v38 }
0x2ae7   :  { %3048 = vrot.lane.b32.xlu0 %v6019_v36, %s5122_s29  ;;  %v1835_v21 = vsel %vm91_vm1, %v1834_v8, 0.0 }
0x2afd   :  { %1836 = vadd.xlane.f32.xlu1 %v1835_v21 }
0x2b3f   :  { %v6181_v18 = vpop.permute.xlu1 %3671 }
0x2b41   :  { %v3685_v4 = vpop.permute.xlu0 %3684 }
0x2b43   :  { %v2740_v25 = vpop.permute.xlu1 %2739 }
0x2b44   :  { %v2742_v42 = vsub.f32 %v5960_v17, %v2740_v25  ;;  %v3984_v17 = vld [vmem:[%s6308_s21] ss:$0 sm:$0xff] }
0x2b45   :  { %v6179_v32 = vpop.permute.xlu0 %2126  ;;  %v1281_v26 = vsub.f32 %v5517_v46, %v3984_v17 }
0x2b47   :  { %v3358_v33 = vpop.permute.xlu1 %3357  ;;  %v1282_v23 = vmul.f32 %v1281_v26, %v1281_v26 }
0x2b48   :  { %v3360_v57 = vsub.f32 %v6086_v50, %v3358_v33 }
0x2b49   :  { %v2745_v43 = vpop.permute.xlu0 %2744 }
0x2b4a   :  { %5065 = vrcp.f32 %v2745_v43 }
0x2b4d   :  { %v3363_v7 = vpop.permute.xlu0 %3362 }
0x2b4e   :  { %5067 = vrcp.f32 %v3363_v7 }
0x2b4f   :  { %5069 = vrcp.f32 %v6179_v32  ;;  %v5089_v32 = vld [vmem:[%s6324_s1 + $0x20] sm:$0xff] }
0x2b50   :  { %5071 = vrcp.f32 %v6165_v14 }
0x2b51   :  { %v2122_v26 = vpop.permute.xlu0 %2121  ;;  %5073 = vrcp.f32 %v6173_v2 }
0x2b52   :  { %5075 = vrcp.f32 %v6181_v18 }
0x2b54   :  { %v5066_v6 = vpop.eup %5065 }
0x2b55   :  { %v2748_v11 = vmul.f32 %v5066_v6, %v2742_v42 }
0x2b57   :  { %v2761_v24 = vmul.f32 %v2748_v11, %v2748_v11 }
0x2b58   :  { %v5068_v28 = vpop.eup %5067 }
0x2b59   :  { %v2762_v29 = vsel %vm91_vm1, %v2761_v24, 0.0  ;;  %v3366_v54 = vmul.f32 %v5068_v28, %v3360_v57 }
0x2b5a   :  { %2763 = vadd.xlane.f32.xlu1 %v2762_v29 }
0x2b5b   :  { %v3379_v35 = vmul.f32 %v3366_v54, %v3366_v54  ;;  %v5088_v54 = vld [vmem:[%s6324_s1 + $0x28] sm:$0xff] }
0x2b5d   :  { %v3380_v31 = vsel %vm91_vm1, %v3379_v35, 0.0 }
0x2b5e   :  { %3381 = vadd.xlane.f32.xlu1 %v3380_v31 }
0x2b6f   :  { %1268 = vrot.lane.b32.xlu1 %v5517_v46, %s5122_s29 }
0x2baa   :  { %v3661_v1 = vpop.f32.mrb[44].mxu0 }
0x2bab   :  { %v6193_v50 = vadd.f32 %v6083_v12, %v3661_v1  ;;  %v4475_v39 = vpop.f32.mrb[45].mxu0 }
0x2bad   :  { %v3676_v62 = vmul.f32 0.01, %v6193_v50  ;;  %3666 = vrot.lane.b32.xlu0 %v6193_v50, %s5122_s29 }
0x2bae   :  { %v4480_v10 = vpop.f32.mrb[46].mxu0 }
0x2baf   :  { %v3677_v60 = vadd.f32 %v3676_v62, %v6090_v22  ;;  %v3793_v0 = vadd.f32 %v4480_v10, %v6199_v47  ;;  %v3787_v12 = vpop.f32.mrb[47].mxu0 }
0x2bb0   :  { %v3788_v52 = vadd.f32 %v6199_v47, %v3787_v12 }
0x2bb1   :  { %v3827_v27 = vsub.f32 %v5084_v20, %v3793_v0  ;;  %1284 = vrot.lane.b32.xlu0 %v1282_v23, %s5121_s28  ;;  %v3687_v53 = vadd.f32 %v3685_v4, %v3677_v60 }
0x2bb2   :  { %v3826_v30 = vsub.f32 %v5085_v16, %v3788_v52  ;;  %v4483_v22 = vpop.f32.mrb[48].mxu0 }
0x2bb3   :  { %v3835_v34 = vmul.f32 -0.5, %v3827_v27  ;;  %v3893_v5 = vmul.f32 %v3827_v27, %v3827_v27  ;;  %v3803_v40 = vadd.f32 %v4483_v22, %v6199_v47  ;;  %v3797_v44 = vpop.f32.mrb[49].mxu0  ;;  %4488 = vmatmul.mubr.msk.f32.gmra.mrb[52].mxu0 %vm91_vm1, %v3687_v53 }
0x2bb4   :  { %v3834_v19 = vmul.f32 -0.5, %v3826_v30  ;;  %v3892_v3 = vmul.f32 %v3826_v30, %v3826_v30  ;;  %v3798_v45 = vadd.f32 %v6199_v47, %v3797_v44 }
0x2bb5   :  { %v3843_v63 = vmul.f32 %v3835_v34, %v3827_v27  ;;  %v3901_v48 = vsel %vm91_vm1, %v3893_v5, 0.0  ;;  %v3829_v9 = vsub.f32 %v5086_v49, %v3803_v40 }
0x2bb6   :  { %v3842_v58 = vmul.f32 %v3834_v19, %v3826_v30  ;;  %v3900_v56 = vsel %vm91_vm1, %v3892_v3, 0.0  ;;  %v3828_v15 = vsub.f32 %v5087_v51, %v3798_v45  ;;  %v4486_v41 = vpop.f32.mrb[50].mxu0 }
0x2bb7   :  { %v3851_v38 = vmul.f32 4.0, %v3843_v63  ;;  %v3902_v8 = vadd.f32 %v3901_v48, %v3900_v56  ;;  %v3837_v21 = vmul.f32 -0.5, %v3829_v9  ;;  %v3895_v4 = vmul.f32 %v3829_v9, %v3829_v9  ;;  %v3807_v43 = vpop.f32.mrb[51].mxu0  ;;  %v2431_v63 = vpop.permute.xlu0 %2430 }
0x2bb8   :  { %v3850_v7 = vmul.f32 4.0, %v3842_v58  ;;  %v3836_v25 = vmul.f32 -0.5, %v3828_v15  ;;  %v3894_v42 = vmul.f32 %v3828_v15, %v3828_v15  ;;  %v3813_v6 = vadd.f32 %v4486_v41, %v6199_v47 }
0x2bb9   :  { %v4051_v33 = vadd.f32 -0.22579135, %v3851_v38  ;;  %v3845_v11 = vmul.f32 %v3837_v21, %v3829_v9  ;;  %v3808_v57 = vadd.f32 %v6199_v47, %v3807_v43  ;;  %v3905_v10 = vsel %vm91_vm1, %v3895_v4, 0.0  ;;  %v5070_v9 = vpop.eup %5069 }
0x2bba   :  { %v4050_v24 = vadd.f32 -0.22579135, %v3850_v7  ;;  %v3844_v28 = vmul.f32 %v3836_v25, %v3828_v15  ;;  %v3903_v29 = vsel %vm91_vm1, %v3894_v42, 0.0  ;;  %v3831_v35 = vsub.f32 %v5088_v54, %v3813_v6  ;;  %v5072_v7 = vpop.eup %5071 }
0x2bbb   :  { %v3867_v31 = vsel %vm91_vm1, %v4051_v33, 0.0  ;;  %v3853_v17 = vmul.f32 4.0, %v3845_v11  ;;  %v3904_v1 = vadd.f32 %v3903_v29, %v3902_v8  ;;  %v3830_v39 = vsub.f32 %v5089_v32, %v3808_v57  ;;  %v3049_v4 = vpop.permute.xlu0 %3048  ;;  %v5074_v6 = vpop.eup %5073 }
0x2bbc   :  { %v3866_v62 = vsel %vm91_vm1, %v4050_v24, 0.0  ;;  %v3852_v60 = vmul.f32 4.0, %v3844_v28  ;;  %v3839_v0 = vmul.f32 -0.5, %v3831_v35  ;;  %v3897_v23 = vmul.f32 %v3831_v35, %v3831_v35  ;;  %v1298_v32 = vpop.permute.xlu1 %1297 }
0x2bbd   :  { %v3868_v12 = vadd.f32 %v3867_v31, %v3866_v62  ;;  %v3838_v52 = vmul.f32 -0.5, %v3830_v39  ;;  %v3896_v20 = vmul.f32 %v3830_v39, %v3830_v39  ;;  %v4053_v27 = vadd.f32 -0.22579135, %v3853_v17 }
0x2bbe   :  { %v4052_v53 = vadd.f32 -0.22579135, %v3852_v60  ;;  %v3847_v16 = vmul.f32 %v3839_v0, %v3831_v35  ;;  %v3906_v30 = vadd.f32 %v3905_v10, %v3904_v1  ;;  %v3909_v45 = vsel %vm91_vm1, %v3897_v23, 0.0 }
0x2bbf   :  { %v3846_v22 = vmul.f32 %v3838_v52, %v3830_v39  ;;  %v3907_v34 = vsel %vm91_vm1, %v3896_v20, 0.0  ;;  %v3871_v48 = vsel %vm91_vm1, %v4053_v27, 0.0  ;;  %v2124_v58 = vsub.f32 %v5839_v59, %v2122_v26  ;;  %v5091_v52 = vld [vmem:[%s6324_s1 + $0x30] sm:$0xff] }
0x2bc0   :  { %v3869_v5 = vsel %vm91_vm1, %v4052_v53, 0.0  ;;  %v3855_v40 = vmul.f32 4.0, %v3847_v16  ;;  %v3908_v44 = vadd.f32 %v3907_v34, %v3906_v30  ;;  %v2433_v8 = vsub.f32 %v5896_v13, %v2431_v63 }
0x2bc1   :  { %v3870_v19 = vadd.f32 %v3869_v5, %v3868_v12  ;;  %v3854_v3 = vmul.f32 4.0, %v3846_v22  ;;  %v2130_v38 = vmul.f32 %v5070_v9, %v2124_v58  ;;  %v3051_v42 = vsub.f32 %v6019_v36, %v3049_v4  ;;  %v5076_v36 = vpop.eup %5075  ;;  %v5090_v12 = vld [vmem:[%s6324_s1 + $0x38] sm:$0xff] }
0x2bc2   :  { %v3910_v49 = vadd.f32 %v3909_v45, %v3908_v44  ;;  %v4055_v56 = vadd.f32 -0.22579135, %v3855_v40  ;;  %v2439_v25 = vmul.f32 %v5072_v7, %v2433_v8  ;;  %v1272_v35 = vmul.f32 2.0, %v5517_v46 }
0x2bc3   :  { %v4054_v51 = vadd.f32 -0.22579135, %v3854_v3  ;;  %v3872_v15 = vadd.f32 %v3871_v48, %v3870_v19  ;;  %v2143_v59 = vmul.f32 %v2130_v38, %v2130_v38  ;;  %v3057_v33 = vmul.f32 %v5074_v6, %v3051_v42 }
0x2bc4   :  { %v3875_v21 = vsel %vm91_vm1, %v4055_v56, 0.0  ;;  %v2452_v2 = vmul.f32 %v2439_v25, %v2439_v25  ;;  %v1273_v1 = vmul.f32 1.442695, %v1272_v35 }
0x2bc5   :  { %v3873_v14 = vsel %vm91_vm1, %v4054_v51, 0.0  ;;  %v2144_v11 = vsel %vm91_vm1, %v2143_v59, 0.0  ;;  %v3070_v24 = vmul.f32 %v3057_v33, %v3057_v33 }
0x2bc6   :  { %v3874_v41 = vadd.f32 %v3873_v14, %v3872_v15  ;;  %v2453_v57 = vsel %vm91_vm1, %v2452_v2, 0.0  ;;  %5077 = vpow2.f32 %v1273_v1  ;;  %v1837_v15 = vpop.xlane.xlu1 %1836 }
0x2bc7   :  { %v3071_v13 = vsel %vm91_vm1, %v3070_v24, 0.0  ;;  %5079 = vrcp.f32 %v1298_v32  ;;  %v1838_v38 = vmul.f32 0.005, %v1837_v15 }
0x2bc8   :  { %v3876_v43 = vadd.f32 %v3875_v21, %v3874_v41 }
0x2bd0   :  { %2145 = vadd.xlane.f32.xlu0 %v2144_v11  ;;  %v5078_v26 = vpop.eup %5077 }
0x2bd1   :  { %v5080_v10 = vpop.eup %5079 }
0x2bd4   :  { %2454 = vadd.xlane.f32.xlu0 %v2453_v57 }
0x2bd8   :  { %3072 = vadd.xlane.f32.xlu0 %v3071_v13 }
0x2be7   :  { %v2764_v21 = vpop.xlane.xlu1 %2763 }
0x2be8   :  { %v2765_v25 = vmul.f32 0.005, %v2764_v21 }
0x2beb   :  { %v3382_v6 = vpop.xlane.xlu1 %3381 }
0x2bec   :  { %v3383_v11 = vmul.f32 0.005, %v3382_v6 }
0x2bef   :  { %v1269_v2 = vpop.permute.xlu1 %1268 }
0x2c1f   :  { %v3667_v28 = vpop.permute.xlu0 %3666 }
0x2c20   :  { %v3669_v29 = vsub.f32 %v6193_v50, %v3667_v28 }
0x2c22   :  { %v3675_v54 = vmul.f32 %v5076_v36, %v3669_v29 }
0x2c23   :  { %v1285_v39 = vpop.permute.xlu0 %1284 }
0x2c24   :  { %v3688_v31 = vmul.f32 %v3675_v54, %v3675_v54  ;;  %v1287_v62 = vadd.f32 %v5078_v26, %v1285_v39 }
0x2c26   :  { %v3689_v17 = vsel %vm91_vm1, %v3688_v31, 0.0  ;;  %v1301_v18 = vmul.f32 %v5080_v10, %v1287_v62 }
0x2c27   :  { %3690 = vadd.xlane.f32.xlu0 %v3689_v17 }
0x2c3d   :  { %1303 = vrot.lane.b32.xlu0 %v1301_v18, %s5122_s29 }
0x2c5d   :  { %v2146_v51 = vpop.xlane.xlu0 %2145 }
0x2c5e   :  { %v2147_v41 = vmul.f32 0.005, %v2146_v51 }
0x2c61   :  { %v2455_v14 = vpop.xlane.xlu0 %2454 }
0x2c62   :  { %v2456_v8 = vmul.f32 0.005, %v2455_v14 }
0x2c65   :  { %v3073_v7 = vpop.xlane.xlu0 %3072 }
0x2c66   :  { %v3074_v59 = vmul.f32 0.005, %v3073_v7 }
0x2c86   :  { %v4489_v50 = vpop.f32.mrb[52].mxu0 }
0x2c87   :  { %v3823_v60 = vadd.f32 %v4489_v50, %v6199_v47  ;;  %v3817_v0 = vpop.f32.mrb[53].mxu0 }
0x2c88   :  { %v3818_v46 = vadd.f32 %v6199_v47, %v3817_v0 }
0x2c89   :  { %v3833_v23 = vsub.f32 %v5090_v12, %v3823_v60 }
0x2c8a   :  { %v3832_v20 = vsub.f32 %v5091_v52, %v3818_v46 }
0x2c8b   :  { %v3841_v27 = vmul.f32 -0.5, %v3833_v23  ;;  %v3899_v30 = vmul.f32 %v3833_v23, %v3833_v23 }
0x2c8c   :  { %v3840_v53 = vmul.f32 -0.5, %v3832_v20  ;;  %v3898_v16 = vmul.f32 %v3832_v20, %v3832_v20 }
0x2c8d   :  { %v3849_v22 = vmul.f32 %v3841_v27, %v3833_v23  ;;  %v3913_v44 = vsel %vm91_vm1, %v3899_v30, 0.0 }
0x2c8e   :  { %v3848_v34 = vmul.f32 %v3840_v53, %v3832_v20  ;;  %v3911_v5 = vsel %vm91_vm1, %v3898_v16, 0.0 }
0x2c8f   :  { %v3912_v40 = vadd.f32 %v3911_v5, %v3910_v49  ;;  %v3857_v47 = vmul.f32 4.0, %v3849_v22  ;;  %v2148_v49 = vadd.f32 %v2147_v41, %v1838_v38 }
0x2c90   :  { %v3856_v19 = vmul.f32 4.0, %v3848_v34 }
0x2c91   :  { %v3914_v3 = vadd.f32 %v3913_v44, %v3912_v40  ;;  %v4057_v63 = vadd.f32 -0.22579135, %v3857_v47  ;;  %v2457_v4 = vadd.f32 %v2456_v8, %v2148_v49 }
0x2c92   :  { %v4056_v45 = vadd.f32 -0.22579135, %v3856_v19 }
0x2c93   :  { %v3879_v58 = vsel %vm91_vm1, %v4057_v63, 0.0  ;;  %v2766_v42 = vadd.f32 %v2765_v25, %v2457_v4 }
0x2c94   :  { %v3877_v48 = vsel %vm91_vm1, %v4056_v45, 0.0 }
0x2c95   :  { %v3878_v9 = vadd.f32 %v3877_v48, %v3876_v43  ;;  %v3075_v33 = vadd.f32 %v3074_v59, %v2766_v42  ;;  %v1265_v43 = vrot.slane %v6130_v61, %v1264_v55 }
0x2c97   :  { %v3880_v56 = vadd.f32 %v3879_v58, %v3878_v9  ;;  %v3384_v13 = vadd.f32 %v3383_v11, %v3075_v33  ;;  %v1271_v28 = vsub.f32 %v1265_v43, %v1269_v2 }
0x2cb4   :  { %v3691_v57 = vpop.xlane.xlu0 %3690 }
0x2cb5   :  { %v3692_v24 = vmul.f32 0.005, %v3691_v57 }
0x2cb7   :  { %v3693_v29 = vadd.f32 %v3692_v24, %v3384_v13 }
0x2cb8   :  { %v1304_v36 = vpop.permute.xlu0 %1303 }
0x2cb9   :  { %v1306_v54 = vadd.f32 %v1304_v36, %v1271_v28  ;;  %v3695_v35 = vsel %vm3694_vm0, %v3693_v29, 0.0 }
0x2cba   :  { %3696 = vadd.xlane.f32.xlu0 %v3695_v35 }
0x2cbb   :  { %v3985_v31 = vadd.f32 -0.5, %v1306_v54 }
0x2cbd   :  { %v1308_v17 = vsel %vm91_vm1, %v3985_v31, 0.0  ;;  %vm3929_vm1 = vcmask 15360  }
0x2cbe   :  { %1309 = vadd.xlane.f32.xlu1 %v1308_v17  ;;  %3915 = vadd.xlane.f32.xlu0 %v3914_v3 }
0x2cc2   :  { %3881 = vadd.xlane.f32.xlu1 %v3880_v56 }
0x2d47   :  { %v3697_v37 = vpop.xlane.xlu0 %3696 }
0x2d48   :  { %v3698_v61 = vrot.slane %v3697_v37, 4 }
0x2d4a   :  { %v3699_v55 = vadd.f32 %v3698_v61, %v3697_v37 }
0x2d4b   :  { %v1310_v1 = vpop.xlane.xlu1 %1309  ;;  %v3916_v32 = vpop.xlane.xlu0 %3915 }
0x2d4c   :  { %v3700_v39 = vrot.slane %v3699_v55, 2  ;;  %v1311_v26 = vrot.slane %v1310_v1, 4  ;;  %v3917_v62 = vrot.slane %v3916_v32, 4 }
0x2d4e   :  { %v1312_v10 = vadd.f32 %v1311_v26, %v1310_v1  ;;  %v3918_v18 = vadd.f32 %v3917_v62, %v3916_v32  ;;  %v3701_v60 = vadd.f32 %v3700_v39, %v3699_v55 }
0x2d4f   :  { %v3882_v50 = vpop.xlane.xlu1 %3881 }
0x2d50   :  { %v1313_v0 = vrot.slane %v1312_v10, 2  ;;  %v3919_v46 = vrot.slane %v3918_v18, 2  ;;  %v3883_v12 = vrot.slane %v3882_v50, 4  ;;  %v3702_v27 = vrot.slane %v3701_v60, 1 }
0x2d52   :  { %v3884_v23 = vadd.f32 %v3883_v12, %v3882_v50  ;;  %v1314_v52 = vadd.f32 %v1313_v0, %v1312_v10  ;;  %v3920_v20 = vadd.f32 %v3919_v46, %v3918_v18  ;;  %v3703_v34 = vadd.f32 %v3702_v27, %v3701_v60 }
0x2d54   :  { %v3885_v53 = vrot.slane %v3884_v23, 2  ;;  %v1315_v16 = vrot.slane %v1314_v52, 1  ;;  %v3921_v5 = vrot.slane %v3920_v20, 1 }
0x2d56   :  { %v3886_v30 = vadd.f32 %v3885_v53, %v3884_v23  ;;  %v1316_v22 = vadd.f32 %v1315_v16, %v1314_v52  ;;  %v3922_v44 = vadd.f32 %v3921_v5, %v3920_v20 }
0x2d58   :  { %4882 = vpush %v1316_v22  ;;  %v3887_v40 = vrot.slane %v3886_v30, 1 }
0x2d59   :  { %4884 = vpush %v3703_v34 }
0x2d5a   :  { %v3888_v47 = vadd.f32 %v3887_v40, %v3886_v30 }
0x2d5c   :  { %4886 = vpush %v3888_v47 }
0x2d5d   :  { %4888 = vpush %v3922_v44 }
0x2d89   :  { %s4883_s1 = spop %4882 }
0x2d8a   :  { %v1318_v19 = vstv %s4883_s1  ;;  %s4885_s29 = spop %4884 }
0x2d8b   :  { %v1320_v3 = vmul.f32 0.125, %v1318_v19  ;;  %v3705_v45 = vstv %s4885_s29 }
0x2d8c   :  { %v3706_v63 = vmul.f32 0.125, %v3705_v45 }
0x2d8d   :  { %s4887_s14 = spop %4886 }
0x2d8e   :  { %v3890_v48 = vstv %s4887_s14  ;;  %s4889_s30 = spop %4888  ;;  %v3927_v9 = vadd.f32 %v3706_v63, %v1320_v3 }
0x2d8f   :  { %v3891_v58 = vmul.f32 0.125, %v3890_v48  ;;  %v3924_v56 = vstv %s4889_s30 }
0x2d90   :  { %v3926_v51 = vmul.f32 0.00390625, %v3924_v56 }
0x2d91   :  { %v3928_v15 = vsel %vm3694_vm0, %v3891_v58, %v3927_v9 }
0x2d92   :  { %v3930_v14 = vsel %vm3929_vm1, %v3928_v15, %v3926_v51 }
0x2d93   :  { %3932 = vst.msk [vmem:[#allocation2] sm:$0x1] %vm3931_vm5, %v3930_v14 }
0x2d94   :  { %5103 = shalt.err (!%p5100_p4)
}
0x2d95   :  { %s5104_s19 = scalar_lea.hbm %s6310_s23, 16 }
0x2d96   :  { %p5105_p5 = scmp.ne.s32.totalorder %s6310_s23, %s5104_s19  ;;  %p5108_p6 = scmp.lt.u32.totalorder %s5104_s19, %s6310_s23 }
0x2d98   :  { %p5110_p7 = pnand %p5108_p6, %p5105_p5 }
0x2d9a   :  { %5113 = shalt.err (!%p5110_p7)
}
0x2d9b   :  { %3942 = dma.vmem_to_hbm [thread:$0]  %s3940_s24, 16, %s6310_s23, [#allocation3]  }
0x2d9c   :  { %5114 = dma.done.wait [#allocation3], 16  }
0x2d9d   :  { %5115 = vsyncadd [#allocation3], 4294967280 }
0x2d9e   :  { %3946 = vsyncpa [#allocation3], 1 }

</bundles_post_ra>
